<compile_context>
chip_gen: v6e
topology: v6e:2x2x1
jax: 0.10.0
libtpu: 0.0.40
codegen_flags: <defaults>
</compile_context>

<pallas_src>
import functools

import numpy as np
import jax
import jax.numpy as jnp
from jax.experimental import pallas as pl
from jax.experimental.pallas import tpu as pltpu


def _round_up(x, m):
    return (x + m - 1) // m * m


# ---------------------------------------------------------------------------
# Fused Pallas kernel: conv1 + BN(eval, folded) + ReLU + mask  ->  conv2 (in-kernel
# im2col via 9 selection matmuls) + channels_first sparse LayerNorm + mask.
# Shapes (demo): w1 (8,40)  p1 (40,128)  b1 (8,1)  m1 (1,128)
#                w2 (9,16,8)  b2/g2/bt2 (16,1)  s2 (9,128,128)  m2 (1,128)
#                o1 (8,128)  o2 (16,128)
# ---------------------------------------------------------------------------

def _fused_encoder_kernel(w1_ref, p1_ref, b1_ref, m1_ref,
                          w2_ref, b2_ref, g2_ref, bt2_ref, s2_ref, m2_ref,
                          o1_ref, o2_ref, *, eps2):
    hi = jax.lax.Precision.HIGHEST

    # ---- stage 1: SparseConv2d + folded eval-BN + ReLU + mask -------------------
    f1 = jnp.dot(w1_ref[...], p1_ref[...],
                 preferred_element_type=jnp.float32, precision=hi)
    f1 = jnp.maximum(f1 + b1_ref[...], 0.0) * m1_ref[...]      # ReLU(0)=0 commutes w/ mask
    o1_ref[...] = f1.astype(o1_ref.dtype)

    # ---- stage 2: conv via 9 per-tap selection matmuls on the resident f1 slab ----
    # p2_t[c, m2] = sum_m1 f1[c, m1] * S_t[m1, m2]; S_t is a {0,1} matrix encoding the
    # 3x3/s2/p1 gather (zero columns for conv padding and for the lane-padded tail).
    y = jnp.zeros(o2_ref.shape, jnp.float32)
    for t in range(9):                                          # static unrolled loop
        p2_t = jnp.dot(f1, s2_ref[t],
                       preferred_element_type=jnp.float32, precision=hi)
        y = y + jnp.dot(w2_ref[t], p2_t,
                        preferred_element_type=jnp.float32, precision=hi)
    y = y + b2_ref[...]

    # channels_first sparse LayerNorm (normalize over C = axis 0, per position).
    # Equivalent to the reference gather->LN->scatter because the mask is per-position
    # (broadcast over C): active columns see identical values, inactive ones are zeroed.
    mu = jnp.mean(y, axis=0, keepdims=True)
    var = jnp.mean((y - mu) ** 2, axis=0, keepdims=True)
    yn = (y - mu) * jax.lax.rsqrt(var + eps2)
    o2_ref[...] = ((yn * g2_ref[...] + bt2_ref[...]) * m2_ref[...]).astype(o2_ref.dtype)


def _fused_call(inputs, out_shapes, eps2):
    def full_spec(shape):
        nd = len(shape)
        return pl.BlockSpec(shape, lambda i, _nd=nd: (0,) * _nd)

    kernel = functools.partial(_fused_encoder_kernel, eps2=eps2)
    return pl.pallas_call(
        kernel,
        out_shape=tuple(jax.ShapeDtypeStruct(s, jnp.float32) for s in out_shapes),
        grid_spec=pl.GridSpec(
            grid=(1,),
            in_specs=[full_spec(a.shape) for a in inputs],
            out_specs=tuple(full_spec(s) for s in out_shapes),
        ),
        compiler_params=pltpu.CompilerParams(
            dimension_semantics=("arbitrary",),
            # Everything (selection tensor included) is < ~2 MiB; budget explicitly so the
            # same config fits v5e's 16 MiB / v7x's 32 MiB scoped-VMEM defaults.
            vmem_limit_bytes=16 * 1024 * 1024,
        ),
    )(*inputs)


# ---------------------------------------------------------------------------
# JAX / numpy glue (trace-time only): stage-1 im2col, weight flattening,
# mask downsampling (max_pool2d equivalent), tap-selection constant.
# ---------------------------------------------------------------------------

def _im2col_t_nchw(x, kh, kw, stride, pad):
    """Patches^T (kh*kw*C, B*Ho*Wo) built straight from NCHW (spatial axis lane-dense)."""
    B, C, H, W = x.shape
    xp = jnp.pad(x, ((0, 0), (0, 0), (pad, pad), (pad, pad)))
    Ho = (H + 2 * pad - kh) // stride + 1
    Wo = (W + 2 * pad - kw) // stride + 1
    taps = []
    for i in range(kh):
        for j in range(kw):
            taps.append(xp[:, :, i:i + stride * Ho:stride, j:j + stride * Wo:stride])
    t = jnp.stack(taps, axis=0)               # (kh*kw, B, C, Ho, Wo)
    t = jnp.transpose(t, (0, 2, 1, 3, 4))     # (kh*kw, C, B, Ho, Wo)
    return t.reshape(kh * kw * C, B * Ho * Wo), Ho, Wo


def _flatten_weight(w_oihw):
    # (Co, Cin, kh, kw) -> (Co, kh*kw*Cin); column = (di*kw + dj)*Cin + c
    co = w_oihw.shape[0]
    return jnp.transpose(w_oihw, (0, 2, 3, 1)).reshape(co, -1)


def downsample_mask(cur_active, target_h):
    # _get_active_ex_or_ii: max_pool2d(cur_active, k=scale, s=scale) > 0.5
    cur_h = cur_active.shape[2]
    if cur_h == target_h:
        return cur_active
    k = cur_h // target_h
    r = jax.lax.reduce_window(cur_active, -jnp.inf, jax.lax.max,
                              window_dimensions=(1, 1, k, k),
                              window_strides=(1, 1, k, k), padding='VALID')
    return (r > 0.5).astype(jnp.float32)


def _mask_lanes(mask_b1hw):
    # (B,1,H,W) -> (1, B*H*W) in (b,h,w) order on the 128-lane axis.
    return jnp.transpose(mask_b1hw, (0, 2, 3, 1)).reshape(1, -1)


def _build_tap_selection(B, H1, W1, H2, W2, M1p, M2p):
    """S[t, m1, m2] = 1 iff stage-2 output position m2 reads stage-1 position m1 at tap t
    (3x3, stride 2, pad 1). Built with numpy at trace time -> compile-time constant."""
    s = np.zeros((9, M1p, M2p), np.float32)
    for di in range(3):
        for dj in range(3):
            t = di * 3 + dj
            for b in range(B):
                for i2 in range(H2):
                    for j2 in range(W2):
                        i1 = 2 * i2 + di - 1
                        j1 = 2 * j2 + dj - 1
                        if 0 <= i1 < H1 and 0 <= j1 < W1:
                            s[t, b * H1 * W1 + i1 * W1 + j1,
                              b * H2 * W2 + i2 * W2 + j2] = 1.0
    return jnp.asarray(s)


# ---------------------------------------------------------------------------
# SparseEncoder forward (hierarchical=True -> list of stage feature maps, NCHW)
# ---------------------------------------------------------------------------

def sparse_encoder_forward(x_nchw, params, cur_active):
    B, Cin, H, W = x_nchw.shape
    C1 = params['w1'].shape[0]
    C2 = params['w2'].shape[0]
    H1, W1 = H // 2, W // 2
    H2, W2 = H1 // 2, W1 // 2
    M1, M2 = B * H1 * W1, B * H2 * W2
    M1p, M2p = _round_up(M1, 128), _round_up(M2, 128)     # lane-dense (unmasked vst)
    K1, K1p = 9 * Cin, _round_up(9 * Cin, 8)               # 36 -> 40 sublanes

    # stage-1 patches (single pass over x).  TODO(synk): in-kernel shifted-matmul im2col
    # at scaled-up shapes to remove the 9x read amplification.
    p1, _, _ = _im2col_t_nchw(x_nchw, 3, 3, 2, 1)           # (36, M1)
    p1 = jnp.pad(p1, ((0, K1p - K1), (0, M1p - M1)))

    # fold eval-mode BN (running stats) into the stage-1 weight/bias
    scale1 = params['g1'] / jnp.sqrt(params['rv1'] + 1e-5)
    w1f = scale1[:, None] * _flatten_weight(params['w1'])
    w1f = jnp.pad(w1f, ((0, 0), (0, K1p - K1)))             # (C1, 40)
    b1f = (scale1 * (params['b1'] - params['rm1']) + params['bt1'])[:, None]

    m1 = jnp.pad(_mask_lanes(downsample_mask(cur_active, H1)), ((0, 0), (0, M1p - M1)))
    m2 = jnp.pad(_mask_lanes(downsample_mask(cur_active, H2)), ((0, 0), (0, M2p - M2)))

    w2t = jnp.transpose(params['w2'], (2, 3, 0, 1)).reshape(9, C2, C1)   # per-tap (C2,C1)
    s2 = _build_tap_selection(B, H1, W1, H2, W2, M1p, M2p)               # (9, M1p, M2p)

    inputs = [w1f, p1, b1f, m1,
              w2t, params['b2'][:, None], params['g2'][:, None],
              params['bt2'][:, None], s2, m2]
    o1, o2 = _fused_call(inputs, [(C1, M1p), (C2, M2p)], eps2=1e-6)

    feat1 = o1[:, :M1].reshape(C1, B, H1, W1).transpose(1, 0, 2, 3)      # NCHW
    feat2 = o2[:, :M2].reshape(C2, B, H2, W2).transpose(1, 0, 2, 3)      # NCHW
    return [feat1, feat2]


# ---------------------------------------------------------------------------
# Pure-JAX f32 reference (mirrors the PyTorch semantics) for correctness check
# ---------------------------------------------------------------------------

def reference_forward(x_nchw, params, cur_active):
    def conv(x, w, b, s, p):
        y = jax.lax.conv_general_dilated(
            x, w, (s, s), ((p, p), (p, p)),
            dimension_numbers=('NCHW', 'OIHW', 'NCHW'),
            precision=jax.lax.Precision.HIGHEST)
        return y + b[None, :, None, None]

    y1 = conv(x_nchw, params['w1'], params['b1'], 2, 1)
    m1 = downsample_mask(cur_active, y1.shape[2])
    y1 = y1 * m1
    scale = params['g1'] / jnp.sqrt(params['rv1'] + 1e-5)
    shift = params['bt1'] - params['rm1'] * scale
    f1 = jnp.maximum(y1 * scale[None, :, None, None] + shift[None, :, None, None], 0.0) * m1

    y2 = conv(f1, params['w2'], params['b2'], 2, 1)
    m2 = downsample_mask(cur_active, y2.shape[2])
    y2 = y2 * m2
    mu = jnp.mean(y2, axis=1, keepdims=True)
    var = jnp.mean((y2 - mu) ** 2, axis=1, keepdims=True)
    f2 = (y2 - mu) / jnp.sqrt(var + 1e-6)
    f2 = f2 * params['g2'][None, :, None, None] + params['bt2'][None, :, None, None]
    f2 = f2 * m2
    return [f1, f2]


# ---------------------------------------------------------------------------

if __name__ == "__main__":
    key = jax.random.PRNGKey(0)
    ks = jax.random.split(key, 13)

    params = {
        'w1': 0.1 * jax.random.normal(ks[0], (8, 4, 3, 3), jnp.float32),
        'b1': 0.1 * jax.random.normal(ks[1], (8,), jnp.float32),
        'g1': 1.0 + 0.1 * jax.random.normal(ks[2], (8,), jnp.float32),
        'bt1': 0.1 * jax.random.normal(ks[3], (8,), jnp.float32),
        'rm1': 0.1 * jax.random.normal(ks[4], (8,), jnp.float32),
        'rv1': 1.0 + 0.1 * jnp.abs(jax.random.normal(ks[5], (8,), jnp.float32)),
        'w2': 0.1 * jax.random.normal(ks[6], (16, 8, 3, 3), jnp.float32),
        'b2': 0.1 * jax.random.normal(ks[7], (16,), jnp.float32),
        'g2': 1.0 + 0.1 * jax.random.normal(ks[8], (16,), jnp.float32),
        'bt2': 0.1 * jax.random.normal(ks[9], (16,), jnp.float32),
    }

    # input: (B=2, C=4, 16, 16) NCHW, like the PyTorch module
    x = jax.random.normal(ks[10], (2, 4, 16, 16), jnp.float32)

    # _cur_active: binary mask at input resolution; patches of size 4 (= downsample ratio)
    patch_mask = (jax.random.uniform(ks[11], (2, 1, 4, 4)) < 0.6).astype(jnp.float32)
    cur_active = jnp.repeat(jnp.repeat(patch_mask, 4, axis=2), 4, axis=3)  # (2,1,16,16)

    fwd = jax.jit(sparse_encoder_forward)
    feats = fwd(x, params, cur_active)
    feats = jax.block_until_ready(feats)

    refs = reference_forward(x, params, cur_active)

    # Sparse gather/scatter semantics: masked-out positions must be exactly zero.
    for f in feats:
        m = downsample_mask(cur_active, f.shape[2])
        assert float(jnp.max(jnp.abs(f * (1.0 - m)))) == 0.0, "inactive positions not zero"

    # Numeric check vs the f32 reference.  All kernel matmuls run at Precision.HIGHEST
    # (MXU is ~2% utilized here, so the f32 path costs nothing), so tolerances are tight.
    tols = [5e-3, 5e-3]
    for f, r, tol in zip(feats, refs, tols):
        assert f.shape == r.shape, (f.shape, r.shape)
        max_err = float(jnp.max(jnp.abs(f - r)))
        mean_err = float(jnp.mean(jnp.abs(f - r)))
        assert max_err < tol, f"mismatch, max abs err = {max_err} (tol {tol})"
        assert mean_err < 5e-4, f"mismatch, mean abs err = {mean_err}"

    print("KERNEL_OK")
</pallas_src>

<mosaic_0001>
module attributes {stable_mosaic.version = 11 : i64} {
  func.func @_fused_encoder_kernel(%arg0: i32, %arg1: memref<8x40xf32, #tpu.memory_space<vmem>>, %arg2: memref<40x128xf32, #tpu.memory_space<vmem>>, %arg3: memref<8x1xf32, #tpu.memory_space<vmem>>, %arg4: memref<1x128xf32, #tpu.memory_space<vmem>>, %arg5: memref<9x16x8xf32, #tpu.memory_space<vmem>>, %arg6: memref<16x1xf32, #tpu.memory_space<vmem>>, %arg7: memref<16x1xf32, #tpu.memory_space<vmem>>, %arg8: memref<16x1xf32, #tpu.memory_space<vmem>>, %arg9: memref<9x128x128xf32, #tpu.memory_space<vmem>>, %arg10: memref<1x128xf32, #tpu.memory_space<vmem>>, %arg11: memref<8x128xf32, #tpu.memory_space<vmem>>, %arg12: memref<16x128xf32, #tpu.memory_space<vmem>>) attributes {dimension_semantics = [#tpu.dimension_semantics<arbitrary>], iteration_bounds = array<i64: 1>, scalar_prefetch = 0 : i64, scratch_operands = 0 : i64, tpu.core_type = #tpu.core_type<tc>, window_params = [{pipeline_mode = #tpu.pipeline_mode<synchronous>, transform_indices = @transform_0, window_bounds = array<i64: 8, 40>}, {pipeline_mode = #tpu.pipeline_mode<synchronous>, transform_indices = @transform_1, window_bounds = array<i64: 40, 128>}, {pipeline_mode = #tpu.pipeline_mode<synchronous>, transform_indices = @transform_2, window_bounds = array<i64: 8, 1>}, {pipeline_mode = #tpu.pipeline_mode<synchronous>, transform_indices = @transform_3, window_bounds = array<i64: 1, 128>}, {pipeline_mode = #tpu.pipeline_mode<synchronous>, transform_indices = @transform_4, window_bounds = array<i64: 9, 16, 8>}, {pipeline_mode = #tpu.pipeline_mode<synchronous>, transform_indices = @transform_5, window_bounds = array<i64: 16, 1>}, {pipeline_mode = #tpu.pipeline_mode<synchronous>, transform_indices = @transform_6, window_bounds = array<i64: 16, 1>}, {pipeline_mode = #tpu.pipeline_mode<synchronous>, transform_indices = @transform_7, window_bounds = array<i64: 16, 1>}, {pipeline_mode = #tpu.pipeline_mode<synchronous>, transform_indices = @transform_8, window_bounds = array<i64: 9, 128, 128>}, {pipeline_mode = #tpu.pipeline_mode<synchronous>, transform_indices = @transform_9, window_bounds = array<i64: 1, 128>}, {pipeline_mode = #tpu.pipeline_mode<synchronous>, transform_indices = @transform_10, window_bounds = array<i64: 8, 128>}, {pipeline_mode = #tpu.pipeline_mode<synchronous>, transform_indices = @transform_11, window_bounds = array<i64: 16, 128>}]} {
    %c0 = arith.constant 0 : index
    %c0_0 = arith.constant 0 : index
    %0 = vector.load %arg1[%c0, %c0_0] : memref<8x40xf32, #tpu.memory_space<vmem>>, vector<8x40xf32>
    %c0_1 = arith.constant 0 : index
    %c0_2 = arith.constant 0 : index
    %1 = vector.load %arg2[%c0_1, %c0_2] : memref<40x128xf32, #tpu.memory_space<vmem>>, vector<40x128xf32>
    %cst = arith.constant dense<0.000000e+00> : vector<8x128xf32>
    %2 = tpu.matmul %0, %1, %cst {dimension_numbers = #tpu.dot_dimension_numbers<[1], [0], [0], [1], [0, 0, 1, 1], [], []>, precision = #tpu.contract_precision<fp32>} : vector<8x40xf32>, vector<40x128xf32>, vector<8x128xf32> -> vector<8x128xf32>
    %c0_3 = arith.constant 0 : index
    %c0_4 = arith.constant 0 : index
    %3 = vector.load %arg3[%c0_3, %c0_4] : memref<8x1xf32, #tpu.memory_space<vmem>>, vector<8x1xf32>
    %4 = vector.broadcast %3 : vector<8x1xf32> to vector<8x128xf32>
    %5 = arith.addf %2, %4 : vector<8x128xf32>
    %cst_5 = arith.constant 0.000000e+00 : f32
    %6 = vector.broadcast %cst_5 : f32 to vector<8x128xf32>
    %7 = arith.maximumf %5, %6 : vector<8x128xf32>
    %c0_6 = arith.constant 0 : index
    %c0_7 = arith.constant 0 : index
    %8 = vector.load %arg4[%c0_6, %c0_7] : memref<1x128xf32, #tpu.memory_space<vmem>>, vector<1x128xf32>
    %9 = vector.broadcast %8 : vector<1x128xf32> to vector<8x128xf32>
    %10 = arith.mulf %7, %9 : vector<8x128xf32>
    %c0_8 = arith.constant 0 : index
    %c0_9 = arith.constant 0 : index
    %11 = vector.load %arg11[%c0_8, %c0_9] : memref<8x128xf32, #tpu.memory_space<vmem>>, vector<8x128xf32>
    tpu.vector_store %arg11[%c0_8, %c0_9], %10 {strides = array<i32>} : memref<8x128xf32, #tpu.memory_space<vmem>>, vector<8x128xf32>,
    %cst_10 = arith.constant 0.000000e+00 : f32
    %12 = vector.broadcast %cst_10 : f32 to vector<16x128xf32>
    %c0_11 = arith.constant 0 : index
    %c0_12 = arith.constant 0 : index
    %c0_13 = arith.constant 0 : index
    %13 = vector.load %arg9[%c0_11, %c0_12, %c0_13] : memref<9x128x128xf32, #tpu.memory_space<vmem>>, vector<1x128x128xf32>
    %14 = vector.shape_cast %13 : vector<1x128x128xf32> to vector<128x128xf32>
    %cst_14 = arith.constant dense<0.000000e+00> : vector<8x128xf32>
    %15 = tpu.matmul %10, %14, %cst_14 {dimension_numbers = #tpu.dot_dimension_numbers<[1], [0], [0], [1], [0, 0, 1, 1], [], []>, precision = #tpu.contract_precision<fp32>} : vector<8x128xf32>, vector<128x128xf32>, vector<8x128xf32> -> vector<8x128xf32>
    %c0_15 = arith.constant 0 : index
    %c0_16 = arith.constant 0 : index
    %c0_17 = arith.constant 0 : index
    %16 = vector.load %arg5[%c0_15, %c0_16, %c0_17] : memref<9x16x8xf32, #tpu.memory_space<vmem>>, vector<1x16x8xf32>
    %17 = vector.shape_cast %16 : vector<1x16x8xf32> to vector<16x8xf32>
    %cst_18 = arith.constant dense<0.000000e+00> : vector<16x128xf32>
    %18 = tpu.matmul %17, %15, %cst_18 {dimension_numbers = #tpu.dot_dimension_numbers<[1], [0], [0], [1], [0, 0, 1, 1], [], []>, precision = #tpu.contract_precision<fp32>} : vector<16x8xf32>, vector<8x128xf32>, vector<16x128xf32> -> vector<16x128xf32>
    %19 = arith.addf %12, %18 : vector<16x128xf32>
    %c1 = arith.constant 1 : index
    %c0_19 = arith.constant 0 : index
    %c0_20 = arith.constant 0 : index
    %20 = vector.load %arg9[%c1, %c0_19, %c0_20] : memref<9x128x128xf32, #tpu.memory_space<vmem>>, vector<1x128x128xf32>
    %21 = vector.shape_cast %20 : vector<1x128x128xf32> to vector<128x128xf32>
    %cst_21 = arith.constant dense<0.000000e+00> : vector<8x128xf32>
    %22 = tpu.matmul %10, %21, %cst_21 {dimension_numbers = #tpu.dot_dimension_numbers<[1], [0], [0], [1], [0, 0, 1, 1], [], []>, precision = #tpu.contract_precision<fp32>} : vector<8x128xf32>, vector<128x128xf32>, vector<8x128xf32> -> vector<8x128xf32>
    %c1_22 = arith.constant 1 : index
    %c0_23 = arith.constant 0 : index
    %c0_24 = arith.constant 0 : index
    %23 = vector.load %arg5[%c1_22, %c0_23, %c0_24] : memref<9x16x8xf32, #tpu.memory_space<vmem>>, vector<1x16x8xf32>
    %24 = vector.shape_cast %23 : vector<1x16x8xf32> to vector<16x8xf32>
    %cst_25 = arith.constant dense<0.000000e+00> : vector<16x128xf32>
    %25 = tpu.matmul %24, %22, %cst_25 {dimension_numbers = #tpu.dot_dimension_numbers<[1], [0], [0], [1], [0, 0, 1, 1], [], []>, precision = #tpu.contract_precision<fp32>} : vector<16x8xf32>, vector<8x128xf32>, vector<16x128xf32> -> vector<16x128xf32>
    %26 = arith.addf %19, %25 : vector<16x128xf32>
    %c2 = arith.constant 2 : index
    %c0_26 = arith.constant 0 : index
    %c0_27 = arith.constant 0 : index
    %27 = vector.load %arg9[%c2, %c0_26, %c0_27] : memref<9x128x128xf32, #tpu.memory_space<vmem>>, vector<1x128x128xf32>
    %28 = vector.shape_cast %27 : vector<1x128x128xf32> to vector<128x128xf32>
    %cst_28 = arith.constant dense<0.000000e+00> : vector<8x128xf32>
    %29 = tpu.matmul %10, %28, %cst_28 {dimension_numbers = #tpu.dot_dimension_numbers<[1], [0], [0], [1], [0, 0, 1, 1], [], []>, precision = #tpu.contract_precision<fp32>} : vector<8x128xf32>, vector<128x128xf32>, vector<8x128xf32> -> vector<8x128xf32>
    %c2_29 = arith.constant 2 : index
    %c0_30 = arith.constant 0 : index
    %c0_31 = arith.constant 0 : index
    %30 = vector.load %arg5[%c2_29, %c0_30, %c0_31] : memref<9x16x8xf32, #tpu.memory_space<vmem>>, vector<1x16x8xf32>
    %31 = vector.shape_cast %30 : vector<1x16x8xf32> to vector<16x8xf32>
    %cst_32 = arith.constant dense<0.000000e+00> : vector<16x128xf32>
    %32 = tpu.matmul %31, %29, %cst_32 {dimension_numbers = #tpu.dot_dimension_numbers<[1], [0], [0], [1], [0, 0, 1, 1], [], []>, precision = #tpu.contract_precision<fp32>} : vector<16x8xf32>, vector<8x128xf32>, vector<16x128xf32> -> vector<16x128xf32>
    %33 = arith.addf %26, %32 : vector<16x128xf32>
    %c3 = arith.constant 3 : index
    %c0_33 = arith.constant 0 : index
    %c0_34 = arith.constant 0 : index
    %34 = vector.load %arg9[%c3, %c0_33, %c0_34] : memref<9x128x128xf32, #tpu.memory_space<vmem>>, vector<1x128x128xf32>
    %35 = vector.shape_cast %34 : vector<1x128x128xf32> to vector<128x128xf32>
    %cst_35 = arith.constant dense<0.000000e+00> : vector<8x128xf32>
    %36 = tpu.matmul %10, %35, %cst_35 {dimension_numbers = #tpu.dot_dimension_numbers<[1], [0], [0], [1], [0, 0, 1, 1], [], []>, precision = #tpu.contract_precision<fp32>} : vector<8x128xf32>, vector<128x128xf32>, vector<8x128xf32> -> vector<8x128xf32>
    %c3_36 = arith.constant 3 : index
    %c0_37 = arith.constant 0 : index
    %c0_38 = arith.constant 0 : index
    %37 = vector.load %arg5[%c3_36, %c0_37, %c0_38] : memref<9x16x8xf32, #tpu.memory_space<vmem>>, vector<1x16x8xf32>
    %38 = vector.shape_cast %37 : vector<1x16x8xf32> to vector<16x8xf32>
    %cst_39 = arith.constant dense<0.000000e+00> : vector<16x128xf32>
    %39 = tpu.matmul %38, %36, %cst_39 {dimension_numbers = #tpu.dot_dimension_numbers<[1], [0], [0], [1], [0, 0, 1, 1], [], []>, precision = #tpu.contract_precision<fp32>} : vector<16x8xf32>, vector<8x128xf32>, vector<16x128xf32> -> vector<16x128xf32>
    %40 = arith.addf %33, %39 : vector<16x128xf32>
    %c4 = arith.constant 4 : index
    %c0_40 = arith.constant 0 : index
    %c0_41 = arith.constant 0 : index
    %41 = vector.load %arg9[%c4, %c0_40, %c0_41] : memref<9x128x128xf32, #tpu.memory_space<vmem>>, vector<1x128x128xf32>
    %42 = vector.shape_cast %41 : vector<1x128x128xf32> to vector<128x128xf32>
    %cst_42 = arith.constant dense<0.000000e+00> : vector<8x128xf32>
    %43 = tpu.matmul %10, %42, %cst_42 {dimension_numbers = #tpu.dot_dimension_numbers<[1], [0], [0], [1], [0, 0, 1, 1], [], []>, precision = #tpu.contract_precision<fp32>} : vector<8x128xf32>, vector<128x128xf32>, vector<8x128xf32> -> vector<8x128xf32>
    %c4_43 = arith.constant 4 : index
    %c0_44 = arith.constant 0 : index
    %c0_45 = arith.constant 0 : index
    %44 = vector.load %arg5[%c4_43, %c0_44, %c0_45] : memref<9x16x8xf32, #tpu.memory_space<vmem>>, vector<1x16x8xf32>
    %45 = vector.shape_cast %44 : vector<1x16x8xf32> to vector<16x8xf32>
    %cst_46 = arith.constant dense<0.000000e+00> : vector<16x128xf32>
    %46 = tpu.matmul %45, %43, %cst_46 {dimension_numbers = #tpu.dot_dimension_numbers<[1], [0], [0], [1], [0, 0, 1, 1], [], []>, precision = #tpu.contract_precision<fp32>} : vector<16x8xf32>, vector<8x128xf32>, vector<16x128xf32> -> vector<16x128xf32>
    %47 = arith.addf %40, %46 : vector<16x128xf32>
    %c5 = arith.constant 5 : index
    %c0_47 = arith.constant 0 : index
    %c0_48 = arith.constant 0 : index
    %48 = vector.load %arg9[%c5, %c0_47, %c0_48] : memref<9x128x128xf32, #tpu.memory_space<vmem>>, vector<1x128x128xf32>
    %49 = vector.shape_cast %48 : vector<1x128x128xf32> to vector<128x128xf32>
    %cst_49 = arith.constant dense<0.000000e+00> : vector<8x128xf32>
    %50 = tpu.matmul %10, %49, %cst_49 {dimension_numbers = #tpu.dot_dimension_numbers<[1], [0], [0], [1], [0, 0, 1, 1], [], []>, precision = #tpu.contract_precision<fp32>} : vector<8x128xf32>, vector<128x128xf32>, vector<8x128xf32> -> vector<8x128xf32>
    %c5_50 = arith.constant 5 : index
    %c0_51 = arith.constant 0 : index
    %c0_52 = arith.constant 0 : index
    %51 = vector.load %arg5[%c5_50, %c0_51, %c0_52] : memref<9x16x8xf32, #tpu.memory_space<vmem>>, vector<1x16x8xf32>
    %52 = vector.shape_cast %51 : vector<1x16x8xf32> to vector<16x8xf32>
    %cst_53 = arith.constant dense<0.000000e+00> : vector<16x128xf32>
    %53 = tpu.matmul %52, %50, %cst_53 {dimension_numbers = #tpu.dot_dimension_numbers<[1], [0], [0], [1], [0, 0, 1, 1], [], []>, precision = #tpu.contract_precision<fp32>} : vector<16x8xf32>, vector<8x128xf32>, vector<16x128xf32> -> vector<16x128xf32>
    %54 = arith.addf %47, %53 : vector<16x128xf32>
    %c6 = arith.constant 6 : index
    %c0_54 = arith.constant 0 : index
    %c0_55 = arith.constant 0 : index
    %55 = vector.load %arg9[%c6, %c0_54, %c0_55] : memref<9x128x128xf32, #tpu.memory_space<vmem>>, vector<1x128x128xf32>
    %56 = vector.shape_cast %55 : vector<1x128x128xf32> to vector<128x128xf32>
    %cst_56 = arith.constant dense<0.000000e+00> : vector<8x128xf32>
    %57 = tpu.matmul %10, %56, %cst_56 {dimension_numbers = #tpu.dot_dimension_numbers<[1], [0], [0], [1], [0, 0, 1, 1], [], []>, precision = #tpu.contract_precision<fp32>} : vector<8x128xf32>, vector<128x128xf32>, vector<8x128xf32> -> vector<8x128xf32>
    %c6_57 = arith.constant 6 : index
    %c0_58 = arith.constant 0 : index
    %c0_59 = arith.constant 0 : index
    %58 = vector.load %arg5[%c6_57, %c0_58, %c0_59] : memref<9x16x8xf32, #tpu.memory_space<vmem>>, vector<1x16x8xf32>
    %59 = vector.shape_cast %58 : vector<1x16x8xf32> to vector<16x8xf32>
    %cst_60 = arith.constant dense<0.000000e+00> : vector<16x128xf32>
    %60 = tpu.matmul %59, %57, %cst_60 {dimension_numbers = #tpu.dot_dimension_numbers<[1], [0], [0], [1], [0, 0, 1, 1], [], []>, precision = #tpu.contract_precision<fp32>} : vector<16x8xf32>, vector<8x128xf32>, vector<16x128xf32> -> vector<16x128xf32>
    %61 = arith.addf %54, %60 : vector<16x128xf32>
    %c7 = arith.constant 7 : index
    %c0_61 = arith.constant 0 : index
    %c0_62 = arith.constant 0 : index
    %62 = vector.load %arg9[%c7, %c0_61, %c0_62] : memref<9x128x128xf32, #tpu.memory_space<vmem>>, vector<1x128x128xf32>
    %63 = vector.shape_cast %62 : vector<1x128x128xf32> to vector<128x128xf32>
    %cst_63 = arith.constant dense<0.000000e+00> : vector<8x128xf32>
    %64 = tpu.matmul %10, %63, %cst_63 {dimension_numbers = #tpu.dot_dimension_numbers<[1], [0], [0], [1], [0, 0, 1, 1], [], []>, precision = #tpu.contract_precision<fp32>} : vector<8x128xf32>, vector<128x128xf32>, vector<8x128xf32> -> vector<8x128xf32>
    %c7_64 = arith.constant 7 : index
    %c0_65 = arith.constant 0 : index
    %c0_66 = arith.constant 0 : index
    %65 = vector.load %arg5[%c7_64, %c0_65, %c0_66] : memref<9x16x8xf32, #tpu.memory_space<vmem>>, vector<1x16x8xf32>
    %66 = vector.shape_cast %65 : vector<1x16x8xf32> to vector<16x8xf32>
    %cst_67 = arith.constant dense<0.000000e+00> : vector<16x128xf32>
    %67 = tpu.matmul %66, %64, %cst_67 {dimension_numbers = #tpu.dot_dimension_numbers<[1], [0], [0], [1], [0, 0, 1, 1], [], []>, precision = #tpu.contract_precision<fp32>} : vector<16x8xf32>, vector<8x128xf32>, vector<16x128xf32> -> vector<16x128xf32>
    %68 = arith.addf %61, %67 : vector<16x128xf32>
    %c8 = arith.constant 8 : index
    %c0_68 = arith.constant 0 : index
    %c0_69 = arith.constant 0 : index
    %69 = vector.load %arg9[%c8, %c0_68, %c0_69] : memref<9x128x128xf32, #tpu.memory_space<vmem>>, vector<1x128x128xf32>
    %70 = vector.shape_cast %69 : vector<1x128x128xf32> to vector<128x128xf32>
    %cst_70 = arith.constant dense<0.000000e+00> : vector<8x128xf32>
    %71 = tpu.matmul %10, %70, %cst_70 {dimension_numbers = #tpu.dot_dimension_numbers<[1], [0], [0], [1], [0, 0, 1, 1], [], []>, precision = #tpu.contract_precision<fp32>} : vector<8x128xf32>, vector<128x128xf32>, vector<8x128xf32> -> vector<8x128xf32>
    %c8_71 = arith.constant 8 : index
    %c0_72 = arith.constant 0 : index
    %c0_73 = arith.constant 0 : index
    %72 = vector.load %arg5[%c8_71, %c0_72, %c0_73] : memref<9x16x8xf32, #tpu.memory_space<vmem>>, vector<1x16x8xf32>
    %73 = vector.shape_cast %72 : vector<1x16x8xf32> to vector<16x8xf32>
    %cst_74 = arith.constant dense<0.000000e+00> : vector<16x128xf32>
    %74 = tpu.matmul %73, %71, %cst_74 {dimension_numbers = #tpu.dot_dimension_numbers<[1], [0], [0], [1], [0, 0, 1, 1], [], []>, precision = #tpu.contract_precision<fp32>} : vector<16x8xf32>, vector<8x128xf32>, vector<16x128xf32> -> vector<16x128xf32>
    %75 = arith.addf %68, %74 : vector<16x128xf32>
    %c0_75 = arith.constant 0 : index
    %c0_76 = arith.constant 0 : index
    %76 = vector.load %arg6[%c0_75, %c0_76] : memref<16x1xf32, #tpu.memory_space<vmem>>, vector<16x1xf32>
    %77 = vector.broadcast %76 : vector<16x1xf32> to vector<16x128xf32>
    %78 = arith.addf %75, %77 : vector<16x128xf32>
    %cst_77 = arith.constant dense<0.000000e+00> : vector<128xf32>
    %79 = vector.multi_reduction <add>, %78, %cst_77 [0] : vector<16x128xf32> to vector<128xf32>
    %80 = vector.shape_cast %79 : vector<128xf32> to vector<1x128xf32>
    %cst_78 = arith.constant 1.600000e+01 : f32
    %81 = vector.broadcast %cst_78 : f32 to vector<1x128xf32>
    %82 = arith.divf %80, %81 : vector<1x128xf32>
    %83 = vector.broadcast %82 : vector<1x128xf32> to vector<16x128xf32>
    %84 = arith.subf %78, %83 : vector<16x128xf32>
    %85 = arith.mulf %84, %84 : vector<16x128xf32>
    %cst_79 = arith.constant dense<0.000000e+00> : vector<128xf32>
    %86 = vector.multi_reduction <add>, %85, %cst_79 [0] : vector<16x128xf32> to vector<128xf32>
    %87 = vector.shape_cast %86 : vector<128xf32> to vector<1x128xf32>
    %cst_80 = arith.constant 1.600000e+01 : f32
    %88 = vector.broadcast %cst_80 : f32 to vector<1x128xf32>
    %89 = arith.divf %87, %88 : vector<1x128xf32>
    %90 = vector.broadcast %82 : vector<1x128xf32> to vector<16x128xf32>
    %91 = arith.subf %78, %90 : vector<16x128xf32>
    %cst_81 = arith.constant 9.99999997E-7 : f32
    %92 = vector.broadcast %cst_81 : f32 to vector<1x128xf32>
    %93 = arith.addf %89, %92 : vector<1x128xf32>
    %94 = math.rsqrt %93 : vector<1x128xf32>
    %95 = vector.broadcast %94 : vector<1x128xf32> to vector<16x128xf32>
    %96 = arith.mulf %91, %95 : vector<16x128xf32>
    %c0_82 = arith.constant 0 : index
    %c0_83 = arith.constant 0 : index
    %97 = vector.load %arg7[%c0_82, %c0_83] : memref<16x1xf32, #tpu.memory_space<vmem>>, vector<16x1xf32>
    %98 = vector.broadcast %97 : vector<16x1xf32> to vector<16x128xf32>
    %99 = arith.mulf %96, %98 : vector<16x128xf32>
    %c0_84 = arith.constant 0 : index
    %c0_85 = arith.constant 0 : index
    %100 = vector.load %arg8[%c0_84, %c0_85] : memref<16x1xf32, #tpu.memory_space<vmem>>, vector<16x1xf32>
    %101 = vector.broadcast %100 : vector<16x1xf32> to vector<16x128xf32>
    %102 = arith.addf %99, %101 : vector<16x128xf32>
    %c0_86 = arith.constant 0 : index
    %c0_87 = arith.constant 0 : index
    %103 = vector.load %arg10[%c0_86, %c0_87] : memref<1x128xf32, #tpu.memory_space<vmem>>, vector<1x128xf32>
    %104 = vector.broadcast %103 : vector<1x128xf32> to vector<16x128xf32>
    %105 = arith.mulf %102, %104 : vector<16x128xf32>
    %c0_88 = arith.constant 0 : index
    %c0_89 = arith.constant 0 : index
    %106 = vector.load %arg12[%c0_88, %c0_89] : memref<16x128xf32, #tpu.memory_space<vmem>>, vector<16x128xf32>
    tpu.vector_store %arg12[%c0_88, %c0_89], %105 {strides = array<i32>} : memref<16x128xf32, #tpu.memory_space<vmem>>, vector<16x128xf32>,
    return
  }
  func.func @transform_0(%arg0: i32) -> (i32, i32) {
    %c0_i32 = arith.constant 0 : i32
    %c0_i32_0 = arith.constant 0 : i32
    %c0_i32_1 = arith.constant 0 : i32
    return %c0_i32, %c0_i32_0 : i32, i32
  }
  func.func @transform_1(%arg0: i32) -> (i32, i32) {
    %c0_i32 = arith.constant 0 : i32
    %c0_i32_0 = arith.constant 0 : i32
    %c0_i32_1 = arith.constant 0 : i32
    return %c0_i32, %c0_i32_0 : i32, i32
  }
  func.func @transform_2(%arg0: i32) -> (i32, i32) {
    %c0_i32 = arith.constant 0 : i32
    %c0_i32_0 = arith.constant 0 : i32
    %c0_i32_1 = arith.constant 0 : i32
    return %c0_i32, %c0_i32_0 : i32, i32
  }
  func.func @transform_3(%arg0: i32) -> (i32, i32) {
    %c0_i32 = arith.constant 0 : i32
    %c0_i32_0 = arith.constant 0 : i32
    %c0_i32_1 = arith.constant 0 : i32
    return %c0_i32, %c0_i32_0 : i32, i32
  }
  func.func @transform_4(%arg0: i32) -> (i32, i32, i32) {
    %c0_i32 = arith.constant 0 : i32
    %c0_i32_0 = arith.constant 0 : i32
    %c0_i32_1 = arith.constant 0 : i32
    %c0_i32_2 = arith.constant 0 : i32
    return %c0_i32, %c0_i32_0, %c0_i32_1 : i32, i32, i32
  }
  func.func @transform_5(%arg0: i32) -> (i32, i32) {
    %c0_i32 = arith.constant 0 : i32
    %c0_i32_0 = arith.constant 0 : i32
    %c0_i32_1 = arith.constant 0 : i32
    return %c0_i32, %c0_i32_0 : i32, i32
  }
  func.func @transform_6(%arg0: i32) -> (i32, i32) {
    %c0_i32 = arith.constant 0 : i32
    %c0_i32_0 = arith.constant 0 : i32
    %c0_i32_1 = arith.constant 0 : i32
    return %c0_i32, %c0_i32_0 : i32, i32
  }
  func.func @transform_7(%arg0: i32) -> (i32, i32) {
    %c0_i32 = arith.constant 0 : i32
    %c0_i32_0 = arith.constant 0 : i32
    %c0_i32_1 = arith.constant 0 : i32
    return %c0_i32, %c0_i32_0 : i32, i32
  }
  func.func @transform_8(%arg0: i32) -> (i32, i32, i32) {
    %c0_i32 = arith.constant 0 : i32
    %c0_i32_0 = arith.constant 0 : i32
    %c0_i32_1 = arith.constant 0 : i32
    %c0_i32_2 = arith.constant 0 : i32
    return %c0_i32, %c0_i32_0, %c0_i32_1 : i32, i32, i32
  }
  func.func @transform_9(%arg0: i32) -> (i32, i32) {
    %c0_i32 = arith.constant 0 : i32
    %c0_i32_0 = arith.constant 0 : i32
    %c0_i32_1 = arith.constant 0 : i32
    return %c0_i32, %c0_i32_0 : i32, i32
  }
  func.func @transform_10(%arg0: i32) -> (i32, i32) {
    %c0_i32 = arith.constant 0 : i32
    %c0_i32_0 = arith.constant 0 : i32
    %c0_i32_1 = arith.constant 0 : i32
    return %c0_i32, %c0_i32_0 : i32, i32
  }
  func.func @transform_11(%arg0: i32) -> (i32, i32) {
    %c0_i32 = arith.constant 0 : i32
    %c0_i32_0 = arith.constant 0 : i32
    %c0_i32_1 = arith.constant 0 : i32
    return %c0_i32, %c0_i32_0 : i32, i32
  }
}

</mosaic_0001>

<bundles_post_ra>
// kernel: sparse_encoder_forward.1
= control target key start
LH: loop header
LB: loop body
LE: loop exit
PB: predicated region body
PF: predicated region fallthrough
CT: control target
= control target key end

     0   :  { %vm49_vm0 = vcmask 326656   ;;  %v14571_v0 = vmov 0.0   ;;  %vm14572_vm1 = vmmov 0   ;;  %v14573_v13 = vmov 0   ;;  %s18800_s1 = inlined_call_operand.vmem [shape: f32[40,128], index: 1, kind: input, shape index: {}]   ;;  %s18801_s0 = inlined_call_operand.vmem [shape: f32[8,40], index: 0, kind: input, shape index: {}]   ;;  %s18802_s2 = inlined_call_operand.vmem [shape: f32[8,1], index: 2, kind: input, shape index: {}]   ;;  %s18803_s5 = inlined_call_operand.vmem [shape: f32[16,1], index: 5, kind: input, shape index: {}]   ;;  %s18804_s6 = inlined_call_operand.vmem [shape: f32[16,1], index: 6, kind: input, shape index: {}]   ;;  %s18805_s7 = inlined_call_operand.vmem [shape: f32[16,1], index: 7, kind: input, shape index: {}]   ;;  %s18806_s8 = inlined_call_operand.vmem [shape: f32[9,128,128], index: 8, kind: input, shape index: {}]   ;;  %s18807_s3 = inlined_call_operand.vmem [shape: f32[1,128], index: 3, kind: input, shape index: {}]   ;;  %s18808_s10 = inlined_call_operand.vmem [shape: f32[8,128], index: 10, kind: output, shape index: {0}]   ;;  %s18809_s4 = inlined_call_operand.vmem [shape: f32[9,16,8], index: 4, kind: input, shape index: {}]   ;;  %s18810_s9 = inlined_call_operand.vmem [shape: f32[1,128], index: 9, kind: input, shape index: {}]   ;;  %s18811_s11 = inlined_call_operand.vmem [shape: f32[16,128], index: 11, kind: output, shape index: {1}]  }
   0x1   :  { %12326 = vmatprep.subr.mxu0 %v14571_v0  ;;  %v42_v1 = vld [vmem:[%s18800_s1 + $0x20] sm:$0xff]  ;;  %v41_v2 = vld [vmem:[%s18800_s1 + $0x18] sm:$0xff]  ;;  %v40_v3 = vld [vmem:[%s18800_s1 + $0x10] sm:$0xff]  ;;  %12339 = vmatprep.subr.mxu1 %v14571_v0  ;;  %vm1881_vm2 = vcmask 64512  }
   0x2   :  { %v14645_v4 = vand.u32 4294901760, %v42_v1  ;;  %v14647_v5 = vand.u32 4294901760, %v41_v2  ;;  %v14649_v6 = vand.u32 4294901760, %v40_v3  ;;  %v39_v7 = vld [vmem:[%s18800_s1 + $0x8] sm:$0xff]  ;;  %v38_v8 = vld [vmem:[%s18800_s1] sm:$0xff]  ;;  %12336 = vmatprep.mubr.msk.f32.mxu0 %vm14572_vm1, %v14571_v0  ;;  %12349 = vmatprep.mubr.msk.f32.mxu1 %vm14572_vm1, %v14571_v0  ;;  %v576_v43 = vld [vmem:[%s18806_s8 + $0x78] sm:$0xff] }
   0x3   :  { %v37_v9 = vld [vmem:[%s18801_s0] sm:$0xff]  ;;  %v14664_v10 = vand.u32 4294901760, %v39_v7  ;;  %v14666_v11 = vand.u32 4294901760, %v38_v8  ;;  %14567 = vset.pattern.permute.xlu0 %v14573_v13  ;;  %14568 = vset.pattern.permute.xlu1 %v14573_v13  ;;  %v11018_v41 = vld [vmem:[%s18804_s6 + $0x8] sm:$0xff]  ;;  %v14786_v44 = vand.u32 4294901760, %v576_v43  ;;  %v575_v45 = vld [vmem:[%s18806_s8 + $0x70] sm:$0xff] }
   0x4   :  { %v51_v12 = vsel %vm49_vm0, %v37_v9, 0  ;;  %v43_v14 = vld [vmem:[%s18802_s2] sm:$0xff]  ;;  %12327 = vmatpush3.msra.mxu0 %v14645_v4  ;;  %v14674_v15 = vsub.f32 %v42_v1, %v14645_v4  ;;  %v14679_v17 = vsub.f32 %v41_v2, %v14647_v5  ;;  %v14682_v18 = vsub.f32 %v40_v3, %v14649_v6  ;;  %v11032_v42 = vld [vmem:[%s18805_s7 + $0x8] sm:$0xff]  ;;  %v572_v57 = vld [vmem:[%s18806_s8 + $0x58] sm:$0xff] }
   0x5   :  { %v14676_v16 = vand.u32 4294901760, %v51_v12  ;;  %46 = vperm.xlu0 %14567, %v43_v14   ;;  %12328 = vmatprep.subr.mxu0 %v14571_v0  ;;  %v14686_v19 = vsub.f32 %v39_v7, %v14664_v10  ;;  %v14689_v20 = vsub.f32 %v38_v8, %v14666_v11  ;;  %v10978_v21 = vld [vmem:[%s18803_s5] sm:$0xff]  ;;  %v14792_v46 = vsub.f32 %v576_v43, %v14786_v44  ;;  %v574_v48 = vld [vmem:[%s18806_s8 + $0x68] sm:$0xff]  ;;  %v571_v63 = vld [vmem:[%s18806_s8 + $0x50] sm:$0xff] }
   0x6   :  { %12329 = vmatpush3.msra.mxu0 %v14647_v5  ;;  %v158_v22 = vand.u32 4294901760, %v14674_v15  ;;  %v165_v24 = vand.u32 4294901760, %v14679_v17  ;;  %v172_v25 = vand.u32 4294901760, %v14682_v18  ;;  %v14794_v47 = vand.u32 4294901760, %v575_v45  ;;  %v573_v52 = vld [vmem:[%s18806_s8 + $0x60] sm:$0xff] }
   0x7   :  { %v14697_v23 = vsub.f32 %v51_v12, %v14676_v16  ;;  %12330 = vmatprep.subr.mxu0 %v14571_v0  ;;  %v179_v26 = vand.u32 4294901760, %v14686_v19  ;;  %v186_v27 = vand.u32 4294901760, %v14689_v20  ;;  %v671_v49 = vand.u32 4294901760, %v14792_v46  ;;  %v569_v12 = vld [vmem:[%s18806_s8 + $0x40] sm:$0xff] }
   0x8   :  { %12331 = vmatpush3.msra.mxu0 %v14649_v6  ;;  %v159_v28 = vsub.f32 %v14674_v15, %v158_v22  ;;  %v166_v30 = vsub.f32 %v14679_v17, %v165_v24  ;;  %v173_v31 = vsub.f32 %v14682_v18, %v172_v25  ;;  %v14803_v50 = vsub.f32 %v575_v45, %v14794_v47 }
   0x9   :  { %v125_v29 = vand.u32 4294901760, %v14697_v23  ;;  %10982 = vperm.xlu0 %14567, %v10978_v21   ;;  %12332 = vmatprep.subr.mxu0 %v14571_v0  ;;  %v180_v35 = vsub.f32 %v14686_v19, %v179_v26  ;;  %v187_v38 = vsub.f32 %v14689_v20, %v186_v27  ;;  %v14805_v51 = vand.u32 4294901760, %v574_v48 }
   0xa   :  { %12333 = vmatpush3.msra.mxu0 %v14664_v10  ;;  %v160_v32 = vand.u32 4294901760, %v159_v28  ;;  %v167_v34 = vand.u32 4294901760, %v166_v30  ;;  %v174_v37 = vand.u32 4294901760, %v173_v31  ;;  %v672_v53 = vsub.f32 %v14792_v46, %v671_v49  ;;  %v566_v30 = vld [vmem:[%s18806_s8 + $0x28] sm:$0xff] }
   0xb   :  { %v126_v33 = vsub.f32 %v14697_v23, %v125_v29  ;;  %12334 = vmatprep.subr.mxu0 %v14571_v0  ;;  %v181_v39 = vand.u32 4294901760, %v180_v35  ;;  %v188_v40 = vand.u32 4294901760, %v187_v38  ;;  %v678_v54 = vand.u32 4294901760, %v14803_v50 }
   0xc   :  { %12335 = vmatpush3.msra.mxu0 %v14666_v11  ;;  %12340 = vmatpush3.msra.mxu1 %v160_v32  ;;  %v14817_v55 = vsub.f32 %v574_v48, %v14805_v51  ;;  %v14819_v56 = vand.u32 4294901760, %v573_v52  ;;  %v673_v58 = vand.u32 4294901760, %v672_v53  ;;  %v14834_v62 = vand.u32 4294901760, %v572_v57 }
   0xd   :  { %v127_v36 = vand.u32 4294901760, %v126_v33  ;;  %12341 = vmatprep.subr.mxu1 %v14571_v0  ;;  %12352 = vmatprep.subr.mxu0 %v14571_v0  ;;  %v679_v59 = vsub.f32 %v14803_v50, %v678_v54 }
   0xe   :  { %12342 = vmatpush3.msra.mxu1 %v167_v34  ;;  %11026 = vperm.xlu0 %14567, %v11018_v41   ;;  %v685_v60 = vand.u32 4294901760, %v14817_v55  ;;  %v14831_v61 = vsub.f32 %v573_v52, %v14819_v56  ;;  %v14918_v34 = vand.u32 4294901760, %v566_v30 }
   0xf   :  { %12337 = vmatmul.mubr.f32.vlgmr.msra.gmra.mxu0 %v127_v36  ;;  %12343 = vmatprep.subr.mxu1 %v14571_v0  ;;  %v680_v1 = vand.u32 4294901760, %v679_v59  ;;  %v565_v36 = vld [vmem:[%s18806_s8 + $0x20] sm:$0xff] }
  0x10   :  { %12353 = vmatpush3.msra.mxu0 %v14674_v15  ;;  %12344 = vmatpush3.msra.mxu1 %v174_v37  ;;  %v686_v2 = vsub.f32 %v14817_v55, %v685_v60  ;;  %v692_v3 = vand.u32 4294901760, %v14831_v61 }
  0x11   :  { %12354 = vmatprep.subr.mxu0 %v14571_v0  ;;  %12345 = vmatprep.subr.mxu1 %v14571_v0 }
  0x12   :  { %12355 = vmatpush3.msra.mxu0 %v14679_v17  ;;  %12346 = vmatpush3.msra.mxu1 %v181_v39  ;;  %v687_v7 = vand.u32 4294901760, %v686_v2  ;;  %v693_v8 = vsub.f32 %v14831_v61, %v692_v3  ;;  %v14933_v39 = vsub.f32 %v566_v30, %v14918_v34 }
  0x13   :  { %12356 = vmatprep.subr.mxu0 %v14571_v0  ;;  %12347 = vmatprep.subr.mxu1 %v14571_v0 }
  0x14   :  { %12357 = vmatpush3.msra.mxu0 %v14682_v18  ;;  %12348 = vmatpush3.msra.mxu1 %v188_v40  ;;  %v694_v13 = vand.u32 4294901760, %v693_v8  ;;  %v568_v18 = vld [vmem:[%s18806_s8 + $0x38] sm:$0xff]  ;;  %v14935_v40 = vand.u32 4294901760, %v565_v36  ;;  %v741_v45 = vand.u32 4294901760, %v14933_v39 }
  0x15   :  { %12358 = vmatprep.subr.mxu0 %v14571_v0  ;;  %12350 = vmatmul.mubr.f32.vlgmr.msra.gmra.mxu1 %v14676_v16 }
  0x16   :  { %12359 = vmatpush3.msra.mxu0 %v14686_v19  ;;  %12365 = vmatprep.subr.mxu1 %v14571_v0  ;;  %v14946_v48 = vsub.f32 %v565_v36, %v14935_v40 }
  0x17   :  { %12360 = vmatprep.subr.mxu0 %v14571_v0  ;;  %12366 = vmatpush3.msra.mxu1 %v14645_v4 }
  0x18   :  { %12361 = vmatpush3.msra.mxu0 %v14689_v20  ;;  %12362 = vmatprep.mubr.msk.f32.mxu0 %vm14572_vm1, %v14571_v0  ;;  %v18816_v59 = vand.u32 4294901760, %v14946_v48 }
  0x19   :  { %12367 = vmatprep.subr.mxu1 %v14571_v0  ;;  %12378 = vmatprep.subr.mxu0 %v14571_v0 }
  0x1a   :  { %12363 = vmatmul.mubr.f32.vlgmr.msra.gmra.mxu0 %v14697_v23  ;;  %12368 = vmatpush3.msra.mxu1 %v14647_v5  ;;  %v749_v8 = vsub.f32 %v14946_v48, %v18816_v59 }
  0x1b   :  { %12379 = vmatpush3.msra.mxu0 %v158_v22  ;;  %12369 = vmatprep.subr.mxu1 %v14571_v0  ;;  %v14891_v22 = vand.u32 4294901760, %v568_v18 }
  0x1c   :  { %12380 = vmatprep.subr.mxu0 %v14571_v0  ;;  %12370 = vmatpush3.msra.mxu1 %v14649_v6 }
  0x1d   :  { %12381 = vmatpush3.msra.mxu0 %v165_v24  ;;  %12371 = vmatprep.subr.mxu1 %v14571_v0  ;;  %v567_v24 = vld [vmem:[%s18806_s8 + $0x30] sm:$0xff]  ;;  %v14904_v28 = vsub.f32 %v568_v18, %v14891_v22  ;;  %v561_v18 = vld [vmem:[%s18806_s8] sm:$0xff] }
  0x1e   :  { %12382 = vmatprep.subr.mxu0 %v14571_v0  ;;  %12372 = vmatpush3.msra.mxu1 %v14664_v10 }
  0x1f   :  { %12383 = vmatpush3.msra.mxu0 %v172_v25  ;;  %12373 = vmatprep.subr.mxu1 %v14571_v0  ;;  %v727_v33 = vand.u32 4294901760, %v14904_v28 }
  0x20   :  { %12384 = vmatprep.subr.mxu0 %v14571_v0  ;;  %12374 = vmatpush3.msra.mxu1 %v14666_v11 }
  0x21   :  { %12375 = vmatprep.mubr.msk.f32.mxu1 %vm14572_vm1, %v14571_v0  ;;  %12385 = vmatpush3.msra.mxu0 %v179_v26  ;;  %v728_v38 = vsub.f32 %v14904_v28, %v727_v33 }
  0x22   :  { %12376 = vmatmul.mubr.f32.vlgmr.msra.gmra.mxu1 %v125_v29  ;;  %12386 = vmatprep.subr.mxu0 %v14571_v0  ;;  %v14907_v29 = vand.u32 4294901760, %v567_v24 }
  0x23   :  { %12391 = vmatprep.subr.mxu1 %v14571_v0  ;;  %12387 = vmatpush3.msra.mxu0 %v186_v27  ;;  %v729_v43 = vand.u32 4294901760, %v728_v38 }
  0x24   :  { %12388 = vmatprep.mubr.msk.f32.mxu0 %vm14572_vm1, %v14571_v0  ;;  %12392 = vmatpush3.msra.mxu1 %v14645_v4  ;;  %v14844_v4 = vand.u32 4294901760, %v571_v63  ;;  %v14922_v35 = vsub.f32 %v567_v24, %v14907_v29 }
  0x25   :  { %12389 = vmatmul.mubr.f32.vlgmr.msra.gmra.mxu0 %v14676_v16  ;;  %12393 = vmatprep.subr.mxu1 %v14571_v0 }
  0x26   :  { %12401 = vmatprep.mubr.msk.f32.mxu1 %vm14572_vm1, %v14571_v0  ;;  %12394 = vmatpush3.msra.mxu1 %v14647_v5  ;;  %v14848_v5 = vsub.f32 %v572_v57, %v14834_v62  ;;  %v14858_v9 = vsub.f32 %v571_v63, %v14844_v4  ;;  %v734_v41 = vand.u32 4294901760, %v14922_v35  ;;  %v563_v57 = vld [vmem:[%s18806_s8 + $0x10] sm:$0xff] }
  0x27   :  { %12395 = vmatprep.subr.mxu1 %v14571_v0  ;;  %12404 = vmatprep.subr.mxu0 %v14571_v0 }
  0x28   :  { %12396 = vmatpush3.msra.mxu1 %v14649_v6  ;;  %12436 = vmatprep.mubr.msk.f32.mxu0 %vm14572_vm1, %v14571_v0  ;;  %v570_v6 = vld [vmem:[%s18806_s8 + $0x48] sm:$0xff]  ;;  %v706_v14 = vand.u32 4294901760, %v14858_v9  ;;  %v735_v53 = vsub.f32 %v14922_v35, %v734_v41 }
  0x29   :  { %12397 = vmatprep.subr.mxu1 %v14571_v0  ;;  %11040 = vperm.xlu0 %14567, %v11032_v42   ;;  %v564_v42 = vld [vmem:[%s18806_s8 + $0x18] sm:$0xff] }
  0x2a   :  { %12398 = vmatpush3.msra.mxu1 %v14664_v10  ;;  %12405 = vmatpush3.msra.mxu0 %v14786_v44  ;;  %v14860_v10 = vand.u32 4294901760, %v570_v6  ;;  %v707_v19 = vsub.f32 %v14858_v9, %v706_v14  ;;  %v14948_v52 = vand.u32 4294901760, %v564_v42  ;;  %v736_v2 = vand.u32 4294901760, %v735_v53 }
  0x2b   :  { %12399 = vmatprep.subr.mxu1 %v14571_v0  ;;  %12406 = vmatprep.subr.mxu0 %v14571_v0 }
  0x2c   :  { %12400 = vmatpush3.msra.mxu1 %v14666_v11  ;;  %12407 = vmatpush3.msra.mxu0 %v14794_v47  ;;  %v699_v11 = vand.u32 4294901760, %v14848_v5  ;;  %v14871_v15 = vsub.f32 %v570_v6, %v14860_v10  ;;  %v708_v25 = vand.u32 4294901760, %v707_v19  ;;  %v14964_v63 = vsub.f32 %v564_v42, %v14948_v52  ;;  %v562_v6 = vld [vmem:[%s18806_s8 + $0x8] sm:$0xff] }
  0x2d   :  { %12402 = vmatmul.mubr.f32.vlgmr.msra.gmra.mxu1 %v14676_v16  ;;  %12439 = vmatprep.subr.mxu1 %v14571_v0  ;;  %v14873_v16 = vand.u32 4294901760, %v569_v12  ;;  %v750_v19 = vand.u32 4294901760, %v749_v8 }
  0x2e   :  { %12471 = vmatprep.mubr.msk.f32.mxu1 %vm14572_vm1, %v14571_v0  ;;  %12408 = vmatprep.subr.mxu0 %v14571_v0  ;;  %v700_v17 = vsub.f32 %v14848_v5, %v699_v11  ;;  %v713_v20 = vand.u32 4294901760, %v14871_v15 }
  0x2f   :  { %12409 = vmatpush3.msra.mxu0 %v14805_v51  ;;  %12440 = vmatpush3.msra.mxu1 %v673_v58  ;;  %v14889_v21 = vsub.f32 %v569_v12, %v14873_v16  ;;  %v742_v58 = vsub.f32 %v14933_v39, %v741_v45  ;;  %v18815_v12 = vand.u32 4294901760, %v14964_v63 }
  0x30   :  { %12410 = vmatprep.subr.mxu0 %v14571_v0  ;;  %12441 = vmatprep.subr.mxu1 %v14571_v0  ;;  %v701_v23 = vand.u32 4294901760, %v700_v17  ;;  %v714_v26 = vsub.f32 %v14871_v15, %v713_v20  ;;  %v14982_v17 = vand.u32 4294901760, %v562_v6 }
  0x31   :  { %12411 = vmatpush3.msra.mxu0 %v14819_v56  ;;  %12442 = vmatpush3.msra.mxu1 %v680_v1  ;;  %v720_v27 = vand.u32 4294901760, %v14889_v21  ;;  %v14966_v1 = vand.u32 4294901760, %v563_v57 }
  0x32   :  { %12412 = vmatprep.subr.mxu0 %v14571_v0  ;;  %12443 = vmatprep.subr.mxu1 %v14571_v0  ;;  %v715_v31 = vand.u32 4294901760, %v714_v26  ;;  %v14997_v26 = vsub.f32 %v562_v6, %v14982_v17 }
  0x33   :  { %12413 = vmatpush3.msra.mxu0 %v14834_v62  ;;  %12444 = vmatpush3.msra.mxu1 %v687_v7  ;;  %v721_v32 = vsub.f32 %v14889_v21, %v720_v27  ;;  %v743_v7 = vand.u32 4294901760, %v742_v58 }
  0x34   :  { %12414 = vmatprep.subr.mxu0 %v14571_v0  ;;  %12445 = vmatprep.subr.mxu1 %v14571_v0  ;;  %v18813_v36 = vand.u32 4294901760, %v14997_v26 }
  0x35   :  { %12415 = vmatpush3.msra.mxu0 %v14844_v4  ;;  %12446 = vmatpush3.msra.mxu1 %v694_v13  ;;  %v722_v37 = vand.u32 4294901760, %v721_v32  ;;  %v14979_v13 = vsub.f32 %v563_v57, %v14966_v1 }
  0x36   :  { %12416 = vmatprep.subr.mxu0 %v14571_v0  ;;  %12447 = vmatprep.subr.mxu1 %v14571_v0  ;;  %v770_v42 = vsub.f32 %v14997_v26, %v18813_v36 }
  0x37   :  { %12417 = vmatpush3.msra.mxu0 %v14860_v10  ;;  %12448 = vmatpush3.msra.mxu1 %v701_v23  ;;  %v756_v23 = vsub.f32 %v14964_v63, %v18815_v12  ;;  %v18814_v24 = vand.u32 4294901760, %v14979_v13 }
  0x38   :  { %12418 = vmatprep.subr.mxu0 %v14571_v0  ;;  %12449 = vmatprep.subr.mxu1 %v14571_v0  ;;  %v771_v53 = vand.u32 4294901760, %v770_v42 }
  0x39   :  { %12419 = vmatpush3.msra.mxu0 %v14873_v16  ;;  %12450 = vmatpush3.msra.mxu1 %v708_v25  ;;  %v14993_v25 = vand.u32 4294901760, %v561_v18  ;;  %v757_v30 = vand.u32 4294901760, %v756_v23 }
  0x3a   :  { %12420 = vmatprep.subr.mxu0 %v14571_v0  ;;  %12451 = vmatprep.subr.mxu1 %v14571_v0 }
  0x3b   :  { %12421 = vmatpush3.msra.mxu0 %v14891_v22  ;;  %12452 = vmatpush3.msra.mxu1 %v715_v31  ;;  %v763_v31 = vsub.f32 %v14979_v13, %v18814_v24  ;;  %v15005_v32 = vsub.f32 %v561_v18, %v14993_v25 }
  0x3c   :  { %12422 = vmatprep.subr.mxu0 %v14571_v0  ;;  %12453 = vmatprep.subr.mxu1 %v14571_v0 }
  0x3d   :  { %12423 = vmatpush3.msra.mxu0 %v14907_v29  ;;  %12454 = vmatpush3.msra.mxu1 %v722_v37  ;;  %v764_v37 = vand.u32 4294901760, %v763_v31  ;;  %v18812_v38 = vand.u32 4294901760, %v15005_v32 }
  0x3e   :  { %12424 = vmatprep.subr.mxu0 %v14571_v0  ;;  %12455 = vmatprep.subr.mxu1 %v14571_v0 }
  0x3f   :  { %12425 = vmatpush3.msra.mxu0 %v14918_v34  ;;  %12456 = vmatpush3.msra.mxu1 %v729_v43  ;;  %v777_v43 = vsub.f32 %v15005_v32, %v18812_v38 }
  0x40   :  { %12426 = vmatprep.subr.mxu0 %v14571_v0  ;;  %12457 = vmatprep.subr.mxu1 %v14571_v0 }
  0x41   :  { %12427 = vmatpush3.msra.mxu0 %v14935_v40  ;;  %12458 = vmatpush3.msra.mxu1 %v736_v2  ;;  %v778_v57 = vand.u32 4294901760, %v777_v43 }
  0x42   :  { %12428 = vmatprep.subr.mxu0 %v14571_v0  ;;  %12459 = vmatprep.subr.mxu1 %v14571_v0 }
  0x43   :  { %12429 = vmatpush3.msra.mxu0 %v14948_v52  ;;  %12460 = vmatpush3.msra.mxu1 %v743_v7 }
  0x44   :  { %12430 = vmatprep.subr.mxu0 %v14571_v0  ;;  %12461 = vmatprep.subr.mxu1 %v14571_v0 }
  0x45   :  { %12431 = vmatpush3.msra.mxu0 %v14966_v1  ;;  %12462 = vmatpush3.msra.mxu1 %v750_v19 }
  0x46   :  { %12432 = vmatprep.subr.mxu0 %v14571_v0  ;;  %12463 = vmatprep.subr.mxu1 %v14571_v0 }
  0x47   :  { %12433 = vmatpush3.msra.mxu0 %v14982_v17  ;;  %12464 = vmatpush3.msra.mxu1 %v757_v30 }
  0x48   :  { %12434 = vmatprep.subr.mxu0 %v14571_v0  ;;  %12465 = vmatprep.subr.mxu1 %v14571_v0 }
  0x49   :  { %12435 = vmatpush3.msra.mxu0 %v14993_v25  ;;  %12466 = vmatpush3.msra.mxu1 %v764_v37 }
  0x4a   :  { %12474 = vmatprep.subr.mxu0 %v14571_v0  ;;  %12467 = vmatprep.subr.mxu1 %v14571_v0 }
  0x4b   :  { %12468 = vmatpush3.msra.mxu1 %v771_v53 }
  0x4c   :  { %12469 = vmatprep.subr.mxu1 %v14571_v0 }
  0x4d   :  { %12470 = vmatpush3.msra.mxu1 %v778_v57 }
  0x4e   :  { %12509 = vmatprep.subr.mxu1 %v14571_v0 }
  0x80   :  { %v47_v18 = vpop.permute.xlu0 %46 }
  0xcf   :  { %v129_v58 = vpop.f32.mrf.mxu0 }
  0xd0   :  { %v130_v23 = vadd.f32 %v129_v58, %v47_v18 }
  0xd1   :  { %v12338_v2 = vpop.f32.mrf.mxu0 }
  0xd2   :  { %v11064_v2 = vld [vmem:[%s18807_s3] ss:$0 sm:$0xff] }
  0xd5   :  { %v225_v6 = vpop.f32.mrf.mxu1 }
  0xd6   :  { %v226_v31 = vadd.f32 %v225_v6, %v130_v23 }
  0xd7   :  { %v12351_v7 = vpop.f32.mrf.mxu1 }
  0xda   :  { %v307_v8 = vpop.f32.mrf.mxu0 }
  0xdb   :  { %v308_v38 = vadd.f32 %v307_v8, %v226_v31  ;;  %v18819_v31 = vand.u32 4294901760, %v14979_v13 }
  0xdc   :  { %v12364_v19 = vpop.f32.mrf.mxu0 }
  0xe2   :  { %v385_v30 = vpop.f32.mrf.mxu1 }
  0xe3   :  { %v386_v53 = vadd.f32 %v385_v30, %v308_v38  ;;  %v18818_v38 = vand.u32 4294901760, %v14964_v63  ;;  %v11069_v30 = vld [vmem:[%s18806_s8 + $0xa0] sm:$0xff] }
  0xe4   :  { %v12377_v37 = vpop.f32.mrf.mxu1 }
  0xe5   :  { %v471_v42 = vpop.f32.mrf.mxu0 }
  0xe6   :  { %v472_v36 = vadd.f32 %v471_v42, %v386_v53 }
  0xe7   :  { %v12390_v43 = vpop.f32.mrf.mxu0 }
  0xed   :  { %v547_v24 = vpop.f32.mrf.mxu1 }
  0xee   :  { %v548_v57 = vadd.f32 %v547_v24, %v472_v36 }
  0xef   :  { %v12403_v12 = vpop.f32.mrf.mxu1 }
  0xf0   :  { %v551_v7 = vmax.f32 %v548_v57, 0.0  ;;  %v18820_v57 = vand.u32 4294901760, %v14997_v26 }
  0xf2   :  { %v559_v59 = vmul.f32 %v11064_v2, %v551_v7 }
  0xf4   :  { %560 = vst [vmem:[%s18808_s10] sm:$0xff] %v559_v59  ;;  %v15029_v58 = vand.u32 4294901760, %v559_v59 }
  0xf6   :  { %v15032_v6 = vsub.f32 %v559_v59, %v15029_v58  ;;  %12472 = vmatmul.mubr.f32.vlgmr.msra.gmra.mxu1 %v15029_v58 }
  0xf7   :  { %12510 = vmatpush3.msra.mxu1 %v14786_v44  ;;  %12541 = vmatprep.mubr.msk.f32.mxu1 %vm14572_vm1, %v14571_v0 }
  0xf8   :  { %v15039_v12 = vand.u32 4294901760, %v15032_v6  ;;  %12511 = vmatprep.subr.mxu1 %v14571_v0 }
  0xf9   :  { %12512 = vmatpush3.msra.mxu1 %v14794_v47 }
  0xfa   :  { %12513 = vmatprep.subr.mxu1 %v14571_v0  ;;  %v661_v59 = vsub.f32 %v15032_v6, %v15039_v12 }
  0xfb   :  { %12514 = vmatpush3.msra.mxu1 %v14805_v51 }
  0xfc   :  { %12515 = vmatprep.subr.mxu1 %v14571_v0  ;;  %v15048_v24 = vand.u32 4294901760, %v661_v59  ;;  %v15311_v59 = vand.u32 4294901760, %v11069_v30 }
  0xfd   :  { %12516 = vmatpush3.msra.mxu1 %v14819_v56 }
  0xfe   :  { %12517 = vmatprep.subr.mxu1 %v14571_v0  ;;  %12437 = vmatmul.mubr.f32.vlgmr.msra.gmra.mxu0 %v15048_v24 }
  0xff   :  { %12475 = vmatpush3.msra.mxu0 %v14792_v46  ;;  %12518 = vmatpush3.msra.mxu1 %v14834_v62  ;;  %v11079_v46 = vld [vmem:[%s18806_s8 + $0xf0] sm:$0xff] }
 0x100   :  { %12476 = vmatprep.subr.mxu0 %v14571_v0  ;;  %12519 = vmatprep.subr.mxu1 %v14571_v0 }
 0x101   :  { %12477 = vmatpush3.msra.mxu0 %v14803_v50  ;;  %12520 = vmatpush3.msra.mxu1 %v14844_v4  ;;  %v15154_v50 = vand.u32 4294901760, %v11079_v46 }
 0x102   :  { %12478 = vmatprep.subr.mxu0 %v14571_v0  ;;  %12521 = vmatprep.subr.mxu1 %v14571_v0 }
 0x103   :  { %12479 = vmatpush3.msra.mxu0 %v14817_v55  ;;  %12522 = vmatpush3.msra.mxu1 %v14860_v10 }
 0x104   :  { %12480 = vmatprep.subr.mxu0 %v14571_v0  ;;  %12523 = vmatprep.subr.mxu1 %v14571_v0 }
 0x105   :  { %12481 = vmatpush3.msra.mxu0 %v14831_v61  ;;  %12524 = vmatpush3.msra.mxu1 %v14873_v16  ;;  %v11076_v61 = vld [vmem:[%s18806_s8 + $0xd8] sm:$0xff] }
 0x106   :  { %12482 = vmatprep.subr.mxu0 %v14571_v0  ;;  %12525 = vmatprep.subr.mxu1 %v14571_v0 }
 0x107   :  { %12483 = vmatpush3.msra.mxu0 %v14848_v5  ;;  %12526 = vmatpush3.msra.mxu1 %v14891_v22  ;;  %v15196_v5 = vand.u32 4294901760, %v11076_v61 }
 0x108   :  { %12484 = vmatprep.subr.mxu0 %v14571_v0  ;;  %12527 = vmatprep.subr.mxu1 %v14571_v0 }
 0x109   :  { %12485 = vmatpush3.msra.mxu0 %v14858_v9  ;;  %12528 = vmatpush3.msra.mxu1 %v14907_v29  ;;  %v11074_v9 = vld [vmem:[%s18806_s8 + $0xc8] sm:$0xff] }
 0x10a   :  { %12486 = vmatprep.subr.mxu0 %v14571_v0  ;;  %12529 = vmatprep.subr.mxu1 %v14571_v0 }
 0x10b   :  { %12487 = vmatpush3.msra.mxu0 %v14871_v15  ;;  %12530 = vmatpush3.msra.mxu1 %v14918_v34  ;;  %v11073_v15 = vld [vmem:[%s18806_s8 + $0xc0] sm:$0xff] }
 0x10c   :  { %12488 = vmatprep.subr.mxu0 %v14571_v0  ;;  %12531 = vmatprep.subr.mxu1 %v14571_v0 }
 0x10d   :  { %12489 = vmatpush3.msra.mxu0 %v14889_v21  ;;  %12532 = vmatpush3.msra.mxu1 %v14935_v40  ;;  %v15222_v21 = vand.u32 4294901760, %v11074_v9 }
 0x10e   :  { %12490 = vmatprep.subr.mxu0 %v14571_v0  ;;  %12533 = vmatprep.subr.mxu1 %v14571_v0 }
 0x10f   :  { %12491 = vmatpush3.msra.mxu0 %v14904_v28  ;;  %12534 = vmatpush3.msra.mxu1 %v14948_v52 }
 0x110   :  { %12492 = vmatprep.subr.mxu0 %v14571_v0  ;;  %12535 = vmatprep.subr.mxu1 %v14571_v0 }
 0x111   :  { %12493 = vmatpush3.msra.mxu0 %v14922_v35  ;;  %12536 = vmatpush3.msra.mxu1 %v14966_v1  ;;  %v18817_v35 = vand.u32 4294901760, %v14946_v48 }
 0x112   :  { %12494 = vmatprep.subr.mxu0 %v14571_v0  ;;  %12537 = vmatprep.subr.mxu1 %v14571_v0 }
 0x113   :  { %12495 = vmatpush3.msra.mxu0 %v14933_v39  ;;  %12538 = vmatpush3.msra.mxu1 %v14982_v17 }
 0x114   :  { %12496 = vmatprep.subr.mxu0 %v14571_v0  ;;  %12539 = vmatprep.subr.mxu1 %v14571_v0 }
 0x115   :  { %12497 = vmatpush3.msra.mxu0 %v14946_v48  ;;  %12540 = vmatpush3.msra.mxu1 %v14993_v25 }
 0x116   :  { %12498 = vmatprep.subr.mxu0 %v14571_v0  ;;  %12542 = vmatmul.mubr.f32.vlgmr.msra.gmra.mxu1 %v15039_v12 }
 0x117   :  { %12579 = vmatprep.subr.mxu1 %v14571_v0  ;;  %12499 = vmatpush3.msra.mxu0 %v14964_v63 }
 0x118   :  { %12580 = vmatpush3.msra.mxu1 %v14786_v44  ;;  %12500 = vmatprep.subr.mxu0 %v14571_v0  ;;  %v11080_v44 = vld [vmem:[%s18806_s8 + $0xf8] sm:$0xff] }
 0x119   :  { %12581 = vmatprep.subr.mxu1 %v14571_v0  ;;  %12501 = vmatpush3.msra.mxu0 %v14979_v13  ;;  %v11068_v13 = vld [vmem:[%s18806_s8 + $0x98] sm:$0xff] }
 0x11a   :  { %12582 = vmatpush3.msra.mxu1 %v14794_v47  ;;  %12502 = vmatprep.subr.mxu0 %v14571_v0  ;;  %v15144_v47 = vand.u32 4294901760, %v11080_v44 }
 0x11b   :  { %12583 = vmatprep.subr.mxu1 %v14571_v0  ;;  %12503 = vmatpush3.msra.mxu0 %v14997_v26  ;;  %v11067_v26 = vld [vmem:[%s18806_s8 + $0x90] sm:$0xff] }
 0x11c   :  { %12584 = vmatpush3.msra.mxu1 %v14805_v51  ;;  %12504 = vmatprep.subr.mxu0 %v14571_v0  ;;  %v11077_v51 = vld [vmem:[%s18806_s8 + $0xe0] sm:$0xff] }
 0x11d   :  { %12585 = vmatprep.subr.mxu1 %v14571_v0  ;;  %12505 = vmatpush3.msra.mxu0 %v15005_v32 }
 0x11e   :  { %12506 = vmatprep.mubr.msk.f32.mxu0 %vm14572_vm1, %v14571_v0  ;;  %12586 = vmatpush3.msra.mxu1 %v14819_v56  ;;  %v15175_v56 = vsub.f32 %v11079_v46, %v15154_v50  ;;  %v18821_v46 = vand.u32 4294901760, %v15005_v32  ;;  %v11066_v32 = vld [vmem:[%s18806_s8 + $0x88] sm:$0xff] }
 0x11f   :  { %12507 = vmatmul.mubr.f32.vlgmr.msra.gmra.mxu0 %v15032_v6  ;;  %12544 = vmatprep.subr.mxu0 %v14571_v0 }
 0x120   :  { %12587 = vmatprep.subr.mxu1 %v14571_v0  ;;  %12545 = vmatpush3.msra.mxu0 %v671_v49  ;;  %v11078_v49 = vld [vmem:[%s18806_s8 + $0xe8] sm:$0xff] }
 0x121   :  { %12588 = vmatpush3.msra.mxu1 %v14834_v62  ;;  %12546 = vmatprep.subr.mxu0 %v14571_v0  ;;  %v15167_v55 = vand.u32 4294901760, %v11078_v49 }
 0x122   :  { %12589 = vmatprep.subr.mxu1 %v14571_v0  ;;  %12547 = vmatpush3.msra.mxu0 %v678_v54  ;;  %v15165_v54 = vsub.f32 %v11080_v44, %v15144_v47 }
 0x123   :  { %12590 = vmatpush3.msra.mxu1 %v14844_v4  ;;  %12548 = vmatprep.subr.mxu0 %v14571_v0  ;;  %v11075_v4 = vld [vmem:[%s18806_s8 + $0xd0] sm:$0xff] }
 0x124   :  { %12591 = vmatprep.subr.mxu1 %v14571_v0  ;;  %12549 = vmatpush3.msra.mxu0 %v685_v60  ;;  %v15177_v60 = vand.u32 4294901760, %v11077_v51  ;;  %v1331_v62 = vand.u32 4294901760, %v15165_v54 }
 0x125   :  { %12592 = vmatpush3.msra.mxu1 %v14860_v10  ;;  %12550 = vmatprep.subr.mxu0 %v14571_v0  ;;  %v1338_v10 = vand.u32 4294901760, %v15175_v56 }
 0x126   :  { %12593 = vmatprep.subr.mxu1 %v14571_v0  ;;  %12551 = vmatpush3.msra.mxu0 %v692_v3  ;;  %v15189_v3 = vsub.f32 %v11078_v49, %v15167_v55 }
 0x127   :  { %12594 = vmatpush3.msra.mxu1 %v14873_v16  ;;  %12552 = vmatprep.subr.mxu0 %v14571_v0  ;;  %v1332_v16 = vsub.f32 %v15165_v54, %v1331_v62 }
 0x128   :  { %12595 = vmatprep.subr.mxu1 %v14571_v0  ;;  %12553 = vmatpush3.msra.mxu0 %v699_v11  ;;  %v15206_v11 = vsub.f32 %v11077_v51, %v15177_v60 }
 0x129   :  { %12596 = vmatpush3.msra.mxu1 %v14891_v22  ;;  %12554 = vmatprep.subr.mxu0 %v14571_v0  ;;  %v15227_v22 = vsub.f32 %v11076_v61, %v15196_v5  ;;  %v1333_v39 = vand.u32 4294901760, %v1332_v16 }
 0x12a   :  { %12597 = vmatprep.subr.mxu1 %v14571_v0  ;;  %12555 = vmatpush3.msra.mxu0 %v706_v14  ;;  %v15210_v14 = vand.u32 4294901760, %v11075_v4  ;;  %v1352_v28 = vand.u32 4294901760, %v15206_v11 }
 0x12b   :  { %12598 = vmatpush3.msra.mxu1 %v14907_v29  ;;  %12556 = vmatprep.subr.mxu0 %v14571_v0  ;;  %v15236_v29 = vand.u32 4294901760, %v11073_v15  ;;  %v1359_v48 = vand.u32 4294901760, %v15227_v22 }
 0x12c   :  { %12599 = vmatprep.subr.mxu1 %v14571_v0  ;;  %12557 = vmatpush3.msra.mxu0 %v713_v20  ;;  %v1345_v20 = vand.u32 4294901760, %v15189_v3 }
 0x12d   :  { %12600 = vmatpush3.msra.mxu1 %v14918_v34  ;;  %12558 = vmatprep.subr.mxu0 %v14571_v0  ;;  %v15244_v34 = vsub.f32 %v11075_v4, %v15210_v14  ;;  %v15270_v36 = vsub.f32 %v11073_v15, %v15236_v29  ;;  %v1360_v63 = vsub.f32 %v15227_v22, %v1359_v48  ;;  %v15327_v4 = vand.u32 4294901760, %v11068_v13 }
 0x12e   :  { %12601 = vmatprep.subr.mxu1 %v14571_v0  ;;  %12559 = vmatpush3.msra.mxu0 %v720_v27  ;;  %v1339_v27 = vsub.f32 %v15175_v56, %v1338_v10 }
 0x12f   :  { %12602 = vmatpush3.msra.mxu1 %v14935_v40  ;;  %12560 = vmatprep.subr.mxu0 %v14571_v0  ;;  %v1346_v40 = vsub.f32 %v15189_v3, %v1345_v20  ;;  %v1366_v8 = vand.u32 4294901760, %v15244_v34  ;;  %v1380_v53 = vand.u32 4294901760, %v15270_v36  ;;  %v1361_v49 = vand.u32 4294901760, %v1360_v63 }
 0x130   :  { %12603 = vmatprep.subr.mxu1 %v14571_v0  ;;  %12561 = vmatpush3.msra.mxu0 %v727_v33  ;;  %v11072_v33 = vld [vmem:[%s18806_s8 + $0xb8] sm:$0xff] }
 0x131   :  { %12604 = vmatpush3.msra.mxu1 %v14948_v52  ;;  %12562 = vmatprep.subr.mxu0 %v14571_v0  ;;  %v15262_v52 = vand.u32 4294901760, %v11072_v33  ;;  %v1347_v19 = vand.u32 4294901760, %v1346_v40  ;;  %v1367_v2 = vsub.f32 %v15244_v34, %v1366_v8 }
 0x132   :  { %12605 = vmatprep.subr.mxu1 %v14571_v0  ;;  %12563 = vmatpush3.msra.mxu0 %v734_v41  ;;  %v15253_v41 = vsub.f32 %v11074_v9, %v15222_v21  ;;  %v1381_v9 = vsub.f32 %v15270_v36, %v1380_v53 }
 0x133   :  { %12606 = vmatpush3.msra.mxu1 %v14966_v1  ;;  %12564 = vmatprep.subr.mxu0 %v14571_v0  ;;  %v1340_v1 = vand.u32 4294901760, %v1339_v27  ;;  %v15293_v37 = vsub.f32 %v11072_v33, %v15262_v52  ;;  %v1368_v15 = vand.u32 4294901760, %v1367_v2  ;;  %v15341_v27 = vsub.f32 %v11069_v30, %v15311_v59 }
 0x134   :  { %12607 = vmatprep.subr.mxu1 %v14571_v0  ;;  %12565 = vmatpush3.msra.mxu0 %v741_v45  ;;  %v11071_v45 = vld [vmem:[%s18806_s8 + $0xb0] sm:$0xff]  ;;  %v1373_v23 = vand.u32 4294901760, %v15253_v41  ;;  %v15343_v33 = vand.u32 4294901760, %v11067_v26 }
 0x135   :  { %12608 = vmatpush3.msra.mxu1 %v14982_v17  ;;  %12566 = vmatprep.subr.mxu0 %v14571_v0  ;;  %v1353_v17 = vsub.f32 %v15206_v11, %v1352_v28  ;;  %v15279_v18 = vand.u32 4294901760, %v11071_v45  ;;  %v1387_v51 = vand.u32 4294901760, %v15293_v37 }
 0x136   :  { %12609 = vmatprep.subr.mxu1 %v14571_v0  ;;  %12567 = vmatpush3.msra.mxu0 %v18817_v35  ;;  %v1374_v44 = vsub.f32 %v15253_v41, %v1373_v23  ;;  %v15368_v30 = vsub.f32 %v11067_v26, %v15343_v33 }
 0x137   :  { %12610 = vmatpush3.msra.mxu1 %v14993_v25  ;;  %12611 = vmatprep.mubr.msk.f32.mxu1 %vm14572_vm1, %v14571_v0  ;;  %v11070_v25 = vld [vmem:[%s18806_s8 + $0xa8] sm:$0xff]  ;;  %v1354_v43 = vand.u32 4294901760, %v1353_v17  ;;  %v15309_v7 = vsub.f32 %v11071_v45, %v15279_v18  ;;  %v1388_v40 = vsub.f32 %v15293_v37, %v1387_v51  ;;  %v15358_v17 = vand.u32 4294901760, %v11066_v32 }
 0x138   :  { %12568 = vmatprep.subr.mxu0 %v14571_v0  ;;  %12612 = vmatmul.mubr.f32.vlgmr.msra.gmra.mxu1 %v15029_v58  ;;  %v15295_v42 = vand.u32 4294901760, %v11070_v25  ;;  %v1375_v35 = vand.u32 4294901760, %v1374_v44  ;;  %v1422_v26 = vand.u32 4294901760, %v15368_v30 }
 0x139   :  { %12649 = vmatprep.subr.mxu1 %v14571_v0  ;;  %12569 = vmatpush3.msra.mxu0 %v18818_v38  ;;  %v1394_v16 = vand.u32 4294901760, %v15309_v7  ;;  %v1389_v63 = vand.u32 4294901760, %v1388_v40 }
 0x13a   :  { %12650 = vmatpush3.msra.mxu1 %v1333_v39  ;;  %12570 = vmatprep.subr.mxu0 %v14571_v0  ;;  %v15325_v61 = vsub.f32 %v11070_v25, %v15295_v42  ;;  %v11065_v39 = vld [vmem:[%s18806_s8 + $0x80] sm:$0xff]  ;;  %v1382_v25 = vand.u32 4294901760, %v1381_v9 }
 0x13b   :  { %12651 = vmatprep.subr.mxu1 %v14571_v0  ;;  %12571 = vmatpush3.msra.mxu0 %v18819_v31  ;;  %v1395_v38 = vsub.f32 %v15309_v7, %v1394_v16  ;;  %v15370_v31 = vand.u32 4294901760, %v11065_v39 }
 0x13c   :  { %12652 = vmatpush3.msra.mxu1 %v1340_v1  ;;  %12572 = vmatprep.subr.mxu0 %v14571_v0  ;;  %v1401_v45 = vand.u32 4294901760, %v15325_v61  ;;  %v15356_v1 = vsub.f32 %v11068_v13, %v15327_v4 }
 0x13d   :  { %12653 = vmatprep.subr.mxu1 %v14571_v0  ;;  %12573 = vmatpush3.msra.mxu0 %v18820_v57  ;;  %v15380_v57 = vsub.f32 %v11066_v32, %v15358_v17  ;;  %v1396_v2 = vand.u32 4294901760, %v1395_v38 }
 0x13e   :  { %12654 = vmatpush3.msra.mxu1 %v1347_v19  ;;  %12574 = vmatprep.subr.mxu0 %v14571_v0  ;;  %v1408_v19 = vand.u32 4294901760, %v15341_v27  ;;  %v1415_v13 = vand.u32 4294901760, %v15356_v1 }
 0x13f   :  { %12655 = vmatprep.subr.mxu1 %v14571_v0  ;;  %12575 = vmatpush3.msra.mxu0 %v18821_v46  ;;  %v15390_v46 = vsub.f32 %v11065_v39, %v15370_v31  ;;  %v1429_v32 = vand.u32 4294901760, %v15380_v57 }
 0x140   :  { %12576 = vmatprep.mubr.msk.f32.mxu0 %vm14572_vm1, %v14571_v0  ;;  %12656 = vmatpush3.msra.mxu1 %v1354_v43  ;;  %v1402_v43 = vsub.f32 %v15325_v61, %v1401_v45  ;;  %v1409_v44 = vsub.f32 %v15341_v27, %v1408_v19  ;;  %v1416_v9 = vsub.f32 %v15356_v1, %v1415_v13 }
 0x141   :  { %12577 = vmatmul.mubr.f32.vlgmr.msra.gmra.mxu0 %v15029_v58  ;;  %12614 = vmatprep.subr.mxu0 %v14571_v0  ;;  %v1436_v39 = vand.u32 4294901760, %v15390_v46 }
 0x142   :  { %12657 = vmatprep.subr.mxu1 %v14571_v0  ;;  %12615 = vmatpush3.msra.mxu0 %v15144_v47  ;;  %v1417_v40 = vand.u32 4294901760, %v1416_v9 }
 0x143   :  { %12658 = vmatpush3.msra.mxu1 %v1361_v49  ;;  %12616 = vmatprep.subr.mxu0 %v14571_v0  ;;  %v1403_v49 = vand.u32 4294901760, %v1402_v43 }
 0x144   :  { %12659 = vmatprep.subr.mxu1 %v14571_v0  ;;  %12617 = vmatpush3.msra.mxu0 %v15154_v50 }
 0x145   :  { %12660 = vmatpush3.msra.mxu1 %v1368_v15  ;;  %12618 = vmatprep.subr.mxu0 %v14571_v0  ;;  %v1410_v15 = vand.u32 4294901760, %v1409_v44 }
 0x146   :  { %12661 = vmatprep.subr.mxu1 %v14571_v0  ;;  %12619 = vmatpush3.msra.mxu0 %v15167_v55 }
 0x147   :  { %12662 = vmatpush3.msra.mxu1 %v1375_v35  ;;  %12620 = vmatprep.subr.mxu0 %v14571_v0  ;;  %v1423_v35 = vsub.f32 %v15368_v30, %v1422_v26 }
 0x148   :  { %12663 = vmatprep.subr.mxu1 %v14571_v0  ;;  %12621 = vmatpush3.msra.mxu0 %v15177_v60 }
 0x149   :  { %12664 = vmatpush3.msra.mxu1 %v1382_v25  ;;  %12622 = vmatprep.subr.mxu0 %v14571_v0  ;;  %v1430_v25 = vsub.f32 %v15380_v57, %v1429_v32  ;;  %v1424_v38 = vand.u32 4294901760, %v1423_v35 }
 0x14a   :  { %12665 = vmatprep.subr.mxu1 %v14571_v0  ;;  %12623 = vmatpush3.msra.mxu0 %v15196_v5 }
 0x14b   :  { %12666 = vmatpush3.msra.mxu1 %v1389_v63  ;;  %12624 = vmatprep.subr.mxu0 %v14571_v0  ;;  %v1437_v63 = vsub.f32 %v15390_v46, %v1436_v39  ;;  %v1431_v43 = vand.u32 4294901760, %v1430_v25 }
 0x14c   :  { %12667 = vmatprep.subr.mxu1 %v14571_v0  ;;  %12625 = vmatpush3.msra.mxu0 %v15210_v14 }
 0x14d   :  { %12668 = vmatpush3.msra.mxu1 %v1396_v2  ;;  %12626 = vmatprep.subr.mxu0 %v14571_v0  ;;  %v1438_v2 = vand.u32 4294901760, %v1437_v63 }
 0x14e   :  { %12669 = vmatprep.subr.mxu1 %v14571_v0  ;;  %12627 = vmatpush3.msra.mxu0 %v15222_v21 }
 0x14f   :  { %12670 = vmatpush3.msra.mxu1 %v1403_v49  ;;  %12628 = vmatprep.subr.mxu0 %v14571_v0 }
 0x150   :  { %12671 = vmatprep.subr.mxu1 %v14571_v0  ;;  %12629 = vmatpush3.msra.mxu0 %v15236_v29 }
 0x151   :  { %12672 = vmatpush3.msra.mxu1 %v1410_v15  ;;  %12630 = vmatprep.subr.mxu0 %v14571_v0 }
 0x152   :  { %12673 = vmatprep.subr.mxu1 %v14571_v0  ;;  %12631 = vmatpush3.msra.mxu0 %v15262_v52 }
 0x153   :  { %12674 = vmatpush3.msra.mxu1 %v1417_v40  ;;  %12632 = vmatprep.subr.mxu0 %v14571_v0 }
 0x154   :  { %12675 = vmatprep.subr.mxu1 %v14571_v0  ;;  %12633 = vmatpush3.msra.mxu0 %v15279_v18 }
 0x155   :  { %12676 = vmatpush3.msra.mxu1 %v1424_v38  ;;  %12634 = vmatprep.subr.mxu0 %v14571_v0 }
 0x156   :  { %12677 = vmatprep.subr.mxu1 %v14571_v0  ;;  %12635 = vmatpush3.msra.mxu0 %v15295_v42 }
 0x157   :  { %12678 = vmatpush3.msra.mxu1 %v1431_v43  ;;  %12636 = vmatprep.subr.mxu0 %v14571_v0 }
 0x158   :  { %12679 = vmatprep.subr.mxu1 %v14571_v0  ;;  %12637 = vmatpush3.msra.mxu0 %v15311_v59 }
 0x159   :  { %12680 = vmatpush3.msra.mxu1 %v1438_v2  ;;  %12681 = vmatprep.mubr.msk.f32.mxu1 %vm14572_vm1, %v14571_v0 }
 0x15a   :  { %12638 = vmatprep.subr.mxu0 %v14571_v0  ;;  %12682 = vmatmul.mubr.f32.vlgmr.msra.gmra.mxu1 %v15029_v58 }
 0x15b   :  { %12719 = vmatprep.subr.mxu1 %v14571_v0  ;;  %12639 = vmatpush3.msra.mxu0 %v15327_v4 }
 0x15c   :  { %12720 = vmatpush3.msra.mxu1 %v15144_v47  ;;  %12640 = vmatprep.subr.mxu0 %v14571_v0 }
 0x15d   :  { %12721 = vmatprep.subr.mxu1 %v14571_v0  ;;  %12641 = vmatpush3.msra.mxu0 %v15343_v33 }
 0x15e   :  { %12722 = vmatpush3.msra.mxu1 %v15154_v50  ;;  %12642 = vmatprep.subr.mxu0 %v14571_v0 }
 0x15f   :  { %12723 = vmatprep.subr.mxu1 %v14571_v0  ;;  %12643 = vmatpush3.msra.mxu0 %v15358_v17 }
 0x160   :  { %12724 = vmatpush3.msra.mxu1 %v15167_v55  ;;  %12644 = vmatprep.subr.mxu0 %v14571_v0 }
 0x161   :  { %12725 = vmatprep.subr.mxu1 %v14571_v0  ;;  %12645 = vmatpush3.msra.mxu0 %v15370_v31 }
 0x162   :  { %12646 = vmatprep.mubr.msk.f32.mxu0 %vm14572_vm1, %v14571_v0  ;;  %12726 = vmatpush3.msra.mxu1 %v15177_v60 }
 0x163   :  { %12647 = vmatmul.mubr.f32.vlgmr.msra.gmra.mxu0 %v15048_v24  ;;  %12684 = vmatprep.subr.mxu0 %v14571_v0 }
 0x164   :  { %12727 = vmatprep.subr.mxu1 %v14571_v0  ;;  %12685 = vmatpush3.msra.mxu0 %v15165_v54 }
 0x165   :  { %12728 = vmatpush3.msra.mxu1 %v15196_v5  ;;  %12686 = vmatprep.subr.mxu0 %v14571_v0 }
 0x166   :  { %12729 = vmatprep.subr.mxu1 %v14571_v0  ;;  %12687 = vmatpush3.msra.mxu0 %v15175_v56 }
 0x167   :  { %12730 = vmatpush3.msra.mxu1 %v15210_v14  ;;  %12688 = vmatprep.subr.mxu0 %v14571_v0 }
 0x168   :  { %12731 = vmatprep.subr.mxu1 %v14571_v0  ;;  %12689 = vmatpush3.msra.mxu0 %v15189_v3 }
 0x169   :  { %12732 = vmatpush3.msra.mxu1 %v15222_v21  ;;  %12690 = vmatprep.subr.mxu0 %v14571_v0 }
 0x16a   :  { %12733 = vmatprep.subr.mxu1 %v14571_v0  ;;  %12691 = vmatpush3.msra.mxu0 %v15206_v11 }
 0x16b   :  { %12734 = vmatpush3.msra.mxu1 %v15236_v29  ;;  %12692 = vmatprep.subr.mxu0 %v14571_v0 }
 0x16c   :  { %12735 = vmatprep.subr.mxu1 %v14571_v0  ;;  %12693 = vmatpush3.msra.mxu0 %v15227_v22 }
 0x16d   :  { %12736 = vmatpush3.msra.mxu1 %v15262_v52  ;;  %12694 = vmatprep.subr.mxu0 %v14571_v0 }
 0x16e   :  { %12737 = vmatprep.subr.mxu1 %v14571_v0  ;;  %12695 = vmatpush3.msra.mxu0 %v15244_v34 }
 0x16f   :  { %12738 = vmatpush3.msra.mxu1 %v15279_v18  ;;  %12696 = vmatprep.subr.mxu0 %v14571_v0 }
 0x170   :  { %12739 = vmatprep.subr.mxu1 %v14571_v0  ;;  %12697 = vmatpush3.msra.mxu0 %v15253_v41 }
 0x171   :  { %12740 = vmatpush3.msra.mxu1 %v15295_v42  ;;  %12698 = vmatprep.subr.mxu0 %v14571_v0 }
 0x172   :  { %12741 = vmatprep.subr.mxu1 %v14571_v0  ;;  %12699 = vmatpush3.msra.mxu0 %v15270_v36 }
 0x173   :  { %12742 = vmatpush3.msra.mxu1 %v15311_v59  ;;  %12700 = vmatprep.subr.mxu0 %v14571_v0 }
 0x174   :  { %12743 = vmatprep.subr.mxu1 %v14571_v0  ;;  %12701 = vmatpush3.msra.mxu0 %v15293_v37 }
 0x175   :  { %12744 = vmatpush3.msra.mxu1 %v15327_v4  ;;  %12702 = vmatprep.subr.mxu0 %v14571_v0 }
 0x176   :  { %12745 = vmatprep.subr.mxu1 %v14571_v0  ;;  %12703 = vmatpush3.msra.mxu0 %v15309_v7 }
 0x177   :  { %12746 = vmatpush3.msra.mxu1 %v15343_v33  ;;  %12704 = vmatprep.subr.mxu0 %v14571_v0 }
 0x178   :  { %12747 = vmatprep.subr.mxu1 %v14571_v0  ;;  %12705 = vmatpush3.msra.mxu0 %v15325_v61 }
 0x179   :  { %12748 = vmatpush3.msra.mxu1 %v15358_v17  ;;  %12706 = vmatprep.subr.mxu0 %v14571_v0 }
 0x17a   :  { %12749 = vmatprep.subr.mxu1 %v14571_v0  ;;  %12707 = vmatpush3.msra.mxu0 %v15341_v27 }
 0x17b   :  { %12750 = vmatpush3.msra.mxu1 %v15370_v31  ;;  %12751 = vmatprep.mubr.msk.f32.mxu1 %vm14572_vm1, %v14571_v0 }
 0x17c   :  { %12708 = vmatprep.subr.mxu0 %v14571_v0  ;;  %12752 = vmatmul.mubr.f32.vlgmr.msra.gmra.mxu1 %v15039_v12 }
 0x17d   :  { %12789 = vmatprep.subr.mxu1 %v14571_v0  ;;  %12709 = vmatpush3.msra.mxu0 %v15356_v1 }
 0x17e   :  { %12790 = vmatpush3.msra.mxu1 %v15144_v47  ;;  %12710 = vmatprep.subr.mxu0 %v14571_v0 }
 0x17f   :  { %12791 = vmatprep.subr.mxu1 %v14571_v0  ;;  %12711 = vmatpush3.msra.mxu0 %v15368_v30  ;;  %v1218_v30 = vld [vmem:[%s18809_s4] sm:$0xff] }
 0x180   :  { %12792 = vmatpush3.msra.mxu1 %v15154_v50  ;;  %12712 = vmatprep.subr.mxu0 %v14571_v0 }
 0x181   :  { %12793 = vmatprep.subr.mxu1 %v14571_v0  ;;  %12713 = vmatpush3.msra.mxu0 %v15380_v57  ;;  %v2378_v57 = vsel %vm1881_vm2, %v1218_v30, 0 }
 0x182   :  { %12794 = vmatpush3.msra.mxu1 %v15167_v55  ;;  %12714 = vmatprep.subr.mxu0 %v14571_v0 }
 0x183   :  { %12795 = vmatprep.subr.mxu1 %v14571_v0  ;;  %12715 = vmatpush3.msra.mxu0 %v15390_v46 }
 0x184   :  { %12716 = vmatprep.mubr.msk.f32.mxu0 %vm14572_vm1, %v14571_v0  ;;  %12796 = vmatpush3.msra.mxu1 %v15177_v60 }
 0x185   :  { %12717 = vmatmul.mubr.f32.vlgmr.msra.gmra.mxu0 %v15032_v6  ;;  %12754 = vmatprep.subr.mxu0 %v14571_v0 }
 0x186   :  { %12797 = vmatprep.subr.mxu1 %v14571_v0  ;;  %12755 = vmatpush3.msra.mxu0 %v1331_v62 }
 0x187   :  { %12798 = vmatpush3.msra.mxu1 %v15196_v5  ;;  %12756 = vmatprep.subr.mxu0 %v14571_v0 }
 0x188   :  { %12799 = vmatprep.subr.mxu1 %v14571_v0  ;;  %12757 = vmatpush3.msra.mxu0 %v1338_v10 }
 0x189   :  { %12800 = vmatpush3.msra.mxu1 %v15210_v14  ;;  %12758 = vmatprep.subr.mxu0 %v14571_v0  ;;  %v11081_v14 = vld [vmem:[%s18809_s4 + $0x10] sm:$0xff] }
 0x18a   :  { %12801 = vmatprep.subr.mxu1 %v14571_v0  ;;  %12759 = vmatpush3.msra.mxu0 %v1345_v20  ;;  %v1883_v20 = vsel %vm1881_vm2, %v11081_v14, 0 }
 0x18b   :  { %12802 = vmatpush3.msra.mxu1 %v15222_v21  ;;  %12760 = vmatprep.subr.mxu0 %v14571_v0  ;;  %v15603_v21 = vand.u32 4294901760, %v1883_v20 }
 0x18c   :  { %12803 = vmatprep.subr.mxu1 %v14571_v0  ;;  %12761 = vmatpush3.msra.mxu0 %v1352_v28 }
 0x18d   :  { %12804 = vmatpush3.msra.mxu1 %v15236_v29  ;;  %12762 = vmatprep.subr.mxu0 %v14571_v0  ;;  %v15606_v22 = vsub.f32 %v1883_v20, %v15603_v21 }
 0x18e   :  { %12805 = vmatprep.subr.mxu1 %v14571_v0  ;;  %12763 = vmatpush3.msra.mxu0 %v1359_v48 }
 0x18f   :  { %12806 = vmatpush3.msra.mxu1 %v15262_v52  ;;  %12764 = vmatprep.subr.mxu0 %v14571_v0  ;;  %v1956_v28 = vand.u32 4294901760, %v15606_v22 }
 0x190   :  { %12807 = vmatprep.subr.mxu1 %v14571_v0  ;;  %12765 = vmatpush3.msra.mxu0 %v1366_v8 }
 0x191   :  { %12808 = vmatpush3.msra.mxu1 %v15279_v18  ;;  %12766 = vmatprep.subr.mxu0 %v14571_v0  ;;  %v1957_v29 = vsub.f32 %v15606_v22, %v1956_v28 }
 0x192   :  { %12809 = vmatprep.subr.mxu1 %v14571_v0  ;;  %12767 = vmatpush3.msra.mxu0 %v1373_v23 }
 0x193   :  { %12810 = vmatpush3.msra.mxu1 %v15295_v42  ;;  %12768 = vmatprep.subr.mxu0 %v14571_v0  ;;  %v1958_v34 = vand.u32 4294901760, %v1957_v29 }
 0x194   :  { %12811 = vmatprep.subr.mxu1 %v14571_v0  ;;  %12769 = vmatpush3.msra.mxu0 %v1380_v53 }
 0x195   :  { %12812 = vmatpush3.msra.mxu1 %v15311_v59  ;;  %12770 = vmatprep.subr.mxu0 %v14571_v0 }
 0x196   :  { %12813 = vmatprep.subr.mxu1 %v14571_v0  ;;  %12771 = vmatpush3.msra.mxu0 %v1387_v51 }
 0x197   :  { %12814 = vmatpush3.msra.mxu1 %v15327_v4  ;;  %12772 = vmatprep.subr.mxu0 %v14571_v0  ;;  %v11082_v4 = vld [vmem:[%s18809_s4 + $0x18] sm:$0xff] }
 0x198   :  { %12815 = vmatprep.subr.mxu1 %v14571_v0  ;;  %12773 = vmatpush3.msra.mxu0 %v1394_v16  ;;  %v1886_v16 = vsel %vm1881_vm2, %v11082_v4, 0 }
 0x199   :  { %12816 = vmatpush3.msra.mxu1 %v15343_v33  ;;  %12774 = vmatprep.subr.mxu0 %v14571_v0  ;;  %v15617_v27 = vand.u32 4294901760, %v1886_v16 }
 0x19a   :  { %12817 = vmatprep.subr.mxu1 %v14571_v0  ;;  %12775 = vmatpush3.msra.mxu0 %v1401_v45 }
 0x19b   :  { %12818 = vmatpush3.msra.mxu1 %v15358_v17  ;;  %12776 = vmatprep.subr.mxu0 %v14571_v0  ;;  %v1965_v1 = vsub.f32 %v1886_v16, %v15617_v27  ;;  %v11091_v16 = vld [vmem:[%s18806_s8 + $0x140] sm:$0xff] }
 0x19c   :  { %12819 = vmatprep.subr.mxu1 %v14571_v0  ;;  %12777 = vmatpush3.msra.mxu0 %v1408_v19  ;;  %v15741_v30 = vand.u32 4294901760, %v11091_v16 }
 0x19d   :  { %12820 = vmatpush3.msra.mxu1 %v15370_v31  ;;  %12821 = vmatprep.mubr.msk.f32.mxu1 %vm14572_vm1, %v14571_v0  ;;  %v1219_v31 = vld [vmem:[%s18809_s4 + $0x8] sm:$0xff] }
 0x19e   :  { %12778 = vmatprep.subr.mxu0 %v14571_v0  ;;  %12822 = vmatmul.mubr.f32.vlgmr.msra.gmra.mxu1 %v15029_v58 }
 0x19f   :  { %12779 = vmatpush3.msra.mxu0 %v1415_v13  ;;  %12786 = vmatprep.mubr.msk.f32.mxu0 %vm14572_vm1, %v14571_v0  ;;  %v1966_v13 = vand.u32 4294901760, %v1965_v1 }
 0x1a0   :  { %12780 = vmatprep.subr.mxu0 %v14571_v0  ;;  %12831 = vmatprep.mubr.f32.mxu1 %v15603_v21 }
 0x1a1   :  { %12781 = vmatpush3.msra.mxu0 %v1422_v26  ;;  %v2381_v26 = vsel %vm1881_vm2, %v1219_v31, 0  ;;  %v1967_v9 = vsub.f32 %v1965_v1, %v1966_v13 }
 0x1a2   :  { %12782 = vmatprep.subr.mxu0 %v14571_v0  ;;  %v15630_v35 = vand.u32 4294901760, %v2381_v26 }
 0x1a3   :  { %12783 = vmatpush3.msra.mxu0 %v1429_v32  ;;  %v15628_v32 = vand.u32 4294901760, %v2378_v57  ;;  %v1968_v38 = vand.u32 4294901760, %v1967_v9 }
 0x1a4   :  { %12784 = vmatprep.subr.mxu0 %v14571_v0  ;;  %v15638_v43 = vsub.f32 %v2381_v26, %v15630_v35 }
 0x1a5   :  { %12785 = vmatpush3.msra.mxu0 %v1436_v39  ;;  %v15635_v63 = vsub.f32 %v2378_v57, %v15628_v32  ;;  %v11089_v57 = vld [vmem:[%s18806_s8 + $0x130] sm:$0xff] }
 0x1a6   :  { %12787 = vmatmul.mubr.f32.vlgmr.msra.gmra.mxu0 %v15029_v58 }
 0x1a7   :  { %12826 = vmatprep.mubr.f32.mxu0 %v1958_v34 }
 0x1b6   :  { %v815_v47 = vpop.f32.mrf.mxu1 }
 0x1b8   :  { %v12473_v50 = vpop.f32.mrf.mxu1 }
 0x1be   :  { %v664_v54 = vpop.f32.mrf.mxu0 }
 0x1bf   :  { %v816_v55 = vadd.f32 %v815_v47, %v664_v54  ;;  %v2451_v54 = vand.u32 4294901760, %v15635_v63 }
 0x1c0   :  { %v12438_v56 = vpop.f32.mrf.mxu0 }
 0x1d6   :  { %v1008_v60 = vpop.f32.mrf.mxu1 }
 0x1d8   :  { %v12543_v62 = vpop.f32.mrf.mxu1 }
 0x1d9   :  { %v2452_v62 = vsub.f32 %v15635_v63, %v2451_v54 }
 0x1db   :  { %v2453_v14 = vand.u32 4294901760, %v2452_v62 }
 0x1df   :  { %v919_v3 = vpop.f32.mrf.mxu0 }
 0x1e0   :  { %v920_v5 = vadd.f32 %v919_v3, %v816_v55  ;;  %v2461_v55 = vand.u32 4294901760, %v15638_v43 }
 0x1e1   :  { %v12508_v10 = vpop.f32.mrf.mxu0 }
 0x1e2   :  { %v1009_v11 = vadd.f32 %v1008_v60, %v920_v5  ;;  %v2462_v5 = vsub.f32 %v15638_v43, %v2461_v55  ;;  %v11098_v10 = vld [vmem:[%s18806_s8 + $0x178] sm:$0xff] }
 0x1e3   :  { %v15660_v34 = vand.u32 4294901760, %v11098_v10 }
 0x1e4   :  { %v2463_v29 = vand.u32 4294901760, %v2462_v5 }
 0x1f8   :  { %v1214_v41 = vpop.f32.mrf.mxu1 }
 0x1fa   :  { %v12613_v48 = vpop.f32.mrf.mxu1 }
 0x201   :  { %v1127_v52 = vpop.f32.mrf.mxu0 }
 0x202   :  { %v1128_v36 = vadd.f32 %v1127_v52, %v1009_v11  ;;  %v11097_v11 = vld [vmem:[%s18806_s8 + $0x170] sm:$0xff] }
 0x203   :  { %v12578_v8 = vpop.f32.mrf.mxu0  ;;  %v15666_v48 = vand.u32 4294901760, %v11097_v11 }
 0x204   :  { %v1215_v18 = vadd.f32 %v1214_v41, %v1128_v36  ;;  %v11096_v41 = vld [vmem:[%s18806_s8 + $0x168] sm:$0xff]  ;;  %v11095_v8 = vld [vmem:[%s18806_s8 + $0x160] sm:$0xff] }
 0x205   :  { %v15670_v36 = vand.u32 4294901760, %v11096_v41 }
 0x206   :  { %v15632_v40 = vand.u32 4294901760, %v1215_v18 }
 0x208   :  { %v2501_v47 = vsub.f32 %v1215_v18, %v15632_v40  ;;  %v15676_v18 = vsub.f32 %v11098_v10, %v15660_v34 }
 0x20a   :  { %v2502_v3 = vand.u32 4294901760, %v2501_v47 }
 0x20c   :  { %v2503_v20 = vsub.f32 %v2501_v47, %v2502_v3 }
 0x20e   :  { %v2504_v52 = vand.u32 4294901760, %v2503_v20 }
 0x21a   :  { %v1475_v23 = vpop.f32.mrf.mxu1 }
 0x21c   :  { %v12683_v37 = vpop.f32.mrf.mxu1 }
 0x21d   :  { %v15690_v37 = vsub.f32 %v11096_v41, %v15670_v36 }
 0x21f   :  { %v2997_v4 = vand.u32 4294901760, %v15690_v37 }
 0x223   :  { %v1324_v42 = vpop.f32.mrf.mxu0 }
 0x224   :  { %v1476_v45 = vadd.f32 %v1475_v23, %v1324_v42  ;;  %v15679_v23 = vsub.f32 %v11097_v11, %v15666_v48  ;;  %v11093_v42 = vld [vmem:[%s18806_s8 + $0x150] sm:$0xff] }
 0x225   :  { %v12648_v53 = vpop.f32.mrf.mxu0 }
 0x23c   :  { %v1668_v7 = vpop.f32.mrf.mxu1 }
 0x23e   :  { %v12753_v59 = vpop.f32.mrf.mxu1 }
 0x23f   :  { %v11092_v59 = vld [vmem:[%s18806_s8 + $0x148] sm:$0xff] }
 0x245   :  { %v1579_v51 = vpop.f32.mrf.mxu0 }
 0x246   :  { %v1580_v19 = vadd.f32 %v1579_v51, %v1476_v45  ;;  %v15725_v45 = vand.u32 4294901760, %v11092_v59 }
 0x247   :  { %v12718_v61 = vpop.f32.mrf.mxu0 }
 0x248   :  { %v1669_v44 = vadd.f32 %v1668_v7, %v1580_v19  ;;  %v2990_v7 = vand.u32 4294901760, %v15679_v23  ;;  %v15709_v61 = vand.u32 4294901760, %v11093_v42  ;;  %v15756_v26 = vsub.f32 %v11092_v59, %v15725_v45 }
 0x24a   :  { %v15739_v19 = vsub.f32 %v11093_v42, %v15709_v61 }
 0x25e   :  { %v1874_v33 = vpop.f32.mrf.mxu1 }
 0x260   :  { %v12823_v17 = vpop.f32.mrf.mxu1 }
 0x261   :  { %v11090_v17 = vld [vmem:[%s18806_s8 + $0x138] sm:$0xff] }
 0x266   :  { %v1787_v46 = vpop.f32.mrf.mxu0 }
 0x267   :  { %v1788_v49 = vadd.f32 %v1787_v46, %v1669_v44  ;;  %v15758_v46 = vand.u32 4294901760, %v11090_v17 }
 0x268   :  { %v12788_v15 = vpop.f32.mrf.mxu0 }
 0x269   :  { %v1875_v39 = vadd.f32 %v1874_v33, %v1788_v49  ;;  %v11088_v15 = vld [vmem:[%s18806_s8 + $0x128] sm:$0xff] }
 0x26b   :  { %v1919_v25 = vand.u32 4294901760, %v1875_v39 }
 0x26d   :  { %v2006_v2 = vsub.f32 %v1875_v39, %v1919_v25  ;;  %12824 = vmatprep.subr.mxu0 %v1919_v25  ;;  %v15769_v39 = vsub.f32 %v11091_v16, %v15741_v30 }
 0x26e   :  { %12825 = vmatpush3.msra.mxu0 %v1919_v25 }
 0x26f   :  { %12827 = vmatmul.mubr.f32.vlgmr.msra.gmra.mxu0 %v1968_v38  ;;  %12834 = vmatprep.subr.mxu0 %v2006_v2  ;;  %v2007_v50 = vand.u32 4294901760, %v2006_v2 }
 0x270   :  { %12835 = vmatpush3.msra.mxu0 %v2006_v2  ;;  %12836 = vmatprep.mubr.f32.mxu0 %v15606_v22  ;;  %v11094_v22 = vld [vmem:[%s18806_s8 + $0x158] sm:$0xff] }
 0x271   :  { %12844 = vmatprep.subr.mxu0 %v2007_v50  ;;  %v2008_v56 = vsub.f32 %v2006_v2, %v2007_v50  ;;  %v15696_v53 = vand.u32 4294901760, %v11094_v22  ;;  %v15786_v2 = vand.u32 4294901760, %v11088_v15 }
 0x273   :  { %12837 = vmatmul.mubr.f32.vlgmr.msra.gmra.mxu0 %v1965_v1  ;;  %v2009_v60 = vand.u32 4294901760, %v2008_v56  ;;  %v2991_v1 = vsub.f32 %v15679_v23, %v2990_v7  ;;  %v3032_v56 = vand.u32 4294901760, %v15769_v39  ;;  %v15811_v5 = vsub.f32 %v11088_v15, %v15786_v2 }
 0x274   :  { %12845 = vmatpush3.msra.mxu0 %v2007_v50  ;;  %12846 = vmatprep.mubr.f32.mxu0 %v15603_v21  ;;  %v11087_v50 = vld [vmem:[%s18806_s8 + $0x120] sm:$0xff] }
 0x275   :  { %12854 = vmatprep.subr.mxu0 %v15632_v40  ;;  %12829 = vmatprep.subr.mxu1 %v2009_v60  ;;  %v2992_v9 = vand.u32 4294901760, %v2991_v1  ;;  %v15807_v62 = vand.u32 4294901760, %v11087_v50  ;;  %v3033_v41 = vsub.f32 %v15769_v39, %v3032_v56  ;;  %v11083_v1 = vld [vmem:[%s18806_s8 + $0x100] sm:$0xff] }
 0x276   :  { %12830 = vmatpush3.msra.mxu1 %v2009_v60  ;;  %v11086_v60 = vld [vmem:[%s18806_s8 + $0x118] sm:$0xff]  ;;  %v15863_v15 = vand.u32 4294901760, %v11083_v1 }
 0x277   :  { %12832 = vmatmul.mubr.f32.vlgmr.msra.gmra.mxu1 %v15617_v27  ;;  %12839 = vmatprep.subr.mxu1 %v1919_v25  ;;  %v15822_v20 = vand.u32 4294901760, %v11086_v60 }
 0x278   :  { %12847 = vmatmul.mubr.f32.vlgmr.msra.gmra.mxu0 %v15617_v27  ;;  %12840 = vmatpush3.msra.mxu1 %v1919_v25 }
 0x279   :  { %12855 = vmatpush3.msra.mxu0 %v15632_v40  ;;  %12849 = vmatprep.subr.mxu1 %v1919_v25 }
 0x27a   :  { %12864 = vmatprep.subr.mxu0 %v2501_v47  ;;  %12841 = vmatprep.mubr.f32.mxu1 %v1956_v28  ;;  %v15685_v28 = vand.u32 4294901760, %v11095_v8 }
 0x27b   :  { %12856 = vmatprep.mubr.f32.mxu0 %v2453_v14  ;;  %12842 = vmatmul.mubr.f32.vlgmr.msra.gmra.mxu1 %v1966_v13  ;;  %v2998_v13 = vsub.f32 %v15690_v37, %v2997_v4  ;;  %v11085_v14 = vld [vmem:[%s18806_s8 + $0x110] sm:$0xff] }
 0x27c   :  { %12850 = vmatpush3.msra.mxu1 %v1919_v25  ;;  %12857 = vmatmul.mubr.f32.vlgmr.msra.gmra.mxu0 %v2463_v29  ;;  %v15707_v51 = vsub.f32 %v11095_v8, %v15685_v28  ;;  %v15774_v25 = vand.u32 4294901760, %v11089_v57  ;;  %v11084_v8 = vld [vmem:[%s18806_s8 + $0x108] sm:$0xff]  ;;  %v15837_v42 = vand.u32 4294901760, %v11085_v14 }
 0x27d   :  { %12865 = vmatpush3.msra.mxu0 %v2501_v47  ;;  %12859 = vmatprep.subr.mxu1 %v2504_v52  ;;  %v2999_v38 = vand.u32 4294901760, %v2998_v13  ;;  %v3025_v47 = vand.u32 4294901760, %v15756_v26  ;;  %v15852_v13 = vand.u32 4294901760, %v11084_v8 }
 0x27e   :  { %12874 = vmatprep.subr.mxu0 %v2502_v3  ;;  %12851 = vmatprep.mubr.f32.mxu1 %v15603_v21  ;;  %v2983_v21 = vand.u32 4294901760, %v15676_v18  ;;  %v3004_v31 = vand.u32 4294901760, %v15707_v51 }
 0x27f   :  { %12866 = vmatprep.mubr.f32.mxu0 %v15635_v63  ;;  %12852 = vmatmul.mubr.f32.vlgmr.msra.gmra.mxu1 %v15617_v27  ;;  %v15720_v27 = vsub.f32 %v11094_v22, %v15696_v53  ;;  %v15781_v63 = vsub.f32 %v11090_v17, %v15758_v46  ;;  %v3026_v10 = vsub.f32 %v15756_v26, %v3025_v47 }
 0x280   :  { %12860 = vmatpush3.msra.mxu1 %v2504_v52  ;;  %12867 = vmatmul.mubr.f32.vlgmr.msra.gmra.mxu0 %v15638_v43  ;;  %v2984_v33 = vsub.f32 %v15676_v18, %v2983_v21  ;;  %v15835_v22 = vsub.f32 %v11087_v50, %v15807_v62  ;;  %v15850_v17 = vsub.f32 %v11086_v60, %v15822_v20 }
 0x281   :  { %12875 = vmatpush3.msra.mxu0 %v2502_v3  ;;  %12869 = vmatprep.subr.mxu1 %v15632_v40  ;;  %v3011_v49 = vand.u32 4294901760, %v15720_v27  ;;  %v3039_v11 = vand.u32 4294901760, %v15781_v63  ;;  %v3027_v59 = vand.u32 4294901760, %v3026_v10  ;;  %v15873_v50 = vsub.f32 %v11084_v8, %v15852_v13 }
 0x282   :  { %12861 = vmatprep.mubr.f32.mxu1 %v15628_v32  ;;  %12876 = vmatprep.mubr.f32.mxu0 %v15628_v32  ;;  %v2985_v44 = vand.u32 4294901760, %v2984_v33  ;;  %v3053_v33 = vand.u32 4294901760, %v15811_v5  ;;  %v15880_v60 = vsub.f32 %v11083_v1, %v15863_v15 }
 0x283   :  { %12884 = vmatprep.subr.mxu0 %v14571_v0  ;;  %12862 = vmatmul.mubr.f32.vlgmr.msra.gmra.mxu1 %v15630_v35  ;;  %v3012_v43 = vsub.f32 %v15720_v27, %v3011_v49  ;;  %v3040_v16 = vsub.f32 %v15781_v63, %v3039_v11 }
 0x284   :  { %12870 = vmatpush3.msra.mxu1 %v15632_v40  ;;  %12877 = vmatmul.mubr.f32.vlgmr.msra.gmra.mxu0 %v15630_v35 }
 0x285   :  { %12885 = vmatpush3.msra.mxu0 %v15660_v34  ;;  %12879 = vmatprep.subr.mxu1 %v15632_v40  ;;  %v3013_v3 = vand.u32 4294901760, %v3012_v43  ;;  %v3054_v43 = vsub.f32 %v15811_v5, %v3053_v33 }
 0x286   :  { %12886 = vmatprep.subr.mxu0 %v14571_v0  ;;  %12871 = vmatprep.mubr.f32.mxu1 %v2451_v54  ;;  %v15796_v54 = vsub.f32 %v11089_v57, %v15774_v25  ;;  %v3034_v57 = vand.u32 4294901760, %v3033_v41  ;;  %v3081_v41 = vand.u32 4294901760, %v15873_v50 }
 0x287   :  { %12887 = vmatpush3.msra.mxu0 %v15666_v48  ;;  %12872 = vmatmul.mubr.f32.vlgmr.msra.gmra.mxu1 %v2461_v55 }
 0x288   :  { %12888 = vmatprep.subr.mxu0 %v14571_v0  ;;  %12880 = vmatpush3.msra.mxu1 %v15632_v40  ;;  %v3005_v40 = vsub.f32 %v15707_v51, %v3004_v31  ;;  %v3046_v52 = vand.u32 4294901760, %v15796_v54 }
 0x289   :  { %12889 = vmatpush3.msra.mxu0 %v15670_v36  ;;  %12881 = vmatprep.mubr.f32.mxu1 %v15628_v32  ;;  %v3018_v32 = vand.u32 4294901760, %v15739_v19 }
 0x28a   :  { %12890 = vmatprep.subr.mxu0 %v14571_v0  ;;  %12919 = vmatprep.subr.mxu1 %v14571_v0 }
 0x28b   :  { %12891 = vmatpush3.msra.mxu0 %v15685_v28  ;;  %12882 = vmatmul.mubr.f32.vlgmr.msra.gmra.mxu1 %v15630_v35  ;;  %v3006_v35 = vand.u32 4294901760, %v3005_v40  ;;  %v3019_v55 = vsub.f32 %v15739_v19, %v3018_v32  ;;  %v3060_v40 = vand.u32 4294901760, %v15835_v22 }
 0x28c   :  { %12892 = vmatprep.subr.mxu0 %v14571_v0  ;;  %12920 = vmatpush3.msra.mxu1 %v2985_v44  ;;  %v3047_v44 = vsub.f32 %v15796_v54, %v3046_v52 }
 0x28d   :  { %12893 = vmatpush3.msra.mxu0 %v15696_v53  ;;  %12921 = vmatprep.subr.mxu1 %v14571_v0  ;;  %v3020_v29 = vand.u32 4294901760, %v3019_v55 }
 0x28e   :  { %12894 = vmatprep.subr.mxu0 %v14571_v0  ;;  %12922 = vmatpush3.msra.mxu1 %v2992_v9  ;;  %v15861_v9 = vsub.f32 %v11085_v14, %v15837_v42  ;;  %v3048_v55 = vand.u32 4294901760, %v3047_v44  ;;  %v3055_v14 = vand.u32 4294901760, %v3054_v43 }
 0x28f   :  { %12895 = vmatpush3.msra.mxu0 %v15709_v61  ;;  %12923 = vmatprep.subr.mxu1 %v14571_v0 }
 0x290   :  { %12896 = vmatprep.subr.mxu0 %v14571_v0  ;;  %12924 = vmatpush3.msra.mxu1 %v2999_v38  ;;  %v3041_v38 = vand.u32 4294901760, %v3040_v16  ;;  %v3074_v10 = vand.u32 4294901760, %v15861_v9  ;;  %v3088_v16 = vand.u32 4294901760, %v15880_v60 }
 0x291   :  { %12897 = vmatpush3.msra.mxu0 %v15725_v45  ;;  %12925 = vmatprep.subr.mxu1 %v14571_v0 }
 0x292   :  { %12898 = vmatprep.subr.mxu0 %v14571_v0  ;;  %12926 = vmatpush3.msra.mxu1 %v3006_v35  ;;  %v3067_v35 = vand.u32 4294901760, %v15850_v17 }
 0x293   :  { %12899 = vmatpush3.msra.mxu0 %v15741_v30  ;;  %12927 = vmatprep.subr.mxu1 %v14571_v0 }
 0x294   :  { %12900 = vmatprep.subr.mxu0 %v14571_v0  ;;  %12928 = vmatpush3.msra.mxu1 %v3013_v3  ;;  %v3061_v3 = vsub.f32 %v15835_v22, %v3060_v40 }
 0x295   :  { %12901 = vmatpush3.msra.mxu0 %v15758_v46  ;;  %12929 = vmatprep.subr.mxu1 %v14571_v0 }
 0x296   :  { %12902 = vmatprep.subr.mxu0 %v14571_v0  ;;  %12930 = vmatpush3.msra.mxu1 %v3020_v29  ;;  %v3068_v29 = vsub.f32 %v15850_v17, %v3067_v35  ;;  %v3062_v8 = vand.u32 4294901760, %v3061_v3 }
 0x297   :  { %12903 = vmatpush3.msra.mxu0 %v15774_v25  ;;  %12931 = vmatprep.subr.mxu1 %v14571_v0 }
 0x298   :  { %12904 = vmatprep.subr.mxu0 %v14571_v0  ;;  %12932 = vmatpush3.msra.mxu1 %v3027_v59  ;;  %v3075_v59 = vsub.f32 %v15861_v9, %v3074_v10  ;;  %v3069_v1 = vand.u32 4294901760, %v3068_v29 }
 0x299   :  { %12905 = vmatpush3.msra.mxu0 %v15786_v2  ;;  %12933 = vmatprep.subr.mxu1 %v14571_v0 }
 0x29a   :  { %12906 = vmatprep.subr.mxu0 %v14571_v0  ;;  %12934 = vmatpush3.msra.mxu1 %v3034_v57  ;;  %v3082_v57 = vsub.f32 %v15873_v50, %v3081_v41  ;;  %v3076_v44 = vand.u32 4294901760, %v3075_v59 }
 0x29b   :  { %12907 = vmatpush3.msra.mxu0 %v15807_v62  ;;  %12935 = vmatprep.subr.mxu1 %v14571_v0 }
 0x29c   :  { %12908 = vmatprep.subr.mxu0 %v14571_v0  ;;  %12936 = vmatpush3.msra.mxu1 %v3041_v38  ;;  %v3089_v38 = vsub.f32 %v15880_v60, %v3088_v16  ;;  %v3083_v43 = vand.u32 4294901760, %v3082_v57 }
 0x29d   :  { %12909 = vmatpush3.msra.mxu0 %v15822_v20  ;;  %12937 = vmatprep.subr.mxu1 %v14571_v0 }
 0x29e   :  { %12910 = vmatprep.subr.mxu0 %v14571_v0  ;;  %12938 = vmatpush3.msra.mxu1 %v3048_v55  ;;  %v3090_v55 = vand.u32 4294901760, %v3089_v38 }
 0x29f   :  { %12911 = vmatpush3.msra.mxu0 %v15837_v42  ;;  %12939 = vmatprep.subr.mxu1 %v14571_v0 }
 0x2a0   :  { %12912 = vmatprep.subr.mxu0 %v14571_v0  ;;  %12940 = vmatpush3.msra.mxu1 %v3055_v14 }
 0x2a1   :  { %12913 = vmatpush3.msra.mxu0 %v15852_v13  ;;  %12941 = vmatprep.subr.mxu1 %v14571_v0 }
 0x2a2   :  { %12914 = vmatprep.subr.mxu0 %v14571_v0  ;;  %12916 = vmatprep.mubr.msk.f32.mxu0 %vm14572_vm1, %v14571_v0 }
 0x2a3   :  { %12915 = vmatpush3.msra.mxu0 %v15863_v15  ;;  %12942 = vmatpush3.msra.mxu1 %v3062_v8 }
 0x2a4   :  { %12917 = vmatmul.mubr.f32.vlgmr.msra.gmra.mxu0 %v15048_v24  ;;  %12943 = vmatprep.subr.mxu1 %v14571_v0 }
 0x2a5   :  { %12954 = vmatprep.subr.mxu0 %v14571_v0  ;;  %12944 = vmatpush3.msra.mxu1 %v3069_v1 }
 0x2a6   :  { %12955 = vmatpush3.msra.mxu0 %v15676_v18  ;;  %12945 = vmatprep.subr.mxu1 %v14571_v0 }
 0x2a7   :  { %12956 = vmatprep.subr.mxu0 %v14571_v0  ;;  %12946 = vmatpush3.msra.mxu1 %v3076_v44 }
 0x2a8   :  { %12957 = vmatpush3.msra.mxu0 %v15679_v23  ;;  %12947 = vmatprep.subr.mxu1 %v14571_v0 }
 0x2a9   :  { %12958 = vmatprep.subr.mxu0 %v14571_v0  ;;  %12948 = vmatpush3.msra.mxu1 %v3083_v43 }
 0x2aa   :  { %12959 = vmatpush3.msra.mxu0 %v15690_v37  ;;  %12949 = vmatprep.subr.mxu1 %v14571_v0 }
 0x2ab   :  { %12960 = vmatprep.subr.mxu0 %v14571_v0  ;;  %12950 = vmatpush3.msra.mxu1 %v3090_v55 }
 0x2ac   :  { %12951 = vmatprep.mubr.msk.f32.mxu1 %vm14572_vm1, %v14571_v0  ;;  %12961 = vmatpush3.msra.mxu0 %v15707_v51 }
 0x2ad   :  { %12952 = vmatmul.mubr.f32.vlgmr.msra.gmra.mxu1 %v15029_v58  ;;  %12962 = vmatprep.subr.mxu0 %v14571_v0 }
 0x2ae   :  { %12989 = vmatprep.subr.mxu1 %v14571_v0  ;;  %12963 = vmatpush3.msra.mxu0 %v15720_v27 }
 0x2af   :  { %12990 = vmatpush3.msra.mxu1 %v15660_v34  ;;  %12964 = vmatprep.subr.mxu0 %v14571_v0 }
 0x2b0   :  { %12991 = vmatprep.subr.mxu1 %v14571_v0  ;;  %12965 = vmatpush3.msra.mxu0 %v15739_v19 }
 0x2b1   :  { %12992 = vmatpush3.msra.mxu1 %v15666_v48  ;;  %12966 = vmatprep.subr.mxu0 %v14571_v0 }
 0x2b2   :  { %12993 = vmatprep.subr.mxu1 %v14571_v0  ;;  %12967 = vmatpush3.msra.mxu0 %v15756_v26 }
 0x2b3   :  { %12994 = vmatpush3.msra.mxu1 %v15670_v36  ;;  %12968 = vmatprep.subr.mxu0 %v14571_v0 }
 0x2b4   :  { %12995 = vmatprep.subr.mxu1 %v14571_v0  ;;  %12969 = vmatpush3.msra.mxu0 %v15769_v39 }
 0x2b5   :  { %12996 = vmatpush3.msra.mxu1 %v15685_v28  ;;  %12970 = vmatprep.subr.mxu0 %v14571_v0 }
 0x2b6   :  { %12997 = vmatprep.subr.mxu1 %v14571_v0  ;;  %12971 = vmatpush3.msra.mxu0 %v15781_v63 }
 0x2b7   :  { %12998 = vmatpush3.msra.mxu1 %v15696_v53  ;;  %12972 = vmatprep.subr.mxu0 %v14571_v0 }
 0x2b8   :  { %12999 = vmatprep.subr.mxu1 %v14571_v0  ;;  %12973 = vmatpush3.msra.mxu0 %v15796_v54 }
 0x2b9   :  { %13000 = vmatpush3.msra.mxu1 %v15709_v61  ;;  %12974 = vmatprep.subr.mxu0 %v14571_v0 }
 0x2ba   :  { %13001 = vmatprep.subr.mxu1 %v14571_v0  ;;  %12975 = vmatpush3.msra.mxu0 %v15811_v5 }
 0x2bb   :  { %13002 = vmatpush3.msra.mxu1 %v15725_v45  ;;  %12976 = vmatprep.subr.mxu0 %v14571_v0 }
 0x2bc   :  { %13003 = vmatprep.subr.mxu1 %v14571_v0  ;;  %12977 = vmatpush3.msra.mxu0 %v15835_v22 }
 0x2bd   :  { %13004 = vmatpush3.msra.mxu1 %v15741_v30  ;;  %12978 = vmatprep.subr.mxu0 %v14571_v0 }
 0x2be   :  { %13005 = vmatprep.subr.mxu1 %v14571_v0  ;;  %12979 = vmatpush3.msra.mxu0 %v15850_v17 }
 0x2bf   :  { %13006 = vmatpush3.msra.mxu1 %v15758_v46  ;;  %12980 = vmatprep.subr.mxu0 %v14571_v0 }
 0x2c0   :  { %13007 = vmatprep.subr.mxu1 %v14571_v0  ;;  %12981 = vmatpush3.msra.mxu0 %v15861_v9 }
 0x2c1   :  { %13008 = vmatpush3.msra.mxu1 %v15774_v25  ;;  %12982 = vmatprep.subr.mxu0 %v14571_v0 }
 0x2c2   :  { %13009 = vmatprep.subr.mxu1 %v14571_v0  ;;  %12983 = vmatpush3.msra.mxu0 %v15873_v50 }
 0x2c3   :  { %13010 = vmatpush3.msra.mxu1 %v15786_v2  ;;  %12984 = vmatprep.subr.mxu0 %v14571_v0 }
 0x2c4   :  { %13011 = vmatprep.subr.mxu1 %v14571_v0  ;;  %12985 = vmatpush3.msra.mxu0 %v15880_v60 }
 0x2c5   :  { %12986 = vmatprep.mubr.msk.f32.mxu0 %vm14572_vm1, %v14571_v0  ;;  %13012 = vmatpush3.msra.mxu1 %v15807_v62 }
 0x2c6   :  { %12987 = vmatmul.mubr.f32.vlgmr.msra.gmra.mxu0 %v15032_v6  ;;  %13013 = vmatprep.subr.mxu1 %v14571_v0 }
 0x2c7   :  { %13024 = vmatprep.subr.mxu0 %v14571_v0  ;;  %13014 = vmatpush3.msra.mxu1 %v15822_v20 }
 0x2c8   :  { %13025 = vmatpush3.msra.mxu0 %v2983_v21  ;;  %13015 = vmatprep.subr.mxu1 %v14571_v0 }
 0x2c9   :  { %13026 = vmatprep.subr.mxu0 %v14571_v0  ;;  %13016 = vmatpush3.msra.mxu1 %v15837_v42 }
 0x2ca   :  { %13027 = vmatpush3.msra.mxu0 %v2990_v7  ;;  %13017 = vmatprep.subr.mxu1 %v14571_v0 }
 0x2cb   :  { %13028 = vmatprep.subr.mxu0 %v14571_v0  ;;  %13018 = vmatpush3.msra.mxu1 %v15852_v13 }
 0x2cc   :  { %13029 = vmatpush3.msra.mxu0 %v2997_v4  ;;  %13019 = vmatprep.subr.mxu1 %v14571_v0 }
 0x2cd   :  { %13030 = vmatprep.subr.mxu0 %v14571_v0  ;;  %13020 = vmatpush3.msra.mxu1 %v15863_v15 }
 0x2ce   :  { %13021 = vmatprep.mubr.msk.f32.mxu1 %vm14572_vm1, %v14571_v0  ;;  %13031 = vmatpush3.msra.mxu0 %v3004_v31 }
 0x2cf   :  { %13022 = vmatmul.mubr.f32.vlgmr.msra.gmra.mxu1 %v15039_v12  ;;  %13032 = vmatprep.subr.mxu0 %v14571_v0 }
 0x2d0   :  { %13059 = vmatprep.subr.mxu1 %v14571_v0  ;;  %13033 = vmatpush3.msra.mxu0 %v3011_v49 }
 0x2d1   :  { %13060 = vmatpush3.msra.mxu1 %v15660_v34  ;;  %13034 = vmatprep.subr.mxu0 %v14571_v0  ;;  %v11099_v34 = vld [vmem:[%s18809_s4 + $0x20] sm:$0xff] }
 0x2d2   :  { %13061 = vmatprep.subr.mxu1 %v14571_v0  ;;  %13035 = vmatpush3.msra.mxu0 %v3018_v32 }
 0x2d3   :  { %13062 = vmatpush3.msra.mxu1 %v15666_v48  ;;  %13036 = vmatprep.subr.mxu0 %v14571_v0  ;;  %v3534_v48 = vsel %vm1881_vm2, %v11099_v34, 0 }
 0x2d4   :  { %13063 = vmatprep.subr.mxu1 %v14571_v0  ;;  %13037 = vmatpush3.msra.mxu0 %v3025_v47 }
 0x2d5   :  { %13064 = vmatpush3.msra.mxu1 %v15670_v36  ;;  %13038 = vmatprep.subr.mxu0 %v14571_v0  ;;  %v16081_v36 = vand.u32 4294901760, %v3534_v48 }
 0x2d6   :  { %13065 = vmatprep.subr.mxu1 %v14571_v0  ;;  %13039 = vmatpush3.msra.mxu0 %v3032_v56 }
 0x2d7   :  { %13066 = vmatpush3.msra.mxu1 %v15685_v28  ;;  %13040 = vmatprep.subr.mxu0 %v14571_v0  ;;  %v16084_v18 = vsub.f32 %v3534_v48, %v16081_v36 }
 0x2d8   :  { %13067 = vmatprep.subr.mxu1 %v14571_v0  ;;  %13041 = vmatpush3.msra.mxu0 %v3039_v11 }
 0x2d9   :  { %13068 = vmatpush3.msra.mxu1 %v15696_v53  ;;  %13042 = vmatprep.subr.mxu0 %v14571_v0  ;;  %v3607_v28 = vand.u32 4294901760, %v16084_v18 }
 0x2da   :  { %13069 = vmatprep.subr.mxu1 %v14571_v0  ;;  %13043 = vmatpush3.msra.mxu0 %v3046_v52 }
 0x2db   :  { %13070 = vmatpush3.msra.mxu1 %v15709_v61  ;;  %13044 = vmatprep.subr.mxu0 %v14571_v0  ;;  %v3608_v53 = vsub.f32 %v16084_v18, %v3607_v28 }
 0x2dc   :  { %13071 = vmatprep.subr.mxu1 %v14571_v0  ;;  %13045 = vmatpush3.msra.mxu0 %v3053_v33 }
 0x2dd   :  { %13072 = vmatpush3.msra.mxu1 %v15725_v45  ;;  %13046 = vmatprep.subr.mxu0 %v14571_v0  ;;  %v3609_v7 = vand.u32 4294901760, %v3608_v53 }
 0x2de   :  { %13073 = vmatprep.subr.mxu1 %v14571_v0  ;;  %13047 = vmatpush3.msra.mxu0 %v3060_v40 }
 0x2df   :  { %13074 = vmatpush3.msra.mxu1 %v15741_v30  ;;  %13048 = vmatprep.subr.mxu0 %v14571_v0 }
 0x2e0   :  { %13075 = vmatprep.subr.mxu1 %v14571_v0  ;;  %13049 = vmatpush3.msra.mxu0 %v3067_v35 }
 0x2e1   :  { %13076 = vmatpush3.msra.mxu1 %v15758_v46  ;;  %13050 = vmatprep.subr.mxu0 %v14571_v0 }
 0x2e2   :  { %13077 = vmatprep.subr.mxu1 %v14571_v0  ;;  %13051 = vmatpush3.msra.mxu0 %v3074_v10 }
 0x2e3   :  { %13078 = vmatpush3.msra.mxu1 %v15774_v25  ;;  %13052 = vmatprep.subr.mxu0 %v14571_v0 }
 0x2e4   :  { %13079 = vmatprep.subr.mxu1 %v14571_v0  ;;  %13053 = vmatpush3.msra.mxu0 %v3081_v41 }
 0x2e5   :  { %13080 = vmatpush3.msra.mxu1 %v15786_v2  ;;  %13054 = vmatprep.subr.mxu0 %v14571_v0 }
 0x2e6   :  { %13081 = vmatprep.subr.mxu1 %v14571_v0  ;;  %13055 = vmatpush3.msra.mxu0 %v3088_v16 }
 0x2e7   :  { %13056 = vmatprep.mubr.msk.f32.mxu0 %vm14572_vm1, %v14571_v0  ;;  %13082 = vmatpush3.msra.mxu1 %v15807_v62 }
 0x2e8   :  { %13057 = vmatmul.mubr.f32.vlgmr.msra.gmra.mxu0 %v15029_v58  ;;  %13083 = vmatprep.subr.mxu1 %v14571_v0 }
 0x2e9   :  { %13084 = vmatpush3.msra.mxu1 %v15822_v20  ;;  %13091 = vmatprep.mubr.msk.f32.mxu1 %vm14572_vm1, %v14571_v0 }
 0x2ea   :  { %13085 = vmatprep.subr.mxu1 %v14571_v0  ;;  %13096 = vmatprep.mubr.f32.mxu0 %v3609_v7 }
 0x2eb   :  { %13086 = vmatpush3.msra.mxu1 %v15837_v42 }
 0x2ec   :  { %13087 = vmatprep.subr.mxu1 %v14571_v0 }
 0x2ed   :  { %13088 = vmatpush3.msra.mxu1 %v15852_v13 }
 0x2ee   :  { %13089 = vmatprep.subr.mxu1 %v14571_v0 }
 0x2ef   :  { %13090 = vmatpush3.msra.mxu1 %v15863_v15 }
 0x2f0   :  { %13092 = vmatmul.mubr.f32.vlgmr.msra.gmra.mxu1 %v15029_v58 }
 0x2f1   :  { %13101 = vmatprep.mubr.f32.mxu1 %v16081_v36 }
 0x32f   :  { %v12828_v23 = vpop.f32.mrf.mxu0 }
 0x331   :  { %v1960_v37 = vpop.f32.mrf.mxu0 }
 0x333   :  { %v12838_v21 = vpop.f32.mrf.mxu0 }
 0x335   :  { %v2126_v51 = vpop.f32.mrf.mxu0 }
 0x337   :  { %v12833_v61 = vpop.f32.mrf.mxu1 }
 0x338   :  { %v2053_v4 = vadd.f32 %v12833_v61, %v12828_v23  ;;  %v12848_v27 = vpop.f32.mrf.mxu0  ;;  %v11100_v23 = vld [vmem:[%s18809_s4 + $0x28] sm:$0xff] }
 0x339   :  { %v2046_v45 = vpop.f32.mrf.mxu1 }
 0x33a   :  { %v2134_v19 = vadd.f32 %v12838_v21, %v2053_v4  ;;  %v2047_v30 = vadd.f32 %v2046_v45, %v1960_v37  ;;  %v2289_v31 = vpop.f32.mrf.mxu0  ;;  %v3537_v37 = vsel %vm1881_vm2, %v11100_v23, 0 }
 0x33b   :  { %v12843_v26 = vpop.f32.mrf.mxu1  ;;  %v16099_v53 = vand.u32 4294901760, %v3537_v37 }
 0x33c   :  { %v2127_v46 = vadd.f32 %v2126_v51, %v2047_v30  ;;  %v2216_v49 = vadd.f32 %v12843_v26, %v2134_v19  ;;  %v12858_v39 = vpop.f32.mrf.mxu0 }
 0x33d   :  { %v2207_v25 = vpop.f32.mrf.mxu1  ;;  %v16102_v21 = vsub.f32 %v3537_v37, %v16099_v53  ;;  %v11106_v37 = vld [vmem:[%s18806_s8 + $0x1a8] sm:$0xff] }
 0x33e   :  { %v2296_v32 = vadd.f32 %v12848_v27, %v2216_v49  ;;  %v2208_v63 = vadd.f32 %v2207_v25, %v2127_v46  ;;  %v2455_v2 = vpop.f32.mrf.mxu0  ;;  %v11116_v46 = vld [vmem:[%s18806_s8 + $0x1f8] sm:$0xff] }
 0x33f   :  { %v12853_v47 = vpop.f32.mrf.mxu1  ;;  %v3617_v27 = vand.u32 4294901760, %v16102_v21 }
 0x340   :  { %v2290_v54 = vadd.f32 %v2289_v31, %v2208_v63  ;;  %v2374_v56 = vadd.f32 %v12853_v47, %v2296_v32  ;;  %v12868_v62 = vpop.f32.mrf.mxu0  ;;  %v16114_v63 = vand.u32 4294901760, %v11116_v46 }
 0x341   :  { %v2367_v5 = vpop.f32.mrf.mxu1  ;;  %v3618_v30 = vsub.f32 %v16102_v21, %v3617_v27 }
 0x342   :  { %v2466_v11 = vadd.f32 %v12858_v39, %v2374_v56  ;;  %v2368_v20 = vadd.f32 %v2367_v5, %v2290_v54  ;;  %v2621_v22 = vpop.f32.mrf.mxu0  ;;  %v11115_v39 = vld [vmem:[%s18806_s8 + $0x1f0] sm:$0xff]  ;;  %v11113_v5 = vld [vmem:[%s18806_s8 + $0x1e0] sm:$0xff] }
 0x343   :  { %v12863_v52 = vpop.f32.mrf.mxu1  ;;  %v3619_v32 = vand.u32 4294901760, %v3618_v30  ;;  %v16119_v54 = vand.u32 4294901760, %v11115_v39  ;;  %v11105_v30 = vld [vmem:[%s18806_s8 + $0x1a0] sm:$0xff] }
 0x344   :  { %v2456_v42 = vadd.f32 %v2455_v2, %v2368_v20  ;;  %v2548_v33 = vadd.f32 %v12863_v52, %v2466_v11  ;;  %v12878_v40 = vpop.f32.mrf.mxu0  ;;  %v11114_v2 = vld [vmem:[%s18806_s8 + $0x1e8] sm:$0xff]  ;;  %v16128_v11 = vsub.f32 %v11116_v46, %v16114_v63 }
 0x345   :  { %v2541_v17 = vpop.f32.mrf.mxu1  ;;  %v16131_v52 = vsub.f32 %v11115_v39, %v16119_v54  ;;  %v16251_v39 = vand.u32 4294901760, %v11105_v30 }
 0x346   :  { %v2629_v13 = vadd.f32 %v12868_v62, %v2548_v33  ;;  %v2542_v9 = vadd.f32 %v2541_v17, %v2456_v42  ;;  %v2784_v14 = vpop.f32.mrf.mxu0  ;;  %v16121_v62 = vand.u32 4294901760, %v11114_v2  ;;  %v16136_v42 = vand.u32 4294901760, %v11113_v5 }
 0x347   :  { %v12873_v15 = vpop.f32.mrf.mxu1 }
 0x348   :  { %v2622_v50 = vadd.f32 %v2621_v22, %v2542_v9  ;;  %v2711_v35 = vadd.f32 %v12873_v15, %v2629_v13  ;;  %v11112_v22 = vld [vmem:[%s18806_s8 + $0x1d8] sm:$0xff]  ;;  %v16140_v17 = vsub.f32 %v11114_v2, %v16121_v62  ;;  %v11111_v13 = vld [vmem:[%s18806_s8 + $0x1d0] sm:$0xff]  ;;  %v4141_v15 = vand.u32 4294901760, %v16128_v11 }
 0x349   :  { %v2702_v60 = vpop.f32.mrf.mxu1  ;;  %v16146_v9 = vand.u32 4294901760, %v11112_v22 }
 0x34a   :  { %v2791_v3 = vadd.f32 %v12878_v40, %v2711_v35  ;;  %v2703_v10 = vadd.f32 %v2702_v60, %v2622_v50  ;;  %v4148_v40 = vand.u32 4294901760, %v16131_v52  ;;  %v11110_v50 = vld [vmem:[%s18806_s8 + $0x1c8] sm:$0xff]  ;;  %v16155_v35 = vsub.f32 %v11113_v5, %v16136_v42 }
 0x34b   :  { %v12883_v29 = vpop.f32.mrf.mxu1  ;;  %v16157_v60 = vand.u32 4294901760, %v11111_v13 }
 0x34c   :  { %v2785_v41 = vadd.f32 %v2784_v14, %v2703_v10  ;;  %v16091_v8 = vadd.f32 %v12883_v29, %v2791_v3  ;;  %v4155_v3 = vand.u32 4294901760, %v16140_v17  ;;  %v11109_v10 = vld [vmem:[%s18806_s8 + $0x1c0] sm:$0xff]  ;;  %v16166_v14 = vsub.f32 %v11112_v22, %v16146_v9 }
 0x34d   :  { %v2862_v59 = vpop.f32.mrf.mxu1  ;;  %v4142_v29 = vsub.f32 %v16128_v11, %v4141_v15 }
 0x34e   :  { %v16093_v16 = vadd.f32 %v2862_v59, %v2785_v41  ;;  %v16171_v41 = vand.u32 4294901760, %v11110_v50  ;;  %v4149_v59 = vsub.f32 %v16131_v52, %v4148_v40 }
 0x350   :  { %v4150_v23 = vand.u32 4294901760, %v4149_v59 }
 0x364   :  { %v2976_v1 = vpop.f32.mrf.mxu0 }
 0x366   :  { %v12918_v57 = vpop.f32.mrf.mxu0 }
 0x367   :  { %v16184_v57 = vsub.f32 %v11111_v13, %v16157_v60  ;;  %v11102_v13 = vld [vmem:[%s18806_s8 + $0x188] sm:$0xff] }
 0x36d   :  { %v3127_v44 = vpop.f32.mrf.mxu1 }
 0x36e   :  { %v3128_v51 = vadd.f32 %v3127_v44, %v2976_v1  ;;  %v11108_v1 = vld [vmem:[%s18806_s8 + $0x1b8] sm:$0xff]  ;;  %v16186_v44 = vand.u32 4294901760, %v11109_v10 }
 0x36f   :  { %v12953_v38 = vpop.f32.mrf.mxu1 }
 0x370   :  { %v4162_v38 = vand.u32 4294901760, %v16155_v35 }
 0x386   :  { %v3231_v43 = vpop.f32.mrf.mxu0 }
 0x387   :  { %v3232_v4 = vadd.f32 %v3231_v43, %v3128_v51  ;;  %v4156_v43 = vsub.f32 %v16140_v17, %v4155_v3 }
 0x388   :  { %v12988_v55 = vpop.f32.mrf.mxu0 }
 0x389   :  { %v16200_v55 = vsub.f32 %v11110_v50, %v16171_v41  ;;  %v16279_v50 = vsub.f32 %v11105_v30, %v16251_v39 }
 0x38f   :  { %v3320_v34 = vpop.f32.mrf.mxu1 }
 0x390   :  { %v3321_v45 = vadd.f32 %v3320_v34, %v3232_v4  ;;  %v16202_v34 = vand.u32 4294901760, %v11108_v1 }
 0x391   :  { %v13023_v48 = vpop.f32.mrf.mxu1 }
 0x392   :  { %v4169_v48 = vand.u32 4294901760, %v16166_v14  ;;  %v16225_v4 = vsub.f32 %v11108_v1, %v16202_v34 }
 0x3a8   :  { %v3439_v7 = vpop.f32.mrf.mxu0 }
 0x3a9   :  { %v3440_v19 = vadd.f32 %v3439_v7, %v3321_v45  ;;  %v4163_v7 = vsub.f32 %v16155_v35, %v4162_v38  ;;  %v16230_v45 = vand.u32 4294901760, %v11106_v37 }
 0x3aa   :  { %v13058_v61 = vpop.f32.mrf.mxu0 }
 0x3ab   :  { %v4157_v61 = vand.u32 4294901760, %v4156_v43  ;;  %v11101_v43 = vld [vmem:[%s18806_s8 + $0x180] sm:$0xff] }
 0x3b0   :  { %v3526_v31 = vpop.f32.mrf.mxu1 }
 0x3b1   :  { %v3527_v26 = vadd.f32 %v3526_v31, %v3440_v19  ;;  %v4183_v19 = vand.u32 4294901760, %v16200_v55 }
 0x3b2   :  { %v13093_v49 = vpop.f32.mrf.mxu1 }
 0x3b3   :  { %v3570_v25 = vand.u32 4294901760, %v3527_v26  ;;  %v11104_v49 = vld [vmem:[%s18806_s8 + $0x198] sm:$0xff]  ;;  %v4184_v2 = vsub.f32 %v16200_v55, %v4183_v19 }
 0x3b4   :  { %v16266_v5 = vand.u32 4294901760, %v11104_v49 }
 0x3b5   :  { %v3657_v47 = vsub.f32 %v3527_v26, %v3570_v25  ;;  %13094 = vmatprep.subr.mxu0 %v3570_v25 }
 0x3b6   :  { %13095 = vmatpush3.msra.mxu0 %v3570_v25 }
 0x3b7   :  { %13097 = vmatmul.mubr.f32.vlgmr.msra.gmra.mxu0 %v3619_v32  ;;  %13104 = vmatprep.subr.mxu0 %v3657_v47  ;;  %v3658_v56 = vand.u32 4294901760, %v3657_v47  ;;  %v16255_v32 = vsub.f32 %v11106_v37, %v16230_v45 }
 0x3b8   :  { %13105 = vmatpush3.msra.mxu0 %v3657_v47  ;;  %13106 = vmatprep.mubr.f32.mxu0 %v16084_v18  ;;  %v11107_v18 = vld [vmem:[%s18806_s8 + $0x1b0] sm:$0xff] }
 0x3b9   :  { %13114 = vmatprep.subr.mxu0 %v3658_v56  ;;  %v3659_v20 = vsub.f32 %v3657_v47, %v3658_v56  ;;  %v16218_v51 = vand.u32 4294901760, %v11107_v18  ;;  %v4197_v47 = vand.u32 4294901760, %v16225_v4  ;;  %v4211_v1 = vand.u32 4294901760, %v16255_v32 }
 0x3bb   :  { %13107 = vmatmul.mubr.f32.vlgmr.msra.gmra.mxu0 %v16102_v21  ;;  %v3660_v33 = vand.u32 4294901760, %v3659_v20  ;;  %v16213_v21 = vsub.f32 %v11109_v10, %v16186_v44  ;;  %v16240_v31 = vsub.f32 %v11107_v18, %v16218_v51  ;;  %v4198_v59 = vsub.f32 %v16225_v4, %v4197_v47 }
 0x3bc   :  { %13115 = vmatpush3.msra.mxu0 %v3658_v56  ;;  %13116 = vmatprep.mubr.f32.mxu0 %v16081_v36  ;;  %v11103_v56 = vld [vmem:[%s18806_s8 + $0x190] sm:$0xff]  ;;  %v16294_v18 = vsub.f32 %v11104_v49, %v16266_v5 }
 0x3bd   :  { %13099 = vmatprep.subr.mxu1 %v3660_v33  ;;  %13124 = vmatprep.subr.mxu0 %v14571_v0  ;;  %v4190_v46 = vand.u32 4294901760, %v16213_v21  ;;  %v16281_v10 = vand.u32 4294901760, %v11103_v56  ;;  %v4199_v30 = vand.u32 4294901760, %v4198_v59 }
 0x3be   :  { %13100 = vmatpush3.msra.mxu1 %v3660_v33  ;;  %v4204_v33 = vand.u32 4294901760, %v16240_v31  ;;  %v4225_v49 = vand.u32 4294901760, %v16294_v18 }
 0x3bf   :  { %13102 = vmatmul.mubr.f32.vlgmr.msra.gmra.mxu1 %v16099_v53  ;;  %13109 = vmatprep.subr.mxu1 %v3570_v25  ;;  %v4191_v22 = vsub.f32 %v16213_v21, %v4190_v46 }
 0x3c0   :  { %13117 = vmatmul.mubr.f32.vlgmr.msra.gmra.mxu0 %v16099_v53  ;;  %13110 = vmatpush3.msra.mxu1 %v3570_v25  ;;  %v4205_v37 = vsub.f32 %v16240_v31, %v4204_v33 }
 0x3c1   :  { %13125 = vmatpush3.msra.mxu0 %v16114_v63  ;;  %13119 = vmatprep.subr.mxu1 %v3570_v25 }
 0x3c2   :  { %13126 = vmatprep.subr.mxu0 %v14571_v0  ;;  %13111 = vmatprep.mubr.f32.mxu1 %v3607_v28  ;;  %v4143_v28 = vand.u32 4294901760, %v4142_v29  ;;  %v4185_v29 = vand.u32 4294901760, %v4184_v2 }
 0x3c3   :  { %13127 = vmatpush3.msra.mxu0 %v16119_v54  ;;  %13112 = vmatmul.mubr.f32.vlgmr.msra.gmra.mxu1 %v3617_v27  ;;  %v4170_v27 = vsub.f32 %v16166_v14, %v4169_v48 }
 0x3c4   :  { %13128 = vmatprep.subr.mxu0 %v14571_v0  ;;  %13120 = vmatpush3.msra.mxu1 %v3570_v25 }
 0x3c5   :  { %13129 = vmatpush3.msra.mxu0 %v16121_v62  ;;  %13121 = vmatprep.mubr.f32.mxu1 %v16081_v36  ;;  %v4176_v36 = vand.u32 4294901760, %v16184_v57  ;;  %v4171_v25 = vand.u32 4294901760, %v4170_v27  ;;  %v4218_v27 = vand.u32 4294901760, %v16279_v50 }
 0x3c6   :  { %13130 = vmatprep.subr.mxu0 %v14571_v0  ;;  %13159 = vmatprep.subr.mxu1 %v14571_v0 }
 0x3c7   :  { %13131 = vmatpush3.msra.mxu0 %v16136_v42  ;;  %13122 = vmatmul.mubr.f32.vlgmr.msra.gmra.mxu1 %v16099_v53  ;;  %v4164_v53 = vand.u32 4294901760, %v4163_v7  ;;  %v4177_v26 = vsub.f32 %v16184_v57, %v4176_v36  ;;  %v16305_v7 = vsub.f32 %v11103_v56, %v16281_v10  ;;  %v4219_v56 = vsub.f32 %v16279_v50, %v4218_v27 }
 0x3c8   :  { %13132 = vmatprep.subr.mxu0 %v14571_v0  ;;  %13160 = vmatpush3.msra.mxu1 %v4143_v28  ;;  %v16296_v28 = vand.u32 4294901760, %v11102_v13 }
 0x3c9   :  { %13133 = vmatpush3.msra.mxu0 %v16146_v9  ;;  %13161 = vmatprep.subr.mxu1 %v14571_v0  ;;  %v4178_v20 = vand.u32 4294901760, %v4177_v26  ;;  %v4220_v59 = vand.u32 4294901760, %v4219_v56 }
 0x3ca   :  { %13134 = vmatprep.subr.mxu0 %v14571_v0  ;;  %13162 = vmatpush3.msra.mxu1 %v4150_v23  ;;  %v4192_v23 = vand.u32 4294901760, %v4191_v22  ;;  %v16317_v26 = vsub.f32 %v11102_v13, %v16296_v28  ;;  %v4226_v13 = vsub.f32 %v16294_v18, %v4225_v49 }
 0x3cb   :  { %13135 = vmatpush3.msra.mxu0 %v16157_v60  ;;  %13163 = vmatprep.subr.mxu1 %v14571_v0 }
 0x3cc   :  { %13136 = vmatprep.subr.mxu0 %v14571_v0  ;;  %13164 = vmatpush3.msra.mxu1 %v4157_v61  ;;  %v16307_v61 = vand.u32 4294901760, %v11101_v43 }
 0x3cd   :  { %13137 = vmatpush3.msra.mxu0 %v16171_v41  ;;  %13165 = vmatprep.subr.mxu1 %v14571_v0 }
 0x3ce   :  { %13138 = vmatprep.subr.mxu0 %v14571_v0  ;;  %13166 = vmatpush3.msra.mxu1 %v4164_v53  ;;  %v4212_v53 = vsub.f32 %v16255_v32, %v4211_v1  ;;  %v16324_v2 = vsub.f32 %v11101_v43, %v16307_v61 }
 0x3cf   :  { %13139 = vmatpush3.msra.mxu0 %v16186_v44  ;;  %13167 = vmatprep.subr.mxu1 %v14571_v0 }
 0x3d0   :  { %13140 = vmatprep.subr.mxu0 %v14571_v0  ;;  %13168 = vmatpush3.msra.mxu1 %v4171_v25  ;;  %v4206_v25 = vand.u32 4294901760, %v4205_v37  ;;  %v4213_v22 = vand.u32 4294901760, %v4212_v53  ;;  %v4227_v37 = vand.u32 4294901760, %v4226_v13 }
 0x3d1   :  { %13141 = vmatpush3.msra.mxu0 %v16202_v34  ;;  %13169 = vmatprep.subr.mxu1 %v14571_v0 }
 0x3d2   :  { %13142 = vmatprep.subr.mxu0 %v14571_v0  ;;  %13170 = vmatpush3.msra.mxu1 %v4178_v20  ;;  %v4232_v20 = vand.u32 4294901760, %v16305_v7 }
 0x3d3   :  { %13143 = vmatpush3.msra.mxu0 %v16218_v51  ;;  %13171 = vmatprep.subr.mxu1 %v14571_v0 }
 0x3d4   :  { %13144 = vmatprep.subr.mxu0 %v14571_v0  ;;  %13172 = vmatpush3.msra.mxu1 %v4185_v29  ;;  %v4239_v29 = vand.u32 4294901760, %v16317_v26  ;;  %v4233_v43 = vsub.f32 %v16305_v7, %v4232_v20 }
 0x3d5   :  { %13145 = vmatpush3.msra.mxu0 %v16230_v45  ;;  %13173 = vmatprep.subr.mxu1 %v14571_v0 }
 0x3d6   :  { %13146 = vmatprep.subr.mxu0 %v14571_v0  ;;  %13174 = vmatpush3.msra.mxu1 %v4192_v23  ;;  %v4246_v23 = vand.u32 4294901760, %v16324_v2  ;;  %v4234_v53 = vand.u32 4294901760, %v4233_v43 }
 0x3d7   :  { %13147 = vmatpush3.msra.mxu0 %v16251_v39  ;;  %13175 = vmatprep.subr.mxu1 %v14571_v0 }
 0x3d8   :  { %13148 = vmatprep.subr.mxu0 %v14571_v0  ;;  %13176 = vmatpush3.msra.mxu1 %v4199_v30  ;;  %v4240_v30 = vsub.f32 %v16317_v26, %v4239_v29 }
 0x3d9   :  { %13149 = vmatpush3.msra.mxu0 %v16266_v5  ;;  %13177 = vmatprep.subr.mxu1 %v14571_v0 }
 0x3da   :  { %13150 = vmatprep.subr.mxu0 %v14571_v0  ;;  %13178 = vmatpush3.msra.mxu1 %v4206_v25  ;;  %v4247_v25 = vsub.f32 %v16324_v2, %v4246_v23  ;;  %v4241_v56 = vand.u32 4294901760, %v4240_v30 }
 0x3db   :  { %13151 = vmatpush3.msra.mxu0 %v16281_v10  ;;  %13179 = vmatprep.subr.mxu1 %v14571_v0 }
 0x3dc   :  { %13152 = vmatprep.subr.mxu0 %v14571_v0  ;;  %13180 = vmatpush3.msra.mxu1 %v4213_v22  ;;  %v4248_v22 = vand.u32 4294901760, %v4247_v25 }
 0x3dd   :  { %13153 = vmatpush3.msra.mxu0 %v16296_v28  ;;  %13181 = vmatprep.subr.mxu1 %v14571_v0 }
 0x3de   :  { %13154 = vmatprep.subr.mxu0 %v14571_v0  ;;  %13156 = vmatprep.mubr.msk.f32.mxu0 %vm14572_vm1, %v14571_v0 }
 0x3df   :  { %13155 = vmatpush3.msra.mxu0 %v16307_v61  ;;  %13182 = vmatpush3.msra.mxu1 %v4220_v59 }
 0x3e0   :  { %13157 = vmatmul.mubr.f32.vlgmr.msra.gmra.mxu0 %v15048_v24  ;;  %13183 = vmatprep.subr.mxu1 %v14571_v0 }
 0x3e1   :  { %13194 = vmatprep.subr.mxu0 %v14571_v0  ;;  %13184 = vmatpush3.msra.mxu1 %v4227_v37  ;;  %v11134_v37 = vld [vmem:[%s18806_s8 + $0x278] sm:$0xff] }
 0x3e2   :  { %13195 = vmatpush3.msra.mxu0 %v16128_v11  ;;  %13185 = vmatprep.subr.mxu1 %v14571_v0 }
 0x3e3   :  { %13196 = vmatprep.subr.mxu0 %v14571_v0  ;;  %13186 = vmatpush3.msra.mxu1 %v4234_v53  ;;  %v11133_v53 = vld [vmem:[%s18806_s8 + $0x270] sm:$0xff] }
 0x3e4   :  { %13197 = vmatpush3.msra.mxu0 %v16131_v52  ;;  %13187 = vmatprep.subr.mxu1 %v14571_v0 }
 0x3e5   :  { %13198 = vmatprep.subr.mxu0 %v14571_v0  ;;  %13188 = vmatpush3.msra.mxu1 %v4241_v56 }
 0x3e6   :  { %13199 = vmatpush3.msra.mxu0 %v16140_v17  ;;  %13189 = vmatprep.subr.mxu1 %v14571_v0 }
 0x3e7   :  { %13200 = vmatprep.subr.mxu0 %v14571_v0  ;;  %13190 = vmatpush3.msra.mxu1 %v4248_v22  ;;  %v16560_v22 = vand.u32 4294901760, %v11134_v37 }
 0x3e8   :  { %13191 = vmatprep.mubr.msk.f32.mxu1 %vm14572_vm1, %v14571_v0  ;;  %13201 = vmatpush3.msra.mxu0 %v16155_v35 }
 0x3e9   :  { %13192 = vmatmul.mubr.f32.vlgmr.msra.gmra.mxu1 %v15029_v58  ;;  %13202 = vmatprep.subr.mxu0 %v14571_v0 }
 0x3ea   :  { %13229 = vmatprep.subr.mxu1 %v14571_v0  ;;  %13203 = vmatpush3.msra.mxu0 %v16166_v14 }
 0x3eb   :  { %13230 = vmatpush3.msra.mxu1 %v16114_v63  ;;  %13204 = vmatprep.subr.mxu0 %v14571_v0 }
 0x3ec   :  { %13231 = vmatprep.subr.mxu1 %v14571_v0  ;;  %13205 = vmatpush3.msra.mxu0 %v16184_v57 }
 0x3ed   :  { %13232 = vmatpush3.msra.mxu1 %v16119_v54  ;;  %13206 = vmatprep.subr.mxu0 %v14571_v0 }
 0x3ee   :  { %13233 = vmatprep.subr.mxu1 %v14571_v0  ;;  %13207 = vmatpush3.msra.mxu0 %v16200_v55 }
 0x3ef   :  { %13234 = vmatpush3.msra.mxu1 %v16121_v62  ;;  %13208 = vmatprep.subr.mxu0 %v14571_v0 }
 0x3f0   :  { %13235 = vmatprep.subr.mxu1 %v14571_v0  ;;  %13209 = vmatpush3.msra.mxu0 %v16213_v21 }
 0x3f1   :  { %13236 = vmatpush3.msra.mxu1 %v16136_v42  ;;  %13210 = vmatprep.subr.mxu0 %v14571_v0 }
 0x3f2   :  { %13237 = vmatprep.subr.mxu1 %v14571_v0  ;;  %13211 = vmatpush3.msra.mxu0 %v16225_v4 }
 0x3f3   :  { %13238 = vmatpush3.msra.mxu1 %v16146_v9  ;;  %13212 = vmatprep.subr.mxu0 %v14571_v0 }
 0x3f4   :  { %13239 = vmatprep.subr.mxu1 %v14571_v0  ;;  %13213 = vmatpush3.msra.mxu0 %v16240_v31 }
 0x3f5   :  { %13240 = vmatpush3.msra.mxu1 %v16157_v60  ;;  %13214 = vmatprep.subr.mxu0 %v14571_v0 }
 0x3f6   :  { %13241 = vmatprep.subr.mxu1 %v14571_v0  ;;  %13215 = vmatpush3.msra.mxu0 %v16255_v32 }
 0x3f7   :  { %13242 = vmatpush3.msra.mxu1 %v16171_v41  ;;  %13216 = vmatprep.subr.mxu0 %v14571_v0 }
 0x3f8   :  { %13243 = vmatprep.subr.mxu1 %v14571_v0  ;;  %13217 = vmatpush3.msra.mxu0 %v16279_v50 }
 0x3f9   :  { %13244 = vmatpush3.msra.mxu1 %v16186_v44  ;;  %13218 = vmatprep.subr.mxu0 %v14571_v0 }
 0x3fa   :  { %13245 = vmatprep.subr.mxu1 %v14571_v0  ;;  %13219 = vmatpush3.msra.mxu0 %v16294_v18 }
 0x3fb   :  { %13246 = vmatpush3.msra.mxu1 %v16202_v34  ;;  %13220 = vmatprep.subr.mxu0 %v14571_v0 }
 0x3fc   :  { %13247 = vmatprep.subr.mxu1 %v14571_v0  ;;  %13221 = vmatpush3.msra.mxu0 %v16305_v7  ;;  %v11118_v7 = vld [vmem:[%s18809_s4 + $0x38] sm:$0xff] }
 0x3fd   :  { %13248 = vmatpush3.msra.mxu1 %v16218_v51  ;;  %13222 = vmatprep.subr.mxu0 %v14571_v0 }
 0x3fe   :  { %13249 = vmatprep.subr.mxu1 %v14571_v0  ;;  %13223 = vmatpush3.msra.mxu0 %v16317_v26 }
 0x3ff   :  { %13250 = vmatpush3.msra.mxu1 %v16230_v45  ;;  %13224 = vmatprep.subr.mxu0 %v14571_v0 }
 0x400   :  { %13251 = vmatprep.subr.mxu1 %v14571_v0  ;;  %13225 = vmatpush3.msra.mxu0 %v16324_v2 }
 0x401   :  { %13226 = vmatprep.mubr.msk.f32.mxu0 %vm14572_vm1, %v14571_v0  ;;  %13252 = vmatpush3.msra.mxu1 %v16251_v39 }
 0x402   :  { %13227 = vmatmul.mubr.f32.vlgmr.msra.gmra.mxu0 %v15032_v6  ;;  %13253 = vmatprep.subr.mxu1 %v14571_v0 }
 0x403   :  { %13264 = vmatprep.subr.mxu0 %v14571_v0  ;;  %13254 = vmatpush3.msra.mxu1 %v16266_v5 }
 0x404   :  { %13265 = vmatpush3.msra.mxu0 %v4141_v15  ;;  %13255 = vmatprep.subr.mxu1 %v14571_v0 }
 0x405   :  { %13266 = vmatprep.subr.mxu0 %v14571_v0  ;;  %13256 = vmatpush3.msra.mxu1 %v16281_v10 }
 0x406   :  { %13267 = vmatpush3.msra.mxu0 %v4148_v40  ;;  %13257 = vmatprep.subr.mxu1 %v14571_v0 }
 0x407   :  { %13268 = vmatprep.subr.mxu0 %v14571_v0  ;;  %13258 = vmatpush3.msra.mxu1 %v16296_v28 }
 0x408   :  { %13269 = vmatpush3.msra.mxu0 %v4155_v3  ;;  %13259 = vmatprep.subr.mxu1 %v14571_v0 }
 0x409   :  { %13270 = vmatprep.subr.mxu0 %v14571_v0  ;;  %13260 = vmatpush3.msra.mxu1 %v16307_v61 }
 0x40a   :  { %13261 = vmatprep.mubr.msk.f32.mxu1 %vm14572_vm1, %v14571_v0  ;;  %13271 = vmatpush3.msra.mxu0 %v4162_v38 }
 0x40b   :  { %13262 = vmatmul.mubr.f32.vlgmr.msra.gmra.mxu1 %v15039_v12  ;;  %13272 = vmatprep.subr.mxu0 %v14571_v0 }
 0x40c   :  { %13299 = vmatprep.subr.mxu1 %v14571_v0  ;;  %13273 = vmatpush3.msra.mxu0 %v4169_v48 }
 0x40d   :  { %13300 = vmatpush3.msra.mxu1 %v16114_v63  ;;  %13274 = vmatprep.subr.mxu0 %v14571_v0  ;;  %v11117_v63 = vld [vmem:[%s18809_s4 + $0x30] sm:$0xff] }
 0x40e   :  { %13301 = vmatprep.subr.mxu1 %v14571_v0  ;;  %13275 = vmatpush3.msra.mxu0 %v4176_v36 }
 0x40f   :  { %13302 = vmatpush3.msra.mxu1 %v16119_v54  ;;  %13276 = vmatprep.subr.mxu0 %v14571_v0  ;;  %v4692_v54 = vsel %vm1881_vm2, %v11117_v63, 0  ;;  %v11132_v63 = vld [vmem:[%s18806_s8 + $0x268] sm:$0xff] }
 0x410   :  { %13303 = vmatprep.subr.mxu1 %v14571_v0  ;;  %13277 = vmatpush3.msra.mxu0 %v4183_v19 }
 0x411   :  { %13304 = vmatpush3.msra.mxu1 %v16121_v62  ;;  %13278 = vmatprep.subr.mxu0 %v14571_v0  ;;  %v16525_v62 = vand.u32 4294901760, %v4692_v54 }
 0x412   :  { %13305 = vmatprep.subr.mxu1 %v14571_v0  ;;  %13279 = vmatpush3.msra.mxu0 %v4190_v46 }
 0x413   :  { %13306 = vmatpush3.msra.mxu1 %v16136_v42  ;;  %13280 = vmatprep.subr.mxu0 %v14571_v0  ;;  %v16528_v11 = vsub.f32 %v4692_v54, %v16525_v62 }
 0x414   :  { %13307 = vmatprep.subr.mxu1 %v14571_v0  ;;  %13281 = vmatpush3.msra.mxu0 %v4197_v47 }
 0x415   :  { %13308 = vmatpush3.msra.mxu1 %v16146_v9  ;;  %13282 = vmatprep.subr.mxu0 %v14571_v0  ;;  %v4765_v52 = vand.u32 4294901760, %v16528_v11 }
 0x416   :  { %13309 = vmatprep.subr.mxu1 %v14571_v0  ;;  %13283 = vmatpush3.msra.mxu0 %v4204_v33 }
 0x417   :  { %13310 = vmatpush3.msra.mxu1 %v16157_v60  ;;  %13284 = vmatprep.subr.mxu0 %v14571_v0  ;;  %v4766_v42 = vsub.f32 %v16528_v11, %v4765_v52 }
 0x418   :  { %13311 = vmatprep.subr.mxu1 %v14571_v0  ;;  %13285 = vmatpush3.msra.mxu0 %v4211_v1 }
 0x419   :  { %13312 = vmatpush3.msra.mxu1 %v16171_v41  ;;  %13286 = vmatprep.subr.mxu0 %v14571_v0  ;;  %v4767_v17 = vand.u32 4294901760, %v4766_v42  ;;  %v16565_v42 = vand.u32 4294901760, %v11133_v53 }
 0x41a   :  { %13313 = vmatprep.subr.mxu1 %v14571_v0  ;;  %13287 = vmatpush3.msra.mxu0 %v4218_v27 }
 0x41b   :  { %13314 = vmatpush3.msra.mxu1 %v16186_v44  ;;  %13288 = vmatprep.subr.mxu0 %v14571_v0 }
 0x41c   :  { %13315 = vmatprep.subr.mxu1 %v14571_v0  ;;  %13289 = vmatpush3.msra.mxu0 %v4225_v49 }
 0x41d   :  { %13316 = vmatpush3.msra.mxu1 %v16202_v34  ;;  %13290 = vmatprep.subr.mxu0 %v14571_v0 }
 0x41e   :  { %13317 = vmatprep.subr.mxu1 %v14571_v0  ;;  %13291 = vmatpush3.msra.mxu0 %v4232_v20 }
 0x41f   :  { %13318 = vmatpush3.msra.mxu1 %v16218_v51  ;;  %13292 = vmatprep.subr.mxu0 %v14571_v0 }
 0x420   :  { %13319 = vmatprep.subr.mxu1 %v14571_v0  ;;  %13293 = vmatpush3.msra.mxu0 %v4239_v29 }
 0x421   :  { %13320 = vmatpush3.msra.mxu1 %v16230_v45  ;;  %13294 = vmatprep.subr.mxu0 %v14571_v0 }
 0x422   :  { %13321 = vmatprep.subr.mxu1 %v14571_v0  ;;  %13295 = vmatpush3.msra.mxu0 %v4246_v23 }
 0x423   :  { %13296 = vmatprep.mubr.msk.f32.mxu0 %vm14572_vm1, %v14571_v0  ;;  %13322 = vmatpush3.msra.mxu1 %v16251_v39 }
 0x424   :  { %13297 = vmatmul.mubr.f32.vlgmr.msra.gmra.mxu0 %v15029_v58  ;;  %13323 = vmatprep.subr.mxu1 %v14571_v0 }
 0x425   :  { %13324 = vmatpush3.msra.mxu1 %v16266_v5  ;;  %13331 = vmatprep.mubr.msk.f32.mxu1 %vm14572_vm1, %v14571_v0 }
 0x426   :  { %13325 = vmatprep.subr.mxu1 %v14571_v0  ;;  %13336 = vmatprep.mubr.f32.mxu0 %v4767_v17 }
 0x427   :  { %13326 = vmatpush3.msra.mxu1 %v16281_v10 }
 0x428   :  { %13327 = vmatprep.subr.mxu1 %v14571_v0 }
 0x429   :  { %13328 = vmatpush3.msra.mxu1 %v16296_v28 }
 0x42a   :  { %13329 = vmatprep.subr.mxu1 %v14571_v0 }
 0x42b   :  { %13330 = vmatpush3.msra.mxu1 %v16307_v61  ;;  %v4695_v61 = vsel %vm1881_vm2, %v11118_v7, 0 }
 0x42c   :  { %13332 = vmatmul.mubr.f32.vlgmr.msra.gmra.mxu1 %v15029_v58 }
 0x42d   :  { %13341 = vmatprep.mubr.f32.mxu1 %v16525_v62 }
 0x477   :  { %v13098_v9 = vpop.f32.mrf.mxu0 }
 0x479   :  { %v3611_v15 = vpop.f32.mrf.mxu0 }
 0x47b   :  { %v13108_v40 = vpop.f32.mrf.mxu0 }
 0x47d   :  { %v3777_v60 = vpop.f32.mrf.mxu0 }
 0x47f   :  { %v13103_v35 = vpop.f32.mrf.mxu1 }
 0x480   :  { %v3704_v3 = vadd.f32 %v13103_v35, %v13098_v9  ;;  %v13118_v38 = vpop.f32.mrf.mxu0  ;;  %v16567_v9 = vand.u32 4294901760, %v11132_v63 }
 0x481   :  { %v3697_v14 = vpop.f32.mrf.mxu1 }
 0x482   :  { %v3785_v41 = vadd.f32 %v13108_v40, %v3704_v3  ;;  %v3698_v57 = vadd.f32 %v3697_v14, %v3611_v15  ;;  %v3940_v36 = vpop.f32.mrf.mxu0  ;;  %v11131_v15 = vld [vmem:[%s18806_s8 + $0x260] sm:$0xff]  ;;  %v16574_v40 = vsub.f32 %v11134_v37, %v16560_v22  ;;  %v11130_v3 = vld [vmem:[%s18806_s8 + $0x258] sm:$0xff] }
 0x483   :  { %v13113_v44 = vpop.f32.mrf.mxu1  ;;  %v16582_v14 = vand.u32 4294901760, %v11131_v15 }
 0x484   :  { %v3778_v55 = vadd.f32 %v3777_v60, %v3698_v57  ;;  %v3867_v34 = vadd.f32 %v13113_v44, %v3785_v41  ;;  %v16577_v60 = vsub.f32 %v11133_v53, %v16565_v42  ;;  %v16586_v57 = vsub.f32 %v11132_v63, %v16567_v9  ;;  %v11129_v44 = vld [vmem:[%s18806_s8 + $0x250] sm:$0xff] }
 0x485   :  { %v3858_v48 = vpop.f32.mrf.mxu1 }
 0x486   :  { %v3947_v21 = vadd.f32 %v13118_v38, %v3867_v34  ;;  %v3859_v51 = vadd.f32 %v3858_v48, %v3778_v55  ;;  %v16592_v38 = vand.u32 4294901760, %v11130_v3  ;;  %v5299_v55 = vand.u32 4294901760, %v16574_v40  ;;  %v11128_v48 = vld [vmem:[%s18806_s8 + $0x248] sm:$0xff] }
 0x487   :  { %v13123_v4 = vpop.f32.mrf.mxu1  ;;  %v5306_v34 = vand.u32 4294901760, %v16577_v60 }
 0x488   :  { %v3941_v45 = vadd.f32 %v3940_v36, %v3859_v51  ;;  %v4025_v19 = vadd.f32 %v13123_v4, %v3947_v21  ;;  %v16601_v21 = vsub.f32 %v11131_v15, %v16582_v14  ;;  %v16603_v51 = vand.u32 4294901760, %v11129_v44  ;;  %v11127_v4 = vld [vmem:[%s18806_s8 + $0x240] sm:$0xff] }
 0x489   :  { %v4018_v31 = vpop.f32.mrf.mxu1  ;;  %v5313_v36 = vand.u32 4294901760, %v16586_v57 }
 0x48a   :  { %v16536_v46 = vadd.f32 %v4025_v19, %v16091_v8  ;;  %v4019_v39 = vadd.f32 %v4018_v31, %v3941_v45  ;;  %v16545_v8 = vand.u32 4294901760, %v4695_v61  ;;  %v16612_v45 = vsub.f32 %v11130_v3, %v16592_v38 }
 0x48b   :  { %v5300_v19 = vsub.f32 %v16574_v40, %v5299_v55  ;;  %v16617_v31 = vand.u32 4294901760, %v11128_v48 }
 0x48c   :  { %v16539_v32 = vadd.f32 %v4019_v39, %v16093_v16  ;;  %v16548_v27 = vsub.f32 %v4695_v61, %v16545_v8  ;;  %v5307_v39 = vsub.f32 %v16577_v60, %v5306_v34  ;;  %v11124_v61 = vld [vmem:[%s18806_s8 + $0x228] sm:$0xff] }
 0x48e   :  { %v4775_v20 = vand.u32 4294901760, %v16548_v27  ;;  %v5308_v7 = vand.u32 4294901760, %v5307_v39 }
 0x490   :  { %v4776_v59 = vsub.f32 %v16548_v27, %v4775_v20 }
 0x492   :  { %v4777_v56 = vand.u32 4294901760, %v4776_v59  ;;  %v11123_v59 = vld [vmem:[%s18806_s8 + $0x220] sm:$0xff] }
 0x493   :  { %v16697_v53 = vand.u32 4294901760, %v11123_v59 }
 0x4a0   :  { %v4134_v47 = vpop.f32.mrf.mxu0 }
 0x4a2   :  { %v13158_v5 = vpop.f32.mrf.mxu0 }
 0x4a3   :  { %v16630_v5 = vsub.f32 %v11129_v44, %v16603_v51  ;;  %v11120_v44 = vld [vmem:[%s18806_s8 + $0x208] sm:$0xff] }
 0x4a9   :  { %v4285_v33 = vpop.f32.mrf.mxu1 }
 0x4aa   :  { %v4286_v26 = vadd.f32 %v4285_v33, %v4134_v47  ;;  %v11126_v47 = vld [vmem:[%s18806_s8 + $0x238] sm:$0xff]  ;;  %v16632_v33 = vand.u32 4294901760, %v11127_v4 }
 0x4ab   :  { %v13193_v50 = vpop.f32.mrf.mxu1 }
 0x4ac   :  { %v5320_v50 = vand.u32 4294901760, %v16601_v21 }
 0x4c2   :  { %v4389_v10 = vpop.f32.mrf.mxu0 }
 0x4c3   :  { %v4390_v2 = vadd.f32 %v4389_v10, %v4286_v26  ;;  %v5314_v10 = vsub.f32 %v16586_v57, %v5313_v36 }
 0x4c4   :  { %v13228_v1 = vpop.f32.mrf.mxu0 }
 0x4c5   :  { %v16646_v1 = vsub.f32 %v11128_v48, %v16617_v31  ;;  %v16725_v48 = vsub.f32 %v11123_v59, %v16697_v53 }
 0x4cb   :  { %v4478_v18 = vpop.f32.mrf.mxu1 }
 0x4cc   :  { %v4479_v13 = vadd.f32 %v4478_v18, %v4390_v2  ;;  %v16648_v18 = vand.u32 4294901760, %v11126_v47 }
 0x4cd   :  { %v13263_v28 = vpop.f32.mrf.mxu1 }
 0x4ce   :  { %v5327_v28 = vand.u32 4294901760, %v16612_v45  ;;  %v16671_v2 = vsub.f32 %v11126_v47, %v16648_v18 }
 0x4e4   :  { %v4597_v16 = vpop.f32.mrf.mxu0 }
 0x4e5   :  { %v4598_v29 = vadd.f32 %v4597_v16, %v4479_v13  ;;  %v5321_v16 = vsub.f32 %v16601_v21, %v5320_v50  ;;  %v16676_v13 = vand.u32 4294901760, %v11124_v61 }
 0x4e6   :  { %v13298_v49 = vpop.f32.mrf.mxu0 }
 0x4e7   :  { %v5315_v49 = vand.u32 4294901760, %v5314_v10  ;;  %v11119_v10 = vld [vmem:[%s18806_s8 + $0x200] sm:$0xff] }
 0x4ec   :  { %v4684_v43 = vpop.f32.mrf.mxu1 }
 0x4ed   :  { %v4685_v23 = vadd.f32 %v4684_v43, %v4598_v29  ;;  %v5341_v29 = vand.u32 4294901760, %v16646_v1 }
 0x4ee   :  { %v13333_v30 = vpop.f32.mrf.mxu1 }
 0x4ef   :  { %v4728_v25 = vand.u32 4294901760, %v4685_v23  ;;  %v11122_v30 = vld [vmem:[%s18806_s8 + $0x218] sm:$0xff]  ;;  %v5342_v63 = vsub.f32 %v16646_v1, %v5341_v29 }
 0x4f0   :  { %v16712_v15 = vand.u32 4294901760, %v11122_v30 }
 0x4f1   :  { %v4815_v54 = vsub.f32 %v4685_v23, %v4728_v25  ;;  %13334 = vmatprep.subr.mxu0 %v4728_v25 }
 0x4f2   :  { %13335 = vmatpush3.msra.mxu0 %v4728_v25 }
 0x4f3   :  { %13337 = vmatmul.mubr.f32.vlgmr.msra.gmra.mxu0 %v4777_v56  ;;  %13344 = vmatprep.subr.mxu0 %v4815_v54  ;;  %v4816_v17 = vand.u32 4294901760, %v4815_v54  ;;  %v16701_v56 = vsub.f32 %v11124_v61, %v16676_v13 }
 0x4f4   :  { %13345 = vmatpush3.msra.mxu0 %v4815_v54  ;;  %13346 = vmatprep.mubr.f32.mxu0 %v16528_v11  ;;  %v11125_v11 = vld [vmem:[%s18806_s8 + $0x230] sm:$0xff] }
 0x4f5   :  { %13354 = vmatprep.subr.mxu0 %v4816_v17  ;;  %v4817_v35 = vsub.f32 %v4815_v54, %v4816_v17  ;;  %v16664_v26 = vand.u32 4294901760, %v11125_v11  ;;  %v5355_v54 = vand.u32 4294901760, %v16671_v2  ;;  %v5369_v47 = vand.u32 4294901760, %v16701_v56 }
 0x4f7   :  { %13347 = vmatmul.mubr.f32.vlgmr.msra.gmra.mxu0 %v16548_v27  ;;  %v4818_v41 = vand.u32 4294901760, %v4817_v35  ;;  %v16659_v27 = vsub.f32 %v11127_v4, %v16632_v33  ;;  %v16686_v43 = vsub.f32 %v11125_v11, %v16664_v26  ;;  %v5356_v39 = vsub.f32 %v16671_v2, %v5355_v54 }
 0x4f8   :  { %13355 = vmatpush3.msra.mxu0 %v4816_v17  ;;  %13356 = vmatprep.mubr.f32.mxu0 %v16525_v62  ;;  %v11121_v17 = vld [vmem:[%s18806_s8 + $0x210] sm:$0xff]  ;;  %v16740_v11 = vsub.f32 %v11122_v30, %v16712_v15 }
 0x4f9   :  { %13339 = vmatprep.subr.mxu1 %v4818_v41  ;;  %13364 = vmatprep.subr.mxu0 %v14571_v0  ;;  %v5348_v37 = vand.u32 4294901760, %v16659_v27  ;;  %v16727_v4 = vand.u32 4294901760, %v11121_v17  ;;  %v5357_v59 = vand.u32 4294901760, %v5356_v39 }
 0x4fa   :  { %13340 = vmatpush3.msra.mxu1 %v4818_v41  ;;  %v5362_v41 = vand.u32 4294901760, %v16686_v43  ;;  %v5383_v30 = vand.u32 4294901760, %v16740_v11 }
 0x4fb   :  { %13342 = vmatmul.mubr.f32.vlgmr.msra.gmra.mxu1 %v16545_v8  ;;  %13349 = vmatprep.subr.mxu1 %v4728_v25  ;;  %v5349_v3 = vsub.f32 %v16659_v27, %v5348_v37 }
 0x4fc   :  { %13357 = vmatmul.mubr.f32.vlgmr.msra.gmra.mxu0 %v16545_v8  ;;  %13350 = vmatpush3.msra.mxu1 %v4728_v25  ;;  %v5363_v61 = vsub.f32 %v16686_v43, %v5362_v41 }
 0x4fd   :  { %13365 = vmatpush3.msra.mxu0 %v16560_v22  ;;  %13359 = vmatprep.subr.mxu1 %v4728_v25 }
 0x4fe   :  { %13366 = vmatprep.subr.mxu0 %v14571_v0  ;;  %13351 = vmatprep.mubr.f32.mxu1 %v4765_v52  ;;  %v5301_v52 = vand.u32 4294901760, %v5300_v19  ;;  %v5343_v19 = vand.u32 4294901760, %v5342_v63 }
 0x4ff   :  { %13367 = vmatpush3.msra.mxu0 %v16565_v42  ;;  %13352 = vmatmul.mubr.f32.vlgmr.msra.gmra.mxu1 %v4775_v20  ;;  %v5328_v20 = vsub.f32 %v16612_v45, %v5327_v28 }
 0x500   :  { %13368 = vmatprep.subr.mxu0 %v14571_v0  ;;  %13360 = vmatpush3.msra.mxu1 %v4728_v25 }
 0x501   :  { %13369 = vmatpush3.msra.mxu0 %v16567_v9  ;;  %13361 = vmatprep.mubr.f32.mxu1 %v16525_v62  ;;  %v5334_v62 = vand.u32 4294901760, %v16630_v5  ;;  %v5329_v25 = vand.u32 4294901760, %v5328_v20  ;;  %v5376_v20 = vand.u32 4294901760, %v16725_v48 }
 0x502   :  { %13370 = vmatprep.subr.mxu0 %v14571_v0  ;;  %13399 = vmatprep.subr.mxu1 %v14571_v0 }
 0x503   :  { %13371 = vmatpush3.msra.mxu0 %v16582_v14  ;;  %13362 = vmatmul.mubr.f32.vlgmr.msra.gmra.mxu1 %v16545_v8  ;;  %v5322_v8 = vand.u32 4294901760, %v5321_v16  ;;  %v5335_v23 = vsub.f32 %v16630_v5, %v5334_v62  ;;  %v16751_v16 = vsub.f32 %v11121_v17, %v16727_v4  ;;  %v5377_v17 = vsub.f32 %v16725_v48, %v5376_v20 }
 0x504   :  { %13372 = vmatprep.subr.mxu0 %v14571_v0  ;;  %13400 = vmatpush3.msra.mxu1 %v5301_v52  ;;  %v16742_v52 = vand.u32 4294901760, %v11120_v44 }
 0x505   :  { %13373 = vmatpush3.msra.mxu0 %v16592_v38  ;;  %13401 = vmatprep.subr.mxu1 %v14571_v0  ;;  %v5336_v35 = vand.u32 4294901760, %v5335_v23  ;;  %v5378_v39 = vand.u32 4294901760, %v5377_v17 }
 0x506   :  { %13374 = vmatprep.subr.mxu0 %v14571_v0  ;;  %13402 = vmatpush3.msra.mxu1 %v5308_v7  ;;  %v5350_v7 = vand.u32 4294901760, %v5349_v3  ;;  %v16763_v23 = vsub.f32 %v11120_v44, %v16742_v52  ;;  %v5384_v44 = vsub.f32 %v16740_v11, %v5383_v30 }
 0x507   :  { %13375 = vmatpush3.msra.mxu0 %v16603_v51  ;;  %13403 = vmatprep.subr.mxu1 %v14571_v0 }
 0x508   :  { %13376 = vmatprep.subr.mxu0 %v14571_v0  ;;  %13404 = vmatpush3.msra.mxu1 %v5315_v49  ;;  %v16753_v49 = vand.u32 4294901760, %v11119_v10 }
 0x509   :  { %13377 = vmatpush3.msra.mxu0 %v16617_v31  ;;  %13405 = vmatprep.subr.mxu1 %v14571_v0 }
 0x50a   :  { %13378 = vmatprep.subr.mxu0 %v14571_v0  ;;  %13406 = vmatpush3.msra.mxu1 %v5322_v8  ;;  %v5370_v8 = vsub.f32 %v16701_v56, %v5369_v47  ;;  %v16770_v63 = vsub.f32 %v11119_v10, %v16753_v49 }
 0x50b   :  { %13379 = vmatpush3.msra.mxu0 %v16632_v33  ;;  %13407 = vmatprep.subr.mxu1 %v14571_v0 }
 0x50c   :  { %13380 = vmatprep.subr.mxu0 %v14571_v0  ;;  %13408 = vmatpush3.msra.mxu1 %v5329_v25  ;;  %v5364_v25 = vand.u32 4294901760, %v5363_v61  ;;  %v5371_v3 = vand.u32 4294901760, %v5370_v8  ;;  %v5385_v61 = vand.u32 4294901760, %v5384_v44 }
 0x50d   :  { %13381 = vmatpush3.msra.mxu0 %v16648_v18  ;;  %13409 = vmatprep.subr.mxu1 %v14571_v0 }
 0x50e   :  { %13382 = vmatprep.subr.mxu0 %v14571_v0  ;;  %13410 = vmatpush3.msra.mxu1 %v5336_v35  ;;  %v5390_v35 = vand.u32 4294901760, %v16751_v16 }
 0x50f   :  { %13383 = vmatpush3.msra.mxu0 %v16664_v26  ;;  %13411 = vmatprep.subr.mxu1 %v14571_v0 }
 0x510   :  { %13384 = vmatprep.subr.mxu0 %v14571_v0  ;;  %13412 = vmatpush3.msra.mxu1 %v5343_v19  ;;  %v5397_v19 = vand.u32 4294901760, %v16763_v23  ;;  %v5391_v10 = vsub.f32 %v16751_v16, %v5390_v35 }
 0x511   :  { %13385 = vmatpush3.msra.mxu0 %v16676_v13  ;;  %13413 = vmatprep.subr.mxu1 %v14571_v0 }
 0x512   :  { %13386 = vmatprep.subr.mxu0 %v14571_v0  ;;  %13414 = vmatpush3.msra.mxu1 %v5350_v7  ;;  %v5404_v7 = vand.u32 4294901760, %v16770_v63  ;;  %v5392_v8 = vand.u32 4294901760, %v5391_v10 }
 0x513   :  { %13387 = vmatpush3.msra.mxu0 %v16697_v53  ;;  %13415 = vmatprep.subr.mxu1 %v14571_v0 }
 0x514   :  { %13388 = vmatprep.subr.mxu0 %v14571_v0  ;;  %13416 = vmatpush3.msra.mxu1 %v5357_v59  ;;  %v5398_v59 = vsub.f32 %v16763_v23, %v5397_v19 }
 0x515   :  { %13389 = vmatpush3.msra.mxu0 %v16712_v15  ;;  %13417 = vmatprep.subr.mxu1 %v14571_v0 }
 0x516   :  { %13390 = vmatprep.subr.mxu0 %v14571_v0  ;;  %13418 = vmatpush3.msra.mxu1 %v5364_v25  ;;  %v5405_v25 = vsub.f32 %v16770_v63, %v5404_v7  ;;  %v5399_v17 = vand.u32 4294901760, %v5398_v59 }
 0x517   :  { %13391 = vmatpush3.msra.mxu0 %v16727_v4  ;;  %13419 = vmatprep.subr.mxu1 %v14571_v0 }
 0x518   :  { %13392 = vmatprep.subr.mxu0 %v14571_v0  ;;  %13420 = vmatpush3.msra.mxu1 %v5371_v3  ;;  %v5406_v3 = vand.u32 4294901760, %v5405_v25 }
 0x519   :  { %13393 = vmatpush3.msra.mxu0 %v16742_v52  ;;  %13421 = vmatprep.subr.mxu1 %v14571_v0 }
 0x51a   :  { %13394 = vmatprep.subr.mxu0 %v14571_v0  ;;  %13396 = vmatprep.mubr.msk.f32.mxu0 %vm14572_vm1, %v14571_v0 }
 0x51b   :  { %13395 = vmatpush3.msra.mxu0 %v16753_v49  ;;  %13422 = vmatpush3.msra.mxu1 %v5378_v39 }
 0x51c   :  { %13397 = vmatmul.mubr.f32.vlgmr.msra.gmra.mxu0 %v15048_v24  ;;  %13423 = vmatprep.subr.mxu1 %v14571_v0 }
 0x51d   :  { %13434 = vmatprep.subr.mxu0 %v14571_v0  ;;  %13424 = vmatpush3.msra.mxu1 %v5385_v61  ;;  %v11152_v61 = vld [vmem:[%s18806_s8 + $0x2f8] sm:$0xff] }
 0x51e   :  { %13435 = vmatpush3.msra.mxu0 %v16574_v40  ;;  %13425 = vmatprep.subr.mxu1 %v14571_v0 }
 0x51f   :  { %13436 = vmatprep.subr.mxu0 %v14571_v0  ;;  %13426 = vmatpush3.msra.mxu1 %v5392_v8  ;;  %v11151_v8 = vld [vmem:[%s18806_s8 + $0x2f0] sm:$0xff] }
 0x520   :  { %13437 = vmatpush3.msra.mxu0 %v16577_v60  ;;  %13427 = vmatprep.subr.mxu1 %v14571_v0 }
 0x521   :  { %13438 = vmatprep.subr.mxu0 %v14571_v0  ;;  %13428 = vmatpush3.msra.mxu1 %v5399_v17 }
 0x522   :  { %13439 = vmatpush3.msra.mxu0 %v16586_v57  ;;  %13429 = vmatprep.subr.mxu1 %v14571_v0 }
 0x523   :  { %13440 = vmatprep.subr.mxu0 %v14571_v0  ;;  %13430 = vmatpush3.msra.mxu1 %v5406_v3  ;;  %v17006_v3 = vand.u32 4294901760, %v11152_v61 }
 0x524   :  { %13431 = vmatprep.mubr.msk.f32.mxu1 %vm14572_vm1, %v14571_v0  ;;  %13441 = vmatpush3.msra.mxu0 %v16601_v21 }
 0x525   :  { %13432 = vmatmul.mubr.f32.vlgmr.msra.gmra.mxu1 %v15029_v58  ;;  %13442 = vmatprep.subr.mxu0 %v14571_v0 }
 0x526   :  { %13469 = vmatprep.subr.mxu1 %v14571_v0  ;;  %13443 = vmatpush3.msra.mxu0 %v16612_v45 }
 0x527   :  { %13470 = vmatpush3.msra.mxu1 %v16560_v22  ;;  %13444 = vmatprep.subr.mxu0 %v14571_v0 }
 0x528   :  { %13471 = vmatprep.subr.mxu1 %v14571_v0  ;;  %13445 = vmatpush3.msra.mxu0 %v16630_v5 }
 0x529   :  { %13472 = vmatpush3.msra.mxu1 %v16565_v42  ;;  %13446 = vmatprep.subr.mxu0 %v14571_v0 }
 0x52a   :  { %13473 = vmatprep.subr.mxu1 %v14571_v0  ;;  %13447 = vmatpush3.msra.mxu0 %v16646_v1 }
 0x52b   :  { %13474 = vmatpush3.msra.mxu1 %v16567_v9  ;;  %13448 = vmatprep.subr.mxu0 %v14571_v0 }
 0x52c   :  { %13475 = vmatprep.subr.mxu1 %v14571_v0  ;;  %13449 = vmatpush3.msra.mxu0 %v16659_v27 }
 0x52d   :  { %13476 = vmatpush3.msra.mxu1 %v16582_v14  ;;  %13450 = vmatprep.subr.mxu0 %v14571_v0 }
 0x52e   :  { %13477 = vmatprep.subr.mxu1 %v14571_v0  ;;  %13451 = vmatpush3.msra.mxu0 %v16671_v2 }
 0x52f   :  { %13478 = vmatpush3.msra.mxu1 %v16592_v38  ;;  %13452 = vmatprep.subr.mxu0 %v14571_v0 }
 0x530   :  { %13479 = vmatprep.subr.mxu1 %v14571_v0  ;;  %13453 = vmatpush3.msra.mxu0 %v16686_v43 }
 0x531   :  { %13480 = vmatpush3.msra.mxu1 %v16603_v51  ;;  %13454 = vmatprep.subr.mxu0 %v14571_v0 }
 0x532   :  { %13481 = vmatprep.subr.mxu1 %v14571_v0  ;;  %13455 = vmatpush3.msra.mxu0 %v16701_v56 }
 0x533   :  { %13482 = vmatpush3.msra.mxu1 %v16617_v31  ;;  %13456 = vmatprep.subr.mxu0 %v14571_v0 }
 0x534   :  { %13483 = vmatprep.subr.mxu1 %v14571_v0  ;;  %13457 = vmatpush3.msra.mxu0 %v16725_v48 }
 0x535   :  { %13484 = vmatpush3.msra.mxu1 %v16632_v33  ;;  %13458 = vmatprep.subr.mxu0 %v14571_v0 }
 0x536   :  { %13485 = vmatprep.subr.mxu1 %v14571_v0  ;;  %13459 = vmatpush3.msra.mxu0 %v16740_v11 }
 0x537   :  { %13486 = vmatpush3.msra.mxu1 %v16648_v18  ;;  %13460 = vmatprep.subr.mxu0 %v14571_v0 }
 0x538   :  { %13487 = vmatprep.subr.mxu1 %v14571_v0  ;;  %13461 = vmatpush3.msra.mxu0 %v16751_v16  ;;  %v11136_v16 = vld [vmem:[%s18809_s4 + $0x48] sm:$0xff] }
 0x539   :  { %13488 = vmatpush3.msra.mxu1 %v16664_v26  ;;  %13462 = vmatprep.subr.mxu0 %v14571_v0 }
 0x53a   :  { %13489 = vmatprep.subr.mxu1 %v14571_v0  ;;  %13463 = vmatpush3.msra.mxu0 %v16763_v23 }
 0x53b   :  { %13490 = vmatpush3.msra.mxu1 %v16676_v13  ;;  %13464 = vmatprep.subr.mxu0 %v14571_v0 }
 0x53c   :  { %13491 = vmatprep.subr.mxu1 %v14571_v0  ;;  %13465 = vmatpush3.msra.mxu0 %v16770_v63 }
 0x53d   :  { %13466 = vmatprep.mubr.msk.f32.mxu0 %vm14572_vm1, %v14571_v0  ;;  %13492 = vmatpush3.msra.mxu1 %v16697_v53 }
 0x53e   :  { %13467 = vmatmul.mubr.f32.vlgmr.msra.gmra.mxu0 %v15032_v6  ;;  %13493 = vmatprep.subr.mxu1 %v14571_v0 }
 0x53f   :  { %13504 = vmatprep.subr.mxu0 %v14571_v0  ;;  %13494 = vmatpush3.msra.mxu1 %v16712_v15 }
 0x540   :  { %13505 = vmatpush3.msra.mxu0 %v5299_v55  ;;  %13495 = vmatprep.subr.mxu1 %v14571_v0 }
 0x541   :  { %13506 = vmatprep.subr.mxu0 %v14571_v0  ;;  %13496 = vmatpush3.msra.mxu1 %v16727_v4 }
 0x542   :  { %13507 = vmatpush3.msra.mxu0 %v5306_v34  ;;  %13497 = vmatprep.subr.mxu1 %v14571_v0 }
 0x543   :  { %13508 = vmatprep.subr.mxu0 %v14571_v0  ;;  %13498 = vmatpush3.msra.mxu1 %v16742_v52 }
 0x544   :  { %13509 = vmatpush3.msra.mxu0 %v5313_v36  ;;  %13499 = vmatprep.subr.mxu1 %v14571_v0 }
 0x545   :  { %13510 = vmatprep.subr.mxu0 %v14571_v0  ;;  %13500 = vmatpush3.msra.mxu1 %v16753_v49 }
 0x546   :  { %13501 = vmatprep.mubr.msk.f32.mxu1 %vm14572_vm1, %v14571_v0  ;;  %13511 = vmatpush3.msra.mxu0 %v5320_v50 }
 0x547   :  { %13502 = vmatmul.mubr.f32.vlgmr.msra.gmra.mxu1 %v15039_v12  ;;  %13512 = vmatprep.subr.mxu0 %v14571_v0 }
 0x548   :  { %13539 = vmatprep.subr.mxu1 %v14571_v0  ;;  %13513 = vmatpush3.msra.mxu0 %v5327_v28 }
 0x549   :  { %13540 = vmatpush3.msra.mxu1 %v16560_v22  ;;  %13514 = vmatprep.subr.mxu0 %v14571_v0  ;;  %v11135_v22 = vld [vmem:[%s18809_s4 + $0x40] sm:$0xff] }
 0x54a   :  { %13541 = vmatprep.subr.mxu1 %v14571_v0  ;;  %13515 = vmatpush3.msra.mxu0 %v5334_v62 }
 0x54b   :  { %13542 = vmatpush3.msra.mxu1 %v16565_v42  ;;  %13516 = vmatprep.subr.mxu0 %v14571_v0  ;;  %v5850_v42 = vsel %vm1881_vm2, %v11135_v22, 0  ;;  %v11150_v22 = vld [vmem:[%s18806_s8 + $0x2e8] sm:$0xff] }
 0x54c   :  { %13543 = vmatprep.subr.mxu1 %v14571_v0  ;;  %13517 = vmatpush3.msra.mxu0 %v5341_v29 }
 0x54d   :  { %13544 = vmatpush3.msra.mxu1 %v16567_v9  ;;  %13518 = vmatprep.subr.mxu0 %v14571_v0  ;;  %v16971_v9 = vand.u32 4294901760, %v5850_v42 }
 0x54e   :  { %13545 = vmatprep.subr.mxu1 %v14571_v0  ;;  %13519 = vmatpush3.msra.mxu0 %v5348_v37 }
 0x54f   :  { %13546 = vmatpush3.msra.mxu1 %v16582_v14  ;;  %13520 = vmatprep.subr.mxu0 %v14571_v0  ;;  %v16974_v40 = vsub.f32 %v5850_v42, %v16971_v9 }
 0x550   :  { %13547 = vmatprep.subr.mxu1 %v14571_v0  ;;  %13521 = vmatpush3.msra.mxu0 %v5355_v54 }
 0x551   :  { %13548 = vmatpush3.msra.mxu1 %v16592_v38  ;;  %13522 = vmatprep.subr.mxu0 %v14571_v0  ;;  %v5923_v60 = vand.u32 4294901760, %v16974_v40 }
 0x552   :  { %13549 = vmatprep.subr.mxu1 %v14571_v0  ;;  %13523 = vmatpush3.msra.mxu0 %v5362_v41 }
 0x553   :  { %13550 = vmatpush3.msra.mxu1 %v16603_v51  ;;  %13524 = vmatprep.subr.mxu0 %v14571_v0  ;;  %v5924_v14 = vsub.f32 %v16974_v40, %v5923_v60 }
 0x554   :  { %13551 = vmatprep.subr.mxu1 %v14571_v0  ;;  %13525 = vmatpush3.msra.mxu0 %v5369_v47 }
 0x555   :  { %13552 = vmatpush3.msra.mxu1 %v16617_v31  ;;  %13526 = vmatprep.subr.mxu0 %v14571_v0  ;;  %v5925_v57 = vand.u32 4294901760, %v5924_v14  ;;  %v17011_v14 = vand.u32 4294901760, %v11151_v8 }
 0x556   :  { %13553 = vmatprep.subr.mxu1 %v14571_v0  ;;  %13527 = vmatpush3.msra.mxu0 %v5376_v20 }
 0x557   :  { %13554 = vmatpush3.msra.mxu1 %v16632_v33  ;;  %13528 = vmatprep.subr.mxu0 %v14571_v0 }
 0x558   :  { %13555 = vmatprep.subr.mxu1 %v14571_v0  ;;  %13529 = vmatpush3.msra.mxu0 %v5383_v30 }
 0x559   :  { %13556 = vmatpush3.msra.mxu1 %v16648_v18  ;;  %13530 = vmatprep.subr.mxu0 %v14571_v0 }
 0x55a   :  { %13557 = vmatprep.subr.mxu1 %v14571_v0  ;;  %13531 = vmatpush3.msra.mxu0 %v5390_v35 }
 0x55b   :  { %13558 = vmatpush3.msra.mxu1 %v16664_v26  ;;  %13532 = vmatprep.subr.mxu0 %v14571_v0 }
 0x55c   :  { %13559 = vmatprep.subr.mxu1 %v14571_v0  ;;  %13533 = vmatpush3.msra.mxu0 %v5397_v19 }
 0x55d   :  { %13560 = vmatpush3.msra.mxu1 %v16676_v13  ;;  %13534 = vmatprep.subr.mxu0 %v14571_v0 }
 0x55e   :  { %13561 = vmatprep.subr.mxu1 %v14571_v0  ;;  %13535 = vmatpush3.msra.mxu0 %v5404_v7 }
 0x55f   :  { %13536 = vmatprep.mubr.msk.f32.mxu0 %vm14572_vm1, %v14571_v0  ;;  %13562 = vmatpush3.msra.mxu1 %v16697_v53 }
 0x560   :  { %13537 = vmatmul.mubr.f32.vlgmr.msra.gmra.mxu0 %v15029_v58  ;;  %13563 = vmatprep.subr.mxu1 %v14571_v0 }
 0x561   :  { %13564 = vmatpush3.msra.mxu1 %v16712_v15  ;;  %13571 = vmatprep.mubr.msk.f32.mxu1 %vm14572_vm1, %v14571_v0 }
 0x562   :  { %13565 = vmatprep.subr.mxu1 %v14571_v0  ;;  %13576 = vmatprep.mubr.f32.mxu0 %v5925_v57 }
 0x563   :  { %13566 = vmatpush3.msra.mxu1 %v16727_v4 }
 0x564   :  { %13567 = vmatprep.subr.mxu1 %v14571_v0 }
 0x565   :  { %13568 = vmatpush3.msra.mxu1 %v16742_v52 }
 0x566   :  { %13569 = vmatprep.subr.mxu1 %v14571_v0 }
 0x567   :  { %13570 = vmatpush3.msra.mxu1 %v16753_v49  ;;  %v5853_v49 = vsel %vm1881_vm2, %v11136_v16, 0 }
 0x568   :  { %13572 = vmatmul.mubr.f32.vlgmr.msra.gmra.mxu1 %v15029_v58 }
 0x569   :  { %13581 = vmatprep.mubr.f32.mxu1 %v16971_v9 }
 0x5b3   :  { %v13338_v38 = vpop.f32.mrf.mxu0 }
 0x5b5   :  { %v4769_v55 = vpop.f32.mrf.mxu0 }
 0x5b7   :  { %v13348_v34 = vpop.f32.mrf.mxu0 }
 0x5b9   :  { %v4935_v51 = vpop.f32.mrf.mxu0 }
 0x5bb   :  { %v13343_v21 = vpop.f32.mrf.mxu1 }
 0x5bc   :  { %v4862_v36 = vadd.f32 %v13343_v21, %v13338_v38  ;;  %v13358_v50 = vpop.f32.mrf.mxu0  ;;  %v17013_v38 = vand.u32 4294901760, %v11150_v22 }
 0x5bd   :  { %v4855_v45 = vpop.f32.mrf.mxu1 }
 0x5be   :  { %v4943_v31 = vadd.f32 %v13348_v34, %v4862_v36  ;;  %v4856_v5 = vadd.f32 %v4855_v45, %v4769_v55  ;;  %v5098_v62 = vpop.f32.mrf.mxu0  ;;  %v11149_v55 = vld [vmem:[%s18806_s8 + $0x2e0] sm:$0xff]  ;;  %v17020_v34 = vsub.f32 %v11152_v61, %v17006_v3  ;;  %v11148_v36 = vld [vmem:[%s18806_s8 + $0x2d8] sm:$0xff] }
 0x5bf   :  { %v13353_v33 = vpop.f32.mrf.mxu1  ;;  %v17028_v45 = vand.u32 4294901760, %v11149_v55 }
 0x5c0   :  { %v4936_v1 = vadd.f32 %v4935_v51, %v4856_v5  ;;  %v5025_v18 = vadd.f32 %v13353_v33, %v4943_v31  ;;  %v17023_v51 = vsub.f32 %v11151_v8, %v17011_v14  ;;  %v17032_v5 = vsub.f32 %v11150_v22, %v17013_v38  ;;  %v11147_v33 = vld [vmem:[%s18806_s8 + $0x2d0] sm:$0xff] }
 0x5c1   :  { %v5016_v28 = vpop.f32.mrf.mxu1 }
 0x5c2   :  { %v5105_v27 = vadd.f32 %v13358_v50, %v5025_v18  ;;  %v5017_v26 = vadd.f32 %v5016_v28, %v4936_v1  ;;  %v17038_v50 = vand.u32 4294901760, %v11148_v36  ;;  %v6457_v1 = vand.u32 4294901760, %v17020_v34  ;;  %v11146_v28 = vld [vmem:[%s18806_s8 + $0x2c8] sm:$0xff] }
 0x5c3   :  { %v13363_v2 = vpop.f32.mrf.mxu1  ;;  %v6464_v18 = vand.u32 4294901760, %v17023_v51 }
 0x5c4   :  { %v5099_v13 = vadd.f32 %v5098_v62, %v5017_v26  ;;  %v5183_v29 = vadd.f32 %v13363_v2, %v5105_v27  ;;  %v17047_v27 = vsub.f32 %v11149_v55, %v17028_v45  ;;  %v17049_v26 = vand.u32 4294901760, %v11147_v33  ;;  %v11145_v2 = vld [vmem:[%s18806_s8 + $0x2c0] sm:$0xff] }
 0x5c5   :  { %v5176_v43 = vpop.f32.mrf.mxu1  ;;  %v6471_v62 = vand.u32 4294901760, %v17032_v5 }
 0x5c6   :  { %v16982_v37 = vadd.f32 %v5183_v29, %v16536_v46  ;;  %v5177_v53 = vadd.f32 %v5176_v43, %v5099_v13  ;;  %v16991_v46 = vand.u32 4294901760, %v5853_v49  ;;  %v17058_v13 = vsub.f32 %v11148_v36, %v17038_v50 }
 0x5c7   :  { %v6458_v29 = vsub.f32 %v17020_v34, %v6457_v1  ;;  %v17063_v43 = vand.u32 4294901760, %v11146_v28 }
 0x5c8   :  { %v16985_v56 = vadd.f32 %v5177_v53, %v16539_v32  ;;  %v16994_v20 = vsub.f32 %v5853_v49, %v16991_v46  ;;  %v6465_v53 = vsub.f32 %v17023_v51, %v6464_v18  ;;  %v11142_v49 = vld [vmem:[%s18806_s8 + $0x2a8] sm:$0xff] }
 0x5ca   :  { %v5933_v35 = vand.u32 4294901760, %v16994_v20  ;;  %v6466_v16 = vand.u32 4294901760, %v6465_v53 }
 0x5cc   :  { %v5934_v39 = vsub.f32 %v16994_v20, %v5933_v35 }
 0x5ce   :  { %v5935_v17 = vand.u32 4294901760, %v5934_v39  ;;  %v11141_v39 = vld [vmem:[%s18806_s8 + $0x2a0] sm:$0xff] }
 0x5cf   :  { %v17143_v8 = vand.u32 4294901760, %v11141_v39 }
 0x5dc   :  { %v5292_v54 = vpop.f32.mrf.mxu0 }
 0x5de   :  { %v13398_v15 = vpop.f32.mrf.mxu0 }
 0x5df   :  { %v17076_v15 = vsub.f32 %v11147_v33, %v17049_v26  ;;  %v11138_v33 = vld [vmem:[%s18806_s8 + $0x288] sm:$0xff] }
 0x5e5   :  { %v5443_v41 = vpop.f32.mrf.mxu1 }
 0x5e6   :  { %v5444_v23 = vadd.f32 %v5443_v41, %v5292_v54  ;;  %v11144_v54 = vld [vmem:[%s18806_s8 + $0x2b8] sm:$0xff]  ;;  %v17078_v41 = vand.u32 4294901760, %v11145_v2 }
 0x5e7   :  { %v13433_v48 = vpop.f32.mrf.mxu1 }
 0x5e8   :  { %v6478_v48 = vand.u32 4294901760, %v17047_v27 }
 0x5fe   :  { %v5547_v4 = vpop.f32.mrf.mxu0 }
 0x5ff   :  { %v5548_v63 = vadd.f32 %v5547_v4, %v5444_v23  ;;  %v6472_v4 = vsub.f32 %v17032_v5, %v6471_v62 }
 0x600   :  { %v13468_v47 = vpop.f32.mrf.mxu0 }
 0x601   :  { %v17092_v47 = vsub.f32 %v11146_v28, %v17063_v43  ;;  %v17171_v28 = vsub.f32 %v11141_v39, %v17143_v8 }
 0x607   :  { %v5636_v11 = vpop.f32.mrf.mxu1 }
 0x608   :  { %v5637_v44 = vadd.f32 %v5636_v11, %v5548_v63  ;;  %v17094_v11 = vand.u32 4294901760, %v11144_v54 }
 0x609   :  { %v13503_v52 = vpop.f32.mrf.mxu1 }
 0x60a   :  { %v6485_v52 = vand.u32 4294901760, %v17058_v13  ;;  %v17117_v63 = vsub.f32 %v11144_v54, %v17094_v11 }
 0x620   :  { %v5755_v32 = vpop.f32.mrf.mxu0 }
 0x621   :  { %v5756_v19 = vadd.f32 %v5755_v32, %v5637_v44  ;;  %v6479_v32 = vsub.f32 %v17047_v27, %v6478_v48  ;;  %v17122_v44 = vand.u32 4294901760, %v11142_v49 }
 0x622   :  { %v13538_v30 = vpop.f32.mrf.mxu0 }
 0x623   :  { %v6473_v30 = vand.u32 4294901760, %v6472_v4  ;;  %v11137_v4 = vld [vmem:[%s18806_s8 + $0x280] sm:$0xff] }
 0x628   :  { %v5842_v10 = vpop.f32.mrf.mxu1 }
 0x629   :  { %v5843_v7 = vadd.f32 %v5842_v10, %v5756_v19  ;;  %v6499_v19 = vand.u32 4294901760, %v17092_v47 }
 0x62a   :  { %v13573_v59 = vpop.f32.mrf.mxu1 }
 0x62b   :  { %v5886_v25 = vand.u32 4294901760, %v5843_v7  ;;  %v11140_v59 = vld [vmem:[%s18806_s8 + $0x298] sm:$0xff]  ;;  %v6500_v22 = vsub.f32 %v17092_v47, %v6499_v19 }
 0x62c   :  { %v17158_v55 = vand.u32 4294901760, %v11140_v59 }
 0x62d   :  { %v5973_v42 = vsub.f32 %v5843_v7, %v5886_v25  ;;  %13574 = vmatprep.subr.mxu0 %v5886_v25 }
 0x62e   :  { %13575 = vmatpush3.msra.mxu0 %v5886_v25 }
 0x62f   :  { %13577 = vmatmul.mubr.f32.vlgmr.msra.gmra.mxu0 %v5935_v17  ;;  %13584 = vmatprep.subr.mxu0 %v5973_v42  ;;  %v5974_v57 = vand.u32 4294901760, %v5973_v42  ;;  %v17147_v17 = vsub.f32 %v11142_v49, %v17122_v44 }
 0x630   :  { %13585 = vmatpush3.msra.mxu0 %v5973_v42  ;;  %13586 = vmatprep.mubr.f32.mxu0 %v16974_v40  ;;  %v11143_v40 = vld [vmem:[%s18806_s8 + $0x2b0] sm:$0xff] }
 0x631   :  { %13594 = vmatprep.subr.mxu0 %v5974_v57  ;;  %v5975_v21 = vsub.f32 %v5973_v42, %v5974_v57  ;;  %v17110_v23 = vand.u32 4294901760, %v11143_v40  ;;  %v6513_v42 = vand.u32 4294901760, %v17117_v63  ;;  %v6527_v54 = vand.u32 4294901760, %v17147_v17 }
 0x633   :  { %13587 = vmatmul.mubr.f32.vlgmr.msra.gmra.mxu0 %v16994_v20  ;;  %v5976_v31 = vand.u32 4294901760, %v5975_v21  ;;  %v17105_v20 = vsub.f32 %v11145_v2, %v17078_v41  ;;  %v17132_v10 = vsub.f32 %v11143_v40, %v17110_v23  ;;  %v6514_v53 = vsub.f32 %v17117_v63, %v6513_v42 }
 0x634   :  { %13595 = vmatpush3.msra.mxu0 %v5974_v57  ;;  %13596 = vmatprep.mubr.f32.mxu0 %v16971_v9  ;;  %v11139_v57 = vld [vmem:[%s18806_s8 + $0x290] sm:$0xff]  ;;  %v17186_v40 = vsub.f32 %v11140_v59, %v17158_v55 }
 0x635   :  { %13579 = vmatprep.subr.mxu1 %v5976_v31  ;;  %13604 = vmatprep.subr.mxu0 %v14571_v0  ;;  %v6506_v61 = vand.u32 4294901760, %v17105_v20  ;;  %v17173_v2 = vand.u32 4294901760, %v11139_v57  ;;  %v6515_v39 = vand.u32 4294901760, %v6514_v53 }
 0x636   :  { %13580 = vmatpush3.msra.mxu1 %v5976_v31  ;;  %v6520_v31 = vand.u32 4294901760, %v17132_v10  ;;  %v6541_v59 = vand.u32 4294901760, %v17186_v40 }
 0x637   :  { %13582 = vmatmul.mubr.f32.vlgmr.msra.gmra.mxu1 %v16991_v46  ;;  %13589 = vmatprep.subr.mxu1 %v5886_v25  ;;  %v6507_v36 = vsub.f32 %v17105_v20, %v6506_v61 }
 0x638   :  { %13597 = vmatmul.mubr.f32.vlgmr.msra.gmra.mxu0 %v16991_v46  ;;  %13590 = vmatpush3.msra.mxu1 %v5886_v25  ;;  %v6521_v49 = vsub.f32 %v17132_v10, %v6520_v31 }
 0x639   :  { %13605 = vmatpush3.msra.mxu0 %v17006_v3  ;;  %13599 = vmatprep.subr.mxu1 %v5886_v25 }
 0x63a   :  { %13606 = vmatprep.subr.mxu0 %v14571_v0  ;;  %13591 = vmatprep.mubr.f32.mxu1 %v5923_v60  ;;  %v6459_v60 = vand.u32 4294901760, %v6458_v29  ;;  %v6501_v29 = vand.u32 4294901760, %v6500_v22 }
 0x63b   :  { %13607 = vmatpush3.msra.mxu0 %v17011_v14  ;;  %13592 = vmatmul.mubr.f32.vlgmr.msra.gmra.mxu1 %v5933_v35  ;;  %v6486_v35 = vsub.f32 %v17058_v13, %v6485_v52 }
 0x63c   :  { %13608 = vmatprep.subr.mxu0 %v14571_v0  ;;  %13600 = vmatpush3.msra.mxu1 %v5886_v25 }
 0x63d   :  { %13609 = vmatpush3.msra.mxu0 %v17013_v38  ;;  %13601 = vmatprep.mubr.f32.mxu1 %v16971_v9  ;;  %v6492_v9 = vand.u32 4294901760, %v17076_v15  ;;  %v6487_v25 = vand.u32 4294901760, %v6486_v35  ;;  %v6534_v35 = vand.u32 4294901760, %v17171_v28 }
 0x63e   :  { %13610 = vmatprep.subr.mxu0 %v14571_v0  ;;  %13639 = vmatprep.subr.mxu1 %v14571_v0 }
 0x63f   :  { %13611 = vmatpush3.msra.mxu0 %v17028_v45  ;;  %13602 = vmatmul.mubr.f32.vlgmr.msra.gmra.mxu1 %v16991_v46  ;;  %v6480_v46 = vand.u32 4294901760, %v6479_v32  ;;  %v6493_v7 = vsub.f32 %v17076_v15, %v6492_v9  ;;  %v17197_v32 = vsub.f32 %v11139_v57, %v17173_v2  ;;  %v6535_v57 = vsub.f32 %v17171_v28, %v6534_v35 }
 0x640   :  { %13612 = vmatprep.subr.mxu0 %v14571_v0  ;;  %13640 = vmatpush3.msra.mxu1 %v6459_v60  ;;  %v17188_v60 = vand.u32 4294901760, %v11138_v33 }
 0x641   :  { %13613 = vmatpush3.msra.mxu0 %v17038_v50  ;;  %13641 = vmatprep.subr.mxu1 %v14571_v0  ;;  %v6494_v21 = vand.u32 4294901760, %v6493_v7  ;;  %v6536_v53 = vand.u32 4294901760, %v6535_v57 }
 0x642   :  { %13614 = vmatprep.subr.mxu0 %v14571_v0  ;;  %13642 = vmatpush3.msra.mxu1 %v6466_v16  ;;  %v6508_v16 = vand.u32 4294901760, %v6507_v36  ;;  %v17209_v7 = vsub.f32 %v11138_v33, %v17188_v60  ;;  %v6542_v33 = vsub.f32 %v17186_v40, %v6541_v59 }
 0x643   :  { %13615 = vmatpush3.msra.mxu0 %v17049_v26  ;;  %13643 = vmatprep.subr.mxu1 %v14571_v0 }
 0x644   :  { %13616 = vmatprep.subr.mxu0 %v14571_v0  ;;  %13644 = vmatpush3.msra.mxu1 %v6473_v30  ;;  %v17199_v30 = vand.u32 4294901760, %v11137_v4 }
 0x645   :  { %13617 = vmatpush3.msra.mxu0 %v17063_v43  ;;  %13645 = vmatprep.subr.mxu1 %v14571_v0 }
 0x646   :  { %13618 = vmatprep.subr.mxu0 %v14571_v0  ;;  %13646 = vmatpush3.msra.mxu1 %v6480_v46  ;;  %v6528_v46 = vsub.f32 %v17147_v17, %v6527_v54  ;;  %v17216_v22 = vsub.f32 %v11137_v4, %v17199_v30 }
 0x647   :  { %13619 = vmatpush3.msra.mxu0 %v17078_v41  ;;  %13647 = vmatprep.subr.mxu1 %v14571_v0 }
 0x648   :  { %13620 = vmatprep.subr.mxu0 %v14571_v0  ;;  %13648 = vmatpush3.msra.mxu1 %v6487_v25  ;;  %v6522_v25 = vand.u32 4294901760, %v6521_v49  ;;  %v6529_v36 = vand.u32 4294901760, %v6528_v46  ;;  %v6543_v49 = vand.u32 4294901760, %v6542_v33 }
 0x649   :  { %13621 = vmatpush3.msra.mxu0 %v17094_v11  ;;  %13649 = vmatprep.subr.mxu1 %v14571_v0 }
 0x64a   :  { %13622 = vmatprep.subr.mxu0 %v14571_v0  ;;  %13650 = vmatpush3.msra.mxu1 %v6494_v21  ;;  %v6548_v21 = vand.u32 4294901760, %v17197_v32 }
 0x64b   :  { %13623 = vmatpush3.msra.mxu0 %v17110_v23  ;;  %13651 = vmatprep.subr.mxu1 %v14571_v0 }
 0x64c   :  { %13624 = vmatprep.subr.mxu0 %v14571_v0  ;;  %13652 = vmatpush3.msra.mxu1 %v6501_v29  ;;  %v6555_v29 = vand.u32 4294901760, %v17209_v7  ;;  %v6549_v4 = vsub.f32 %v17197_v32, %v6548_v21 }
 0x64d   :  { %13625 = vmatpush3.msra.mxu0 %v17122_v44  ;;  %13653 = vmatprep.subr.mxu1 %v14571_v0 }
 0x64e   :  { %13626 = vmatprep.subr.mxu0 %v14571_v0  ;;  %13654 = vmatpush3.msra.mxu1 %v6508_v16  ;;  %v6562_v16 = vand.u32 4294901760, %v17216_v22  ;;  %v6550_v46 = vand.u32 4294901760, %v6549_v4 }
 0x64f   :  { %13627 = vmatpush3.msra.mxu0 %v17143_v8  ;;  %13655 = vmatprep.subr.mxu1 %v14571_v0 }
 0x650   :  { %13628 = vmatprep.subr.mxu0 %v14571_v0  ;;  %13656 = vmatpush3.msra.mxu1 %v6515_v39  ;;  %v6556_v39 = vsub.f32 %v17209_v7, %v6555_v29 }
 0x651   :  { %13629 = vmatpush3.msra.mxu0 %v17158_v55  ;;  %13657 = vmatprep.subr.mxu1 %v14571_v0 }
 0x652   :  { %13630 = vmatprep.subr.mxu0 %v14571_v0  ;;  %13658 = vmatpush3.msra.mxu1 %v6522_v25  ;;  %v6563_v25 = vsub.f32 %v17216_v22, %v6562_v16  ;;  %v6557_v57 = vand.u32 4294901760, %v6556_v39 }
 0x653   :  { %13631 = vmatpush3.msra.mxu0 %v17173_v2  ;;  %13659 = vmatprep.subr.mxu1 %v14571_v0 }
 0x654   :  { %13632 = vmatprep.subr.mxu0 %v14571_v0  ;;  %13660 = vmatpush3.msra.mxu1 %v6529_v36  ;;  %v6564_v36 = vand.u32 4294901760, %v6563_v25 }
 0x655   :  { %13633 = vmatpush3.msra.mxu0 %v17188_v60  ;;  %13661 = vmatprep.subr.mxu1 %v14571_v0 }
 0x656   :  { %13634 = vmatprep.subr.mxu0 %v14571_v0  ;;  %13636 = vmatprep.mubr.msk.f32.mxu0 %vm14572_vm1, %v14571_v0 }
 0x657   :  { %13635 = vmatpush3.msra.mxu0 %v17199_v30  ;;  %13662 = vmatpush3.msra.mxu1 %v6536_v53 }
 0x658   :  { %13637 = vmatmul.mubr.f32.vlgmr.msra.gmra.mxu0 %v15048_v24  ;;  %13663 = vmatprep.subr.mxu1 %v14571_v0 }
 0x659   :  { %13674 = vmatprep.subr.mxu0 %v14571_v0  ;;  %13664 = vmatpush3.msra.mxu1 %v6543_v49  ;;  %v11170_v49 = vld [vmem:[%s18806_s8 + $0x378] sm:$0xff] }
 0x65a   :  { %13675 = vmatpush3.msra.mxu0 %v17020_v34  ;;  %13665 = vmatprep.subr.mxu1 %v14571_v0 }
 0x65b   :  { %13676 = vmatprep.subr.mxu0 %v14571_v0  ;;  %13666 = vmatpush3.msra.mxu1 %v6550_v46  ;;  %v11169_v46 = vld [vmem:[%s18806_s8 + $0x370] sm:$0xff] }
 0x65c   :  { %13677 = vmatpush3.msra.mxu0 %v17023_v51  ;;  %13667 = vmatprep.subr.mxu1 %v14571_v0 }
 0x65d   :  { %13678 = vmatprep.subr.mxu0 %v14571_v0  ;;  %13668 = vmatpush3.msra.mxu1 %v6557_v57 }
 0x65e   :  { %13679 = vmatpush3.msra.mxu0 %v17032_v5  ;;  %13669 = vmatprep.subr.mxu1 %v14571_v0 }
 0x65f   :  { %13680 = vmatprep.subr.mxu0 %v14571_v0  ;;  %13670 = vmatpush3.msra.mxu1 %v6564_v36  ;;  %v17452_v36 = vand.u32 4294901760, %v11170_v49 }
 0x660   :  { %13671 = vmatprep.mubr.msk.f32.mxu1 %vm14572_vm1, %v14571_v0  ;;  %13681 = vmatpush3.msra.mxu0 %v17047_v27 }
 0x661   :  { %13672 = vmatmul.mubr.f32.vlgmr.msra.gmra.mxu1 %v15029_v58  ;;  %13682 = vmatprep.subr.mxu0 %v14571_v0 }
 0x662   :  { %13709 = vmatprep.subr.mxu1 %v14571_v0  ;;  %13683 = vmatpush3.msra.mxu0 %v17058_v13 }
 0x663   :  { %13710 = vmatpush3.msra.mxu1 %v17006_v3  ;;  %13684 = vmatprep.subr.mxu0 %v14571_v0 }
 0x664   :  { %13711 = vmatprep.subr.mxu1 %v14571_v0  ;;  %13685 = vmatpush3.msra.mxu0 %v17076_v15 }
 0x665   :  { %13712 = vmatpush3.msra.mxu1 %v17011_v14  ;;  %13686 = vmatprep.subr.mxu0 %v14571_v0 }
 0x666   :  { %13713 = vmatprep.subr.mxu1 %v14571_v0  ;;  %13687 = vmatpush3.msra.mxu0 %v17092_v47 }
 0x667   :  { %13714 = vmatpush3.msra.mxu1 %v17013_v38  ;;  %13688 = vmatprep.subr.mxu0 %v14571_v0 }
 0x668   :  { %13715 = vmatprep.subr.mxu1 %v14571_v0  ;;  %13689 = vmatpush3.msra.mxu0 %v17105_v20 }
 0x669   :  { %13716 = vmatpush3.msra.mxu1 %v17028_v45  ;;  %13690 = vmatprep.subr.mxu0 %v14571_v0 }
 0x66a   :  { %13717 = vmatprep.subr.mxu1 %v14571_v0  ;;  %13691 = vmatpush3.msra.mxu0 %v17117_v63 }
 0x66b   :  { %13718 = vmatpush3.msra.mxu1 %v17038_v50  ;;  %13692 = vmatprep.subr.mxu0 %v14571_v0 }
 0x66c   :  { %13719 = vmatprep.subr.mxu1 %v14571_v0  ;;  %13693 = vmatpush3.msra.mxu0 %v17132_v10 }
 0x66d   :  { %13720 = vmatpush3.msra.mxu1 %v17049_v26  ;;  %13694 = vmatprep.subr.mxu0 %v14571_v0 }
 0x66e   :  { %13721 = vmatprep.subr.mxu1 %v14571_v0  ;;  %13695 = vmatpush3.msra.mxu0 %v17147_v17 }
 0x66f   :  { %13722 = vmatpush3.msra.mxu1 %v17063_v43  ;;  %13696 = vmatprep.subr.mxu0 %v14571_v0 }
 0x670   :  { %13723 = vmatprep.subr.mxu1 %v14571_v0  ;;  %13697 = vmatpush3.msra.mxu0 %v17171_v28 }
 0x671   :  { %13724 = vmatpush3.msra.mxu1 %v17078_v41  ;;  %13698 = vmatprep.subr.mxu0 %v14571_v0 }
 0x672   :  { %13725 = vmatprep.subr.mxu1 %v14571_v0  ;;  %13699 = vmatpush3.msra.mxu0 %v17186_v40 }
 0x673   :  { %13726 = vmatpush3.msra.mxu1 %v17094_v11  ;;  %13700 = vmatprep.subr.mxu0 %v14571_v0 }
 0x674   :  { %13727 = vmatprep.subr.mxu1 %v14571_v0  ;;  %13701 = vmatpush3.msra.mxu0 %v17197_v32  ;;  %v11154_v32 = vld [vmem:[%s18809_s4 + $0x58] sm:$0xff] }
 0x675   :  { %13728 = vmatpush3.msra.mxu1 %v17110_v23  ;;  %13702 = vmatprep.subr.mxu0 %v14571_v0 }
 0x676   :  { %13729 = vmatprep.subr.mxu1 %v14571_v0  ;;  %13703 = vmatpush3.msra.mxu0 %v17209_v7 }
 0x677   :  { %13730 = vmatpush3.msra.mxu1 %v17122_v44  ;;  %13704 = vmatprep.subr.mxu0 %v14571_v0 }
 0x678   :  { %13731 = vmatprep.subr.mxu1 %v14571_v0  ;;  %13705 = vmatpush3.msra.mxu0 %v17216_v22 }
 0x679   :  { %13706 = vmatprep.mubr.msk.f32.mxu0 %vm14572_vm1, %v14571_v0  ;;  %13732 = vmatpush3.msra.mxu1 %v17143_v8 }
 0x67a   :  { %13707 = vmatmul.mubr.f32.vlgmr.msra.gmra.mxu0 %v15032_v6  ;;  %13733 = vmatprep.subr.mxu1 %v14571_v0 }
 0x67b   :  { %13744 = vmatprep.subr.mxu0 %v14571_v0  ;;  %13734 = vmatpush3.msra.mxu1 %v17158_v55 }
 0x67c   :  { %13745 = vmatpush3.msra.mxu0 %v6457_v1  ;;  %13735 = vmatprep.subr.mxu1 %v14571_v0 }
 0x67d   :  { %13746 = vmatprep.subr.mxu0 %v14571_v0  ;;  %13736 = vmatpush3.msra.mxu1 %v17173_v2 }
 0x67e   :  { %13747 = vmatpush3.msra.mxu0 %v6464_v18  ;;  %13737 = vmatprep.subr.mxu1 %v14571_v0 }
 0x67f   :  { %13748 = vmatprep.subr.mxu0 %v14571_v0  ;;  %13738 = vmatpush3.msra.mxu1 %v17188_v60 }
 0x680   :  { %13749 = vmatpush3.msra.mxu0 %v6471_v62  ;;  %13739 = vmatprep.subr.mxu1 %v14571_v0 }
 0x681   :  { %13750 = vmatprep.subr.mxu0 %v14571_v0  ;;  %13740 = vmatpush3.msra.mxu1 %v17199_v30 }
 0x682   :  { %13741 = vmatprep.mubr.msk.f32.mxu1 %vm14572_vm1, %v14571_v0  ;;  %13751 = vmatpush3.msra.mxu0 %v6478_v48 }
 0x683   :  { %13742 = vmatmul.mubr.f32.vlgmr.msra.gmra.mxu1 %v15039_v12  ;;  %13752 = vmatprep.subr.mxu0 %v14571_v0 }
 0x684   :  { %13779 = vmatprep.subr.mxu1 %v14571_v0  ;;  %13753 = vmatpush3.msra.mxu0 %v6485_v52 }
 0x685   :  { %13780 = vmatpush3.msra.mxu1 %v17006_v3  ;;  %13754 = vmatprep.subr.mxu0 %v14571_v0  ;;  %v11153_v3 = vld [vmem:[%s18809_s4 + $0x50] sm:$0xff] }
 0x686   :  { %13781 = vmatprep.subr.mxu1 %v14571_v0  ;;  %13755 = vmatpush3.msra.mxu0 %v6492_v9 }
 0x687   :  { %13782 = vmatpush3.msra.mxu1 %v17011_v14  ;;  %13756 = vmatprep.subr.mxu0 %v14571_v0  ;;  %v7008_v14 = vsel %vm1881_vm2, %v11153_v3, 0  ;;  %v11168_v3 = vld [vmem:[%s18806_s8 + $0x368] sm:$0xff] }
 0x688   :  { %13783 = vmatprep.subr.mxu1 %v14571_v0  ;;  %13757 = vmatpush3.msra.mxu0 %v6499_v19 }
 0x689   :  { %13784 = vmatpush3.msra.mxu1 %v17013_v38  ;;  %13758 = vmatprep.subr.mxu0 %v14571_v0  ;;  %v17417_v38 = vand.u32 4294901760, %v7008_v14 }
 0x68a   :  { %13785 = vmatprep.subr.mxu1 %v14571_v0  ;;  %13759 = vmatpush3.msra.mxu0 %v6506_v61 }
 0x68b   :  { %13786 = vmatpush3.msra.mxu1 %v17028_v45  ;;  %13760 = vmatprep.subr.mxu0 %v14571_v0  ;;  %v17420_v34 = vsub.f32 %v7008_v14, %v17417_v38 }
 0x68c   :  { %13787 = vmatprep.subr.mxu1 %v14571_v0  ;;  %13761 = vmatpush3.msra.mxu0 %v6513_v42 }
 0x68d   :  { %13788 = vmatpush3.msra.mxu1 %v17038_v50  ;;  %13762 = vmatprep.subr.mxu0 %v14571_v0  ;;  %v7081_v51 = vand.u32 4294901760, %v17420_v34 }
 0x68e   :  { %13789 = vmatprep.subr.mxu1 %v14571_v0  ;;  %13763 = vmatpush3.msra.mxu0 %v6520_v31 }
 0x68f   :  { %13790 = vmatpush3.msra.mxu1 %v17049_v26  ;;  %13764 = vmatprep.subr.mxu0 %v14571_v0  ;;  %v7082_v45 = vsub.f32 %v17420_v34, %v7081_v51 }
 0x690   :  { %13791 = vmatprep.subr.mxu1 %v14571_v0  ;;  %13765 = vmatpush3.msra.mxu0 %v6527_v54 }
 0x691   :  { %13792 = vmatpush3.msra.mxu1 %v17063_v43  ;;  %13766 = vmatprep.subr.mxu0 %v14571_v0  ;;  %v7083_v5 = vand.u32 4294901760, %v7082_v45  ;;  %v17457_v45 = vand.u32 4294901760, %v11169_v46 }
 0x692   :  { %13793 = vmatprep.subr.mxu1 %v14571_v0  ;;  %13767 = vmatpush3.msra.mxu0 %v6534_v35 }
 0x693   :  { %13794 = vmatpush3.msra.mxu1 %v17078_v41  ;;  %13768 = vmatprep.subr.mxu0 %v14571_v0 }
 0x694   :  { %13795 = vmatprep.subr.mxu1 %v14571_v0  ;;  %13769 = vmatpush3.msra.mxu0 %v6541_v59 }
 0x695   :  { %13796 = vmatpush3.msra.mxu1 %v17094_v11  ;;  %13770 = vmatprep.subr.mxu0 %v14571_v0 }
 0x696   :  { %13797 = vmatprep.subr.mxu1 %v14571_v0  ;;  %13771 = vmatpush3.msra.mxu0 %v6548_v21 }
 0x697   :  { %13798 = vmatpush3.msra.mxu1 %v17110_v23  ;;  %13772 = vmatprep.subr.mxu0 %v14571_v0 }
 0x698   :  { %13799 = vmatprep.subr.mxu1 %v14571_v0  ;;  %13773 = vmatpush3.msra.mxu0 %v6555_v29 }
 0x699   :  { %13800 = vmatpush3.msra.mxu1 %v17122_v44  ;;  %13774 = vmatprep.subr.mxu0 %v14571_v0 }
 0x69a   :  { %13801 = vmatprep.subr.mxu1 %v14571_v0  ;;  %13775 = vmatpush3.msra.mxu0 %v6562_v16 }
 0x69b   :  { %13776 = vmatprep.mubr.msk.f32.mxu0 %vm14572_vm1, %v14571_v0  ;;  %13802 = vmatpush3.msra.mxu1 %v17143_v8 }
 0x69c   :  { %13777 = vmatmul.mubr.f32.vlgmr.msra.gmra.mxu0 %v15029_v58  ;;  %13803 = vmatprep.subr.mxu1 %v14571_v0 }
 0x69d   :  { %13804 = vmatpush3.msra.mxu1 %v17158_v55  ;;  %13811 = vmatprep.mubr.msk.f32.mxu1 %vm14572_vm1, %v14571_v0 }
 0x69e   :  { %13805 = vmatprep.subr.mxu1 %v14571_v0  ;;  %13816 = vmatprep.mubr.f32.mxu0 %v7083_v5 }
 0x69f   :  { %13806 = vmatpush3.msra.mxu1 %v17173_v2 }
 0x6a0   :  { %13807 = vmatprep.subr.mxu1 %v14571_v0 }
 0x6a1   :  { %13808 = vmatpush3.msra.mxu1 %v17188_v60 }
 0x6a2   :  { %13809 = vmatprep.subr.mxu1 %v14571_v0 }
 0x6a3   :  { %13810 = vmatpush3.msra.mxu1 %v17199_v30  ;;  %v7011_v30 = vsel %vm1881_vm2, %v11154_v32, 0 }
 0x6a4   :  { %13812 = vmatmul.mubr.f32.vlgmr.msra.gmra.mxu1 %v15029_v58 }
 0x6a5   :  { %13821 = vmatprep.mubr.f32.mxu1 %v17417_v38 }
 0x6ef   :  { %v13578_v50 = vpop.f32.mrf.mxu0 }
 0x6f1   :  { %v5927_v1 = vpop.f32.mrf.mxu0 }
 0x6f3   :  { %v13588_v18 = vpop.f32.mrf.mxu0 }
 0x6f5   :  { %v6093_v26 = vpop.f32.mrf.mxu0 }
 0x6f7   :  { %v13583_v27 = vpop.f32.mrf.mxu1 }
 0x6f8   :  { %v6020_v62 = vadd.f32 %v13583_v27, %v13578_v50  ;;  %v13598_v48 = vpop.f32.mrf.mxu0  ;;  %v17459_v50 = vand.u32 4294901760, %v11168_v3 }
 0x6f9   :  { %v6013_v13 = vpop.f32.mrf.mxu1 }
 0x6fa   :  { %v6101_v43 = vadd.f32 %v13588_v18, %v6020_v62  ;;  %v6014_v15 = vadd.f32 %v6013_v13, %v5927_v1  ;;  %v6256_v9 = vpop.f32.mrf.mxu0  ;;  %v11167_v1 = vld [vmem:[%s18806_s8 + $0x360] sm:$0xff]  ;;  %v17466_v18 = vsub.f32 %v11170_v49, %v17452_v36  ;;  %v11166_v62 = vld [vmem:[%s18806_s8 + $0x358] sm:$0xff] }
 0x6fb   :  { %v13593_v41 = vpop.f32.mrf.mxu1  ;;  %v17474_v13 = vand.u32 4294901760, %v11167_v1 }
 0x6fc   :  { %v6094_v47 = vadd.f32 %v6093_v26, %v6014_v15  ;;  %v6183_v11 = vadd.f32 %v13593_v41, %v6101_v43  ;;  %v17469_v26 = vsub.f32 %v11169_v46, %v17457_v45  ;;  %v17478_v15 = vsub.f32 %v11168_v3, %v17459_v50  ;;  %v11165_v41 = vld [vmem:[%s18806_s8 + $0x350] sm:$0xff] }
 0x6fd   :  { %v6174_v52 = vpop.f32.mrf.mxu1 }
 0x6fe   :  { %v6263_v20 = vadd.f32 %v13598_v48, %v6183_v11  ;;  %v6175_v23 = vadd.f32 %v6174_v52, %v6094_v47  ;;  %v17484_v48 = vand.u32 4294901760, %v11166_v62  ;;  %v7615_v47 = vand.u32 4294901760, %v17466_v18  ;;  %v11164_v52 = vld [vmem:[%s18806_s8 + $0x348] sm:$0xff] }
 0x6ff   :  { %v13603_v63 = vpop.f32.mrf.mxu1  ;;  %v7622_v11 = vand.u32 4294901760, %v17469_v26 }
 0x700   :  { %v6257_v44 = vadd.f32 %v6256_v9, %v6175_v23  ;;  %v6341_v19 = vadd.f32 %v13603_v63, %v6263_v20  ;;  %v17493_v20 = vsub.f32 %v11167_v1, %v17474_v13  ;;  %v17495_v23 = vand.u32 4294901760, %v11165_v41  ;;  %v11163_v63 = vld [vmem:[%s18806_s8 + $0x340] sm:$0xff] }
 0x701   :  { %v6334_v10 = vpop.f32.mrf.mxu1  ;;  %v7629_v9 = vand.u32 4294901760, %v17478_v15 }
 0x702   :  { %v17428_v61 = vadd.f32 %v6341_v19, %v16982_v37  ;;  %v6335_v8 = vadd.f32 %v6334_v10, %v6257_v44  ;;  %v17437_v37 = vand.u32 4294901760, %v7011_v30  ;;  %v17504_v44 = vsub.f32 %v11166_v62, %v17484_v48 }
 0x703   :  { %v7616_v19 = vsub.f32 %v17466_v18, %v7615_v47  ;;  %v17509_v10 = vand.u32 4294901760, %v11164_v52 }
 0x704   :  { %v17431_v17 = vadd.f32 %v6335_v8, %v16985_v56  ;;  %v17440_v35 = vsub.f32 %v7011_v30, %v17437_v37  ;;  %v7623_v8 = vsub.f32 %v17469_v26, %v7622_v11  ;;  %v11160_v30 = vld [vmem:[%s18806_s8 + $0x328] sm:$0xff] }
 0x706   :  { %v7091_v21 = vand.u32 4294901760, %v17440_v35  ;;  %v7624_v32 = vand.u32 4294901760, %v7623_v8 }
 0x708   :  { %v7092_v53 = vsub.f32 %v17440_v35, %v7091_v21 }
 0x70a   :  { %v7093_v57 = vand.u32 4294901760, %v7092_v53  ;;  %v11159_v53 = vld [vmem:[%s18806_s8 + $0x320] sm:$0xff] }
 0x70b   :  { %v17589_v46 = vand.u32 4294901760, %v11159_v53 }
 0x718   :  { %v6450_v42 = vpop.f32.mrf.mxu0 }
 0x71a   :  { %v13638_v55 = vpop.f32.mrf.mxu0 }
 0x71b   :  { %v17522_v55 = vsub.f32 %v11165_v41, %v17495_v23  ;;  %v11156_v41 = vld [vmem:[%s18806_s8 + $0x308] sm:$0xff] }
 0x721   :  { %v6601_v31 = vpop.f32.mrf.mxu1 }
 0x722   :  { %v6602_v7 = vadd.f32 %v6601_v31, %v6450_v42  ;;  %v11162_v42 = vld [vmem:[%s18806_s8 + $0x338] sm:$0xff]  ;;  %v17524_v31 = vand.u32 4294901760, %v11163_v63 }
 0x723   :  { %v13673_v28 = vpop.f32.mrf.mxu1 }
 0x724   :  { %v7636_v28 = vand.u32 4294901760, %v17493_v20 }
 0x73a   :  { %v6705_v2 = vpop.f32.mrf.mxu0 }
 0x73b   :  { %v6706_v22 = vadd.f32 %v6705_v2, %v6602_v7  ;;  %v7630_v2 = vsub.f32 %v17478_v15, %v7629_v9 }
 0x73c   :  { %v13708_v54 = vpop.f32.mrf.mxu0 }
 0x73d   :  { %v17538_v54 = vsub.f32 %v11164_v52, %v17509_v10  ;;  %v17617_v52 = vsub.f32 %v11159_v53, %v17589_v46 }
 0x743   :  { %v6794_v40 = vpop.f32.mrf.mxu1 }
 0x744   :  { %v6795_v33 = vadd.f32 %v6794_v40, %v6706_v22  ;;  %v17540_v40 = vand.u32 4294901760, %v11162_v42 }
 0x745   :  { %v13743_v60 = vpop.f32.mrf.mxu1 }
 0x746   :  { %v7643_v60 = vand.u32 4294901760, %v17504_v44  ;;  %v17563_v22 = vsub.f32 %v11162_v42, %v17540_v40 }
 0x75c   :  { %v6913_v56 = vpop.f32.mrf.mxu0 }
 0x75d   :  { %v6914_v29 = vadd.f32 %v6913_v56, %v6795_v33  ;;  %v7637_v56 = vsub.f32 %v17493_v20, %v7636_v28  ;;  %v17568_v33 = vand.u32 4294901760, %v11160_v30 }
 0x75e   :  { %v13778_v59 = vpop.f32.mrf.mxu0 }
 0x75f   :  { %v7631_v59 = vand.u32 4294901760, %v7630_v2  ;;  %v11155_v2 = vld [vmem:[%s18806_s8 + $0x300] sm:$0xff] }
 0x764   :  { %v7000_v4 = vpop.f32.mrf.mxu1 }
 0x765   :  { %v7001_v16 = vadd.f32 %v7000_v4, %v6914_v29  ;;  %v7657_v29 = vand.u32 4294901760, %v17538_v54 }
 0x766   :  { %v13813_v39 = vpop.f32.mrf.mxu1 }
 0x767   :  { %v7044_v25 = vand.u32 4294901760, %v7001_v16  ;;  %v11158_v39 = vld [vmem:[%s18806_s8 + $0x318] sm:$0xff]  ;;  %v7658_v3 = vsub.f32 %v17538_v54, %v7657_v29 }
 0x768   :  { %v17604_v1 = vand.u32 4294901760, %v11158_v39 }
 0x769   :  { %v7131_v14 = vsub.f32 %v7001_v16, %v7044_v25  ;;  %13814 = vmatprep.subr.mxu0 %v7044_v25 }
 0x76a   :  { %13815 = vmatpush3.msra.mxu0 %v7044_v25 }
 0x76b   :  { %13817 = vmatmul.mubr.f32.vlgmr.msra.gmra.mxu0 %v7093_v57  ;;  %13824 = vmatprep.subr.mxu0 %v7131_v14  ;;  %v7132_v5 = vand.u32 4294901760, %v7131_v14  ;;  %v17593_v57 = vsub.f32 %v11160_v30, %v17568_v33 }
 0x76c   :  { %13825 = vmatpush3.msra.mxu0 %v7131_v14  ;;  %13826 = vmatprep.mubr.f32.mxu0 %v17420_v34  ;;  %v11161_v34 = vld [vmem:[%s18806_s8 + $0x330] sm:$0xff] }
 0x76d   :  { %13834 = vmatprep.subr.mxu0 %v7132_v5  ;;  %v7133_v27 = vsub.f32 %v7131_v14, %v7132_v5  ;;  %v17556_v7 = vand.u32 4294901760, %v11161_v34  ;;  %v7671_v14 = vand.u32 4294901760, %v17563_v22  ;;  %v7685_v42 = vand.u32 4294901760, %v17593_v57 }
 0x76f   :  { %13827 = vmatmul.mubr.f32.vlgmr.msra.gmra.mxu0 %v17440_v35  ;;  %v7134_v43 = vand.u32 4294901760, %v7133_v27  ;;  %v17551_v35 = vsub.f32 %v11163_v63, %v17524_v31  ;;  %v17578_v4 = vsub.f32 %v11161_v34, %v17556_v7  ;;  %v7672_v8 = vsub.f32 %v17563_v22, %v7671_v14 }
 0x770   :  { %13835 = vmatpush3.msra.mxu0 %v7132_v5  ;;  %13836 = vmatprep.mubr.f32.mxu0 %v17417_v38  ;;  %v11157_v5 = vld [vmem:[%s18806_s8 + $0x310] sm:$0xff]  ;;  %v17632_v34 = vsub.f32 %v11158_v39, %v17604_v1 }
 0x771   :  { %13819 = vmatprep.subr.mxu1 %v7134_v43  ;;  %13844 = vmatprep.subr.mxu0 %v14571_v0  ;;  %v7664_v49 = vand.u32 4294901760, %v17551_v35  ;;  %v17619_v63 = vand.u32 4294901760, %v11157_v5  ;;  %v7673_v53 = vand.u32 4294901760, %v7672_v8 }
 0x772   :  { %13820 = vmatpush3.msra.mxu1 %v7134_v43  ;;  %v7678_v43 = vand.u32 4294901760, %v17578_v4  ;;  %v7699_v39 = vand.u32 4294901760, %v17632_v34 }
 0x773   :  { %13822 = vmatmul.mubr.f32.vlgmr.msra.gmra.mxu1 %v17437_v37  ;;  %13829 = vmatprep.subr.mxu1 %v7044_v25  ;;  %v7665_v62 = vsub.f32 %v17551_v35, %v7664_v49 }
 0x774   :  { %13837 = vmatmul.mubr.f32.vlgmr.msra.gmra.mxu0 %v17437_v37  ;;  %13830 = vmatpush3.msra.mxu1 %v7044_v25  ;;  %v7679_v30 = vsub.f32 %v17578_v4, %v7678_v43 }
 0x775   :  { %13845 = vmatpush3.msra.mxu0 %v17452_v36  ;;  %13839 = vmatprep.subr.mxu1 %v7044_v25 }
 0x776   :  { %13846 = vmatprep.subr.mxu0 %v14571_v0  ;;  %13831 = vmatprep.mubr.f32.mxu1 %v7081_v51  ;;  %v7617_v51 = vand.u32 4294901760, %v7616_v19  ;;  %v7659_v19 = vand.u32 4294901760, %v7658_v3 }
 0x777   :  { %13847 = vmatpush3.msra.mxu0 %v17457_v45  ;;  %13832 = vmatmul.mubr.f32.vlgmr.msra.gmra.mxu1 %v7091_v21  ;;  %v7644_v21 = vsub.f32 %v17504_v44, %v7643_v60 }
 0x778   :  { %13848 = vmatprep.subr.mxu0 %v14571_v0  ;;  %13840 = vmatpush3.msra.mxu1 %v7044_v25 }
 0x779   :  { %13849 = vmatpush3.msra.mxu0 %v17459_v50  ;;  %13841 = vmatprep.mubr.f32.mxu1 %v17417_v38  ;;  %v7650_v38 = vand.u32 4294901760, %v17522_v55  ;;  %v7645_v25 = vand.u32 4294901760, %v7644_v21  ;;  %v7692_v21 = vand.u32 4294901760, %v17617_v52 }
 0x77a   :  { %13850 = vmatprep.subr.mxu0 %v14571_v0  ;;  %13879 = vmatprep.subr.mxu1 %v14571_v0 }
 0x77b   :  { %13851 = vmatpush3.msra.mxu0 %v17474_v13  ;;  %13842 = vmatmul.mubr.f32.vlgmr.msra.gmra.mxu1 %v17437_v37  ;;  %v7638_v37 = vand.u32 4294901760, %v7637_v56  ;;  %v7651_v16 = vsub.f32 %v17522_v55, %v7650_v38  ;;  %v17643_v56 = vsub.f32 %v11157_v5, %v17619_v63  ;;  %v7693_v5 = vsub.f32 %v17617_v52, %v7692_v21 }
 0x77c   :  { %13852 = vmatprep.subr.mxu0 %v14571_v0  ;;  %13880 = vmatpush3.msra.mxu1 %v7617_v51  ;;  %v17634_v51 = vand.u32 4294901760, %v11156_v41 }
 0x77d   :  { %13853 = vmatpush3.msra.mxu0 %v17484_v48  ;;  %13881 = vmatprep.subr.mxu1 %v14571_v0  ;;  %v7652_v27 = vand.u32 4294901760, %v7651_v16  ;;  %v7694_v8 = vand.u32 4294901760, %v7693_v5 }
 0x77e   :  { %13854 = vmatprep.subr.mxu0 %v14571_v0  ;;  %13882 = vmatpush3.msra.mxu1 %v7624_v32  ;;  %v7666_v32 = vand.u32 4294901760, %v7665_v62  ;;  %v17655_v16 = vsub.f32 %v11156_v41, %v17634_v51  ;;  %v7700_v41 = vsub.f32 %v17632_v34, %v7699_v39 }
 0x77f   :  { %13855 = vmatpush3.msra.mxu0 %v17495_v23  ;;  %13883 = vmatprep.subr.mxu1 %v14571_v0 }
 0x780   :  { %13856 = vmatprep.subr.mxu0 %v14571_v0  ;;  %13884 = vmatpush3.msra.mxu1 %v7631_v59  ;;  %v17645_v59 = vand.u32 4294901760, %v11155_v2 }
 0x781   :  { %13857 = vmatpush3.msra.mxu0 %v17509_v10  ;;  %13885 = vmatprep.subr.mxu1 %v14571_v0 }
 0x782   :  { %13858 = vmatprep.subr.mxu0 %v14571_v0  ;;  %13886 = vmatpush3.msra.mxu1 %v7638_v37  ;;  %v7686_v37 = vsub.f32 %v17593_v57, %v7685_v42  ;;  %v17662_v3 = vsub.f32 %v11155_v2, %v17645_v59 }
 0x783   :  { %13859 = vmatpush3.msra.mxu0 %v17524_v31  ;;  %13887 = vmatprep.subr.mxu1 %v14571_v0 }
 0x784   :  { %13860 = vmatprep.subr.mxu0 %v14571_v0  ;;  %13888 = vmatpush3.msra.mxu1 %v7645_v25  ;;  %v7680_v25 = vand.u32 4294901760, %v7679_v30  ;;  %v7687_v62 = vand.u32 4294901760, %v7686_v37  ;;  %v7701_v30 = vand.u32 4294901760, %v7700_v41 }
 0x785   :  { %13861 = vmatpush3.msra.mxu0 %v17540_v40  ;;  %13889 = vmatprep.subr.mxu1 %v14571_v0 }
 0x786   :  { %13862 = vmatprep.subr.mxu0 %v14571_v0  ;;  %13890 = vmatpush3.msra.mxu1 %v7652_v27  ;;  %v7706_v27 = vand.u32 4294901760, %v17643_v56 }
 0x787   :  { %13863 = vmatpush3.msra.mxu0 %v17556_v7  ;;  %13891 = vmatprep.subr.mxu1 %v14571_v0 }
 0x788   :  { %13864 = vmatprep.subr.mxu0 %v14571_v0  ;;  %13892 = vmatpush3.msra.mxu1 %v7659_v19  ;;  %v7713_v19 = vand.u32 4294901760, %v17655_v16  ;;  %v7707_v2 = vsub.f32 %v17643_v56, %v7706_v27 }
 0x789   :  { %13865 = vmatpush3.msra.mxu0 %v17568_v33  ;;  %13893 = vmatprep.subr.mxu1 %v14571_v0 }
 0x78a   :  { %13866 = vmatprep.subr.mxu0 %v14571_v0  ;;  %13894 = vmatpush3.msra.mxu1 %v7666_v32  ;;  %v7720_v32 = vand.u32 4294901760, %v17662_v3  ;;  %v7708_v37 = vand.u32 4294901760, %v7707_v2 }
 0x78b   :  { %13867 = vmatpush3.msra.mxu0 %v17589_v46  ;;  %13895 = vmatprep.subr.mxu1 %v14571_v0 }
 0x78c   :  { %13868 = vmatprep.subr.mxu0 %v14571_v0  ;;  %13896 = vmatpush3.msra.mxu1 %v7673_v53  ;;  %v7714_v53 = vsub.f32 %v17655_v16, %v7713_v19 }
 0x78d   :  { %13869 = vmatpush3.msra.mxu0 %v17604_v1  ;;  %13897 = vmatprep.subr.mxu1 %v14571_v0 }
 0x78e   :  { %13870 = vmatprep.subr.mxu0 %v14571_v0  ;;  %13898 = vmatpush3.msra.mxu1 %v7680_v25  ;;  %v7721_v25 = vsub.f32 %v17662_v3, %v7720_v32  ;;  %v7715_v5 = vand.u32 4294901760, %v7714_v53 }
 0x78f   :  { %13871 = vmatpush3.msra.mxu0 %v17619_v63  ;;  %13899 = vmatprep.subr.mxu1 %v14571_v0 }
 0x790   :  { %13872 = vmatprep.subr.mxu0 %v14571_v0  ;;  %13900 = vmatpush3.msra.mxu1 %v7687_v62  ;;  %v7722_v62 = vand.u32 4294901760, %v7721_v25 }
 0x791   :  { %13873 = vmatpush3.msra.mxu0 %v17634_v51  ;;  %13901 = vmatprep.subr.mxu1 %v14571_v0 }
 0x792   :  { %13874 = vmatprep.subr.mxu0 %v14571_v0  ;;  %13876 = vmatprep.mubr.msk.f32.mxu0 %vm14572_vm1, %v14571_v0 }
 0x793   :  { %13875 = vmatpush3.msra.mxu0 %v17645_v59  ;;  %13902 = vmatpush3.msra.mxu1 %v7694_v8 }
 0x794   :  { %13877 = vmatmul.mubr.f32.vlgmr.msra.gmra.mxu0 %v15048_v24  ;;  %13903 = vmatprep.subr.mxu1 %v14571_v0 }
 0x795   :  { %13914 = vmatprep.subr.mxu0 %v14571_v0  ;;  %13904 = vmatpush3.msra.mxu1 %v7701_v30  ;;  %v11188_v30 = vld [vmem:[%s18806_s8 + $0x3f8] sm:$0xff] }
 0x796   :  { %13915 = vmatpush3.msra.mxu0 %v17466_v18  ;;  %13905 = vmatprep.subr.mxu1 %v14571_v0 }
 0x797   :  { %13916 = vmatprep.subr.mxu0 %v14571_v0  ;;  %13906 = vmatpush3.msra.mxu1 %v7708_v37  ;;  %v11187_v37 = vld [vmem:[%s18806_s8 + $0x3f0] sm:$0xff] }
 0x798   :  { %13917 = vmatpush3.msra.mxu0 %v17469_v26  ;;  %13907 = vmatprep.subr.mxu1 %v14571_v0 }
 0x799   :  { %13918 = vmatprep.subr.mxu0 %v14571_v0  ;;  %13908 = vmatpush3.msra.mxu1 %v7715_v5 }
 0x79a   :  { %13919 = vmatpush3.msra.mxu0 %v17478_v15  ;;  %13909 = vmatprep.subr.mxu1 %v14571_v0 }
 0x79b   :  { %13920 = vmatprep.subr.mxu0 %v14571_v0  ;;  %13910 = vmatpush3.msra.mxu1 %v7722_v62  ;;  %v17898_v62 = vand.u32 4294901760, %v11188_v30 }
 0x79c   :  { %13911 = vmatprep.mubr.msk.f32.mxu1 %vm14572_vm1, %v14571_v0  ;;  %13921 = vmatpush3.msra.mxu0 %v17493_v20 }
 0x79d   :  { %13912 = vmatmul.mubr.f32.vlgmr.msra.gmra.mxu1 %v15029_v58  ;;  %13922 = vmatprep.subr.mxu0 %v14571_v0 }
 0x79e   :  { %13949 = vmatprep.subr.mxu1 %v14571_v0  ;;  %13923 = vmatpush3.msra.mxu0 %v17504_v44 }
 0x79f   :  { %13950 = vmatpush3.msra.mxu1 %v17452_v36  ;;  %13924 = vmatprep.subr.mxu0 %v14571_v0 }
 0x7a0   :  { %13951 = vmatprep.subr.mxu1 %v14571_v0  ;;  %13925 = vmatpush3.msra.mxu0 %v17522_v55 }
 0x7a1   :  { %13952 = vmatpush3.msra.mxu1 %v17457_v45  ;;  %13926 = vmatprep.subr.mxu0 %v14571_v0 }
 0x7a2   :  { %13953 = vmatprep.subr.mxu1 %v14571_v0  ;;  %13927 = vmatpush3.msra.mxu0 %v17538_v54 }
 0x7a3   :  { %13954 = vmatpush3.msra.mxu1 %v17459_v50  ;;  %13928 = vmatprep.subr.mxu0 %v14571_v0 }
 0x7a4   :  { %13955 = vmatprep.subr.mxu1 %v14571_v0  ;;  %13929 = vmatpush3.msra.mxu0 %v17551_v35 }
 0x7a5   :  { %13956 = vmatpush3.msra.mxu1 %v17474_v13  ;;  %13930 = vmatprep.subr.mxu0 %v14571_v0 }
 0x7a6   :  { %13957 = vmatprep.subr.mxu1 %v14571_v0  ;;  %13931 = vmatpush3.msra.mxu0 %v17563_v22 }
 0x7a7   :  { %13958 = vmatpush3.msra.mxu1 %v17484_v48  ;;  %13932 = vmatprep.subr.mxu0 %v14571_v0 }
 0x7a8   :  { %13959 = vmatprep.subr.mxu1 %v14571_v0  ;;  %13933 = vmatpush3.msra.mxu0 %v17578_v4 }
 0x7a9   :  { %13960 = vmatpush3.msra.mxu1 %v17495_v23  ;;  %13934 = vmatprep.subr.mxu0 %v14571_v0 }
 0x7aa   :  { %13961 = vmatprep.subr.mxu1 %v14571_v0  ;;  %13935 = vmatpush3.msra.mxu0 %v17593_v57 }
 0x7ab   :  { %13962 = vmatpush3.msra.mxu1 %v17509_v10  ;;  %13936 = vmatprep.subr.mxu0 %v14571_v0 }
 0x7ac   :  { %13963 = vmatprep.subr.mxu1 %v14571_v0  ;;  %13937 = vmatpush3.msra.mxu0 %v17617_v52 }
 0x7ad   :  { %13964 = vmatpush3.msra.mxu1 %v17524_v31  ;;  %13938 = vmatprep.subr.mxu0 %v14571_v0 }
 0x7ae   :  { %13965 = vmatprep.subr.mxu1 %v14571_v0  ;;  %13939 = vmatpush3.msra.mxu0 %v17632_v34 }
 0x7af   :  { %13966 = vmatpush3.msra.mxu1 %v17540_v40  ;;  %13940 = vmatprep.subr.mxu0 %v14571_v0 }
 0x7b0   :  { %13967 = vmatprep.subr.mxu1 %v14571_v0  ;;  %13941 = vmatpush3.msra.mxu0 %v17643_v56  ;;  %v11172_v56 = vld [vmem:[%s18809_s4 + $0x68] sm:$0xff] }
 0x7b1   :  { %13968 = vmatpush3.msra.mxu1 %v17556_v7  ;;  %13942 = vmatprep.subr.mxu0 %v14571_v0 }
 0x7b2   :  { %13969 = vmatprep.subr.mxu1 %v14571_v0  ;;  %13943 = vmatpush3.msra.mxu0 %v17655_v16 }
 0x7b3   :  { %13970 = vmatpush3.msra.mxu1 %v17568_v33  ;;  %13944 = vmatprep.subr.mxu0 %v14571_v0 }
 0x7b4   :  { %13971 = vmatprep.subr.mxu1 %v14571_v0  ;;  %13945 = vmatpush3.msra.mxu0 %v17662_v3 }
 0x7b5   :  { %13946 = vmatprep.mubr.msk.f32.mxu0 %vm14572_vm1, %v14571_v0  ;;  %13972 = vmatpush3.msra.mxu1 %v17589_v46 }
 0x7b6   :  { %13947 = vmatmul.mubr.f32.vlgmr.msra.gmra.mxu0 %v15032_v6  ;;  %13973 = vmatprep.subr.mxu1 %v14571_v0 }
 0x7b7   :  { %13984 = vmatprep.subr.mxu0 %v14571_v0  ;;  %13974 = vmatpush3.msra.mxu1 %v17604_v1 }
 0x7b8   :  { %13985 = vmatpush3.msra.mxu0 %v7615_v47  ;;  %13975 = vmatprep.subr.mxu1 %v14571_v0 }
 0x7b9   :  { %13986 = vmatprep.subr.mxu0 %v14571_v0  ;;  %13976 = vmatpush3.msra.mxu1 %v17619_v63 }
 0x7ba   :  { %13987 = vmatpush3.msra.mxu0 %v7622_v11  ;;  %13977 = vmatprep.subr.mxu1 %v14571_v0 }
 0x7bb   :  { %13988 = vmatprep.subr.mxu0 %v14571_v0  ;;  %13978 = vmatpush3.msra.mxu1 %v17634_v51 }
 0x7bc   :  { %13989 = vmatpush3.msra.mxu0 %v7629_v9  ;;  %13979 = vmatprep.subr.mxu1 %v14571_v0 }
 0x7bd   :  { %13990 = vmatprep.subr.mxu0 %v14571_v0  ;;  %13980 = vmatpush3.msra.mxu1 %v17645_v59 }
 0x7be   :  { %13981 = vmatprep.mubr.msk.f32.mxu1 %vm14572_vm1, %v14571_v0  ;;  %13991 = vmatpush3.msra.mxu0 %v7636_v28 }
 0x7bf   :  { %13982 = vmatmul.mubr.f32.vlgmr.msra.gmra.mxu1 %v15039_v12  ;;  %13992 = vmatprep.subr.mxu0 %v14571_v0 }
 0x7c0   :  { %14019 = vmatprep.subr.mxu1 %v14571_v0  ;;  %13993 = vmatpush3.msra.mxu0 %v7643_v60 }
 0x7c1   :  { %14020 = vmatpush3.msra.mxu1 %v17452_v36  ;;  %13994 = vmatprep.subr.mxu0 %v14571_v0  ;;  %v11171_v36 = vld [vmem:[%s18809_s4 + $0x60] sm:$0xff] }
 0x7c2   :  { %14021 = vmatprep.subr.mxu1 %v14571_v0  ;;  %13995 = vmatpush3.msra.mxu0 %v7650_v38 }
 0x7c3   :  { %14022 = vmatpush3.msra.mxu1 %v17457_v45  ;;  %13996 = vmatprep.subr.mxu0 %v14571_v0  ;;  %v8166_v45 = vsel %vm1881_vm2, %v11171_v36, 0  ;;  %v11186_v36 = vld [vmem:[%s18806_s8 + $0x3e8] sm:$0xff] }
 0x7c4   :  { %14023 = vmatprep.subr.mxu1 %v14571_v0  ;;  %13997 = vmatpush3.msra.mxu0 %v7657_v29 }
 0x7c5   :  { %14024 = vmatpush3.msra.mxu1 %v17459_v50  ;;  %13998 = vmatprep.subr.mxu0 %v14571_v0  ;;  %v17863_v50 = vand.u32 4294901760, %v8166_v45 }
 0x7c6   :  { %14025 = vmatprep.subr.mxu1 %v14571_v0  ;;  %13999 = vmatpush3.msra.mxu0 %v7664_v49 }
 0x7c7   :  { %14026 = vmatpush3.msra.mxu1 %v17474_v13  ;;  %14000 = vmatprep.subr.mxu0 %v14571_v0  ;;  %v17866_v18 = vsub.f32 %v8166_v45, %v17863_v50 }
 0x7c8   :  { %14027 = vmatprep.subr.mxu1 %v14571_v0  ;;  %14001 = vmatpush3.msra.mxu0 %v7671_v14 }
 0x7c9   :  { %14028 = vmatpush3.msra.mxu1 %v17484_v48  ;;  %14002 = vmatprep.subr.mxu0 %v14571_v0  ;;  %v8239_v26 = vand.u32 4294901760, %v17866_v18 }
 0x7ca   :  { %14029 = vmatprep.subr.mxu1 %v14571_v0  ;;  %14003 = vmatpush3.msra.mxu0 %v7678_v43 }
 0x7cb   :  { %14030 = vmatpush3.msra.mxu1 %v17495_v23  ;;  %14004 = vmatprep.subr.mxu0 %v14571_v0  ;;  %v8240_v13 = vsub.f32 %v17866_v18, %v8239_v26 }
 0x7cc   :  { %14031 = vmatprep.subr.mxu1 %v14571_v0  ;;  %14005 = vmatpush3.msra.mxu0 %v7685_v42 }
 0x7cd   :  { %14032 = vmatpush3.msra.mxu1 %v17509_v10  ;;  %14006 = vmatprep.subr.mxu0 %v14571_v0  ;;  %v8241_v15 = vand.u32 4294901760, %v8240_v13  ;;  %v17903_v13 = vand.u32 4294901760, %v11187_v37 }
 0x7ce   :  { %14033 = vmatprep.subr.mxu1 %v14571_v0  ;;  %14007 = vmatpush3.msra.mxu0 %v7692_v21 }
 0x7cf   :  { %14034 = vmatpush3.msra.mxu1 %v17524_v31  ;;  %14008 = vmatprep.subr.mxu0 %v14571_v0 }
 0x7d0   :  { %14035 = vmatprep.subr.mxu1 %v14571_v0  ;;  %14009 = vmatpush3.msra.mxu0 %v7699_v39 }
 0x7d1   :  { %14036 = vmatpush3.msra.mxu1 %v17540_v40  ;;  %14010 = vmatprep.subr.mxu0 %v14571_v0 }
 0x7d2   :  { %14037 = vmatprep.subr.mxu1 %v14571_v0  ;;  %14011 = vmatpush3.msra.mxu0 %v7706_v27 }
 0x7d3   :  { %14038 = vmatpush3.msra.mxu1 %v17556_v7  ;;  %14012 = vmatprep.subr.mxu0 %v14571_v0 }
 0x7d4   :  { %14039 = vmatprep.subr.mxu1 %v14571_v0  ;;  %14013 = vmatpush3.msra.mxu0 %v7713_v19 }
 0x7d5   :  { %14040 = vmatpush3.msra.mxu1 %v17568_v33  ;;  %14014 = vmatprep.subr.mxu0 %v14571_v0 }
 0x7d6   :  { %14041 = vmatprep.subr.mxu1 %v14571_v0  ;;  %14015 = vmatpush3.msra.mxu0 %v7720_v32 }
 0x7d7   :  { %14016 = vmatprep.mubr.msk.f32.mxu0 %vm14572_vm1, %v14571_v0  ;;  %14042 = vmatpush3.msra.mxu1 %v17589_v46 }
 0x7d8   :  { %14017 = vmatmul.mubr.f32.vlgmr.msra.gmra.mxu0 %v15029_v58  ;;  %14043 = vmatprep.subr.mxu1 %v14571_v0 }
 0x7d9   :  { %14044 = vmatpush3.msra.mxu1 %v17604_v1  ;;  %14051 = vmatprep.mubr.msk.f32.mxu1 %vm14572_vm1, %v14571_v0 }
 0x7da   :  { %14045 = vmatprep.subr.mxu1 %v14571_v0  ;;  %14056 = vmatprep.mubr.f32.mxu0 %v8241_v15 }
 0x7db   :  { %14046 = vmatpush3.msra.mxu1 %v17619_v63 }
 0x7dc   :  { %14047 = vmatprep.subr.mxu1 %v14571_v0 }
 0x7dd   :  { %14048 = vmatpush3.msra.mxu1 %v17634_v51 }
 0x7de   :  { %14049 = vmatprep.subr.mxu1 %v14571_v0 }
 0x7df   :  { %14050 = vmatpush3.msra.mxu1 %v17645_v59  ;;  %v8169_v59 = vsel %vm1881_vm2, %v11172_v56, 0 }
 0x7e0   :  { %14052 = vmatmul.mubr.f32.vlgmr.msra.gmra.mxu1 %v15029_v58 }
 0x7e1   :  { %14061 = vmatprep.mubr.f32.mxu1 %v17863_v50 }
 0x82b   :  { %v13818_v48 = vpop.f32.mrf.mxu0 }
 0x82d   :  { %v7085_v47 = vpop.f32.mrf.mxu0 }
 0x82f   :  { %v13828_v11 = vpop.f32.mrf.mxu0 }
 0x831   :  { %v7251_v23 = vpop.f32.mrf.mxu0 }
 0x833   :  { %v13823_v20 = vpop.f32.mrf.mxu1 }
 0x834   :  { %v7178_v9 = vadd.f32 %v13823_v20, %v13818_v48  ;;  %v13838_v28 = vpop.f32.mrf.mxu0  ;;  %v17905_v48 = vand.u32 4294901760, %v11186_v36 }
 0x835   :  { %v7171_v44 = vpop.f32.mrf.mxu1 }
 0x836   :  { %v7259_v10 = vadd.f32 %v13828_v11, %v7178_v9  ;;  %v7172_v55 = vadd.f32 %v7171_v44, %v7085_v47  ;;  %v7414_v38 = vpop.f32.mrf.mxu0  ;;  %v11185_v47 = vld [vmem:[%s18806_s8 + $0x3e0] sm:$0xff]  ;;  %v17912_v11 = vsub.f32 %v11188_v30, %v17898_v62  ;;  %v11184_v9 = vld [vmem:[%s18806_s8 + $0x3d8] sm:$0xff] }
 0x837   :  { %v13833_v31 = vpop.f32.mrf.mxu1  ;;  %v17920_v44 = vand.u32 4294901760, %v11185_v47 }
 0x838   :  { %v7252_v54 = vadd.f32 %v7251_v23, %v7172_v55  ;;  %v7341_v40 = vadd.f32 %v13833_v31, %v7259_v10  ;;  %v17915_v23 = vsub.f32 %v11187_v37, %v17903_v13  ;;  %v17924_v55 = vsub.f32 %v11186_v36, %v17905_v48  ;;  %v11183_v31 = vld [vmem:[%s18806_s8 + $0x3d0] sm:$0xff] }
 0x839   :  { %v7332_v60 = vpop.f32.mrf.mxu1 }
 0x83a   :  { %v7421_v35 = vadd.f32 %v13838_v28, %v7341_v40  ;;  %v7333_v7 = vadd.f32 %v7332_v60, %v7252_v54  ;;  %v17930_v28 = vand.u32 4294901760, %v11184_v9  ;;  %v8773_v54 = vand.u32 4294901760, %v17912_v11  ;;  %v11182_v60 = vld [vmem:[%s18806_s8 + $0x3c8] sm:$0xff] }
 0x83b   :  { %v13843_v22 = vpop.f32.mrf.mxu1  ;;  %v8780_v40 = vand.u32 4294901760, %v17915_v23 }
 0x83c   :  { %v7415_v33 = vadd.f32 %v7414_v38, %v7333_v7  ;;  %v7499_v29 = vadd.f32 %v13843_v22, %v7421_v35  ;;  %v17939_v35 = vsub.f32 %v11185_v47, %v17920_v44  ;;  %v17941_v7 = vand.u32 4294901760, %v11183_v31  ;;  %v11181_v22 = vld [vmem:[%s18806_s8 + $0x3c0] sm:$0xff] }
 0x83d   :  { %v7492_v4 = vpop.f32.mrf.mxu1  ;;  %v8787_v38 = vand.u32 4294901760, %v17924_v55 }
 0x83e   :  { %v17874_v49 = vadd.f32 %v7499_v29, %v17428_v61  ;;  %v7493_v46 = vadd.f32 %v7492_v4, %v7415_v33  ;;  %v17883_v61 = vand.u32 4294901760, %v8169_v59  ;;  %v17950_v33 = vsub.f32 %v11184_v9, %v17930_v28 }
 0x83f   :  { %v8774_v29 = vsub.f32 %v17912_v11, %v8773_v54  ;;  %v17955_v4 = vand.u32 4294901760, %v11182_v60 }
 0x840   :  { %v17877_v57 = vadd.f32 %v7493_v46, %v17431_v17  ;;  %v17886_v21 = vsub.f32 %v8169_v59, %v17883_v61  ;;  %v8781_v46 = vsub.f32 %v17915_v23, %v8780_v40  ;;  %v11178_v59 = vld [vmem:[%s18806_s8 + $0x3a8] sm:$0xff] }
 0x842   :  { %v8249_v27 = vand.u32 4294901760, %v17886_v21  ;;  %v8782_v56 = vand.u32 4294901760, %v8781_v46 }
 0x844   :  { %v8250_v8 = vsub.f32 %v17886_v21, %v8249_v27 }
 0x846   :  { %v8251_v5 = vand.u32 4294901760, %v8250_v8  ;;  %v11177_v8 = vld [vmem:[%s18806_s8 + $0x3a0] sm:$0xff] }
 0x847   :  { %v18035_v37 = vand.u32 4294901760, %v11177_v8 }
 0x854   :  { %v7608_v14 = vpop.f32.mrf.mxu0 }
 0x856   :  { %v13878_v1 = vpop.f32.mrf.mxu0 }
 0x857   :  { %v17968_v1 = vsub.f32 %v11183_v31, %v17941_v7  ;;  %v11174_v31 = vld [vmem:[%s18806_s8 + $0x388] sm:$0xff] }
 0x85d   :  { %v7759_v43 = vpop.f32.mrf.mxu1 }
 0x85e   :  { %v7760_v16 = vadd.f32 %v7759_v43, %v7608_v14  ;;  %v11180_v14 = vld [vmem:[%s18806_s8 + $0x3b8] sm:$0xff]  ;;  %v17970_v43 = vand.u32 4294901760, %v11181_v22 }
 0x85f   :  { %v13913_v52 = vpop.f32.mrf.mxu1 }
 0x860   :  { %v8794_v52 = vand.u32 4294901760, %v17939_v35 }
 0x876   :  { %v7863_v63 = vpop.f32.mrf.mxu0 }
 0x877   :  { %v7864_v3 = vadd.f32 %v7863_v63, %v7760_v16  ;;  %v8788_v63 = vsub.f32 %v17924_v55, %v8787_v38 }
 0x878   :  { %v13948_v42 = vpop.f32.mrf.mxu0 }
 0x879   :  { %v17984_v42 = vsub.f32 %v11182_v60, %v17955_v4  ;;  %v18063_v60 = vsub.f32 %v11177_v8, %v18035_v37 }
 0x87f   :  { %v7952_v34 = vpop.f32.mrf.mxu1 }
 0x880   :  { %v7953_v41 = vadd.f32 %v7952_v34, %v7864_v3  ;;  %v17986_v34 = vand.u32 4294901760, %v11180_v14 }
 0x881   :  { %v13983_v51 = vpop.f32.mrf.mxu1 }
 0x882   :  { %v8801_v51 = vand.u32 4294901760, %v17950_v33  ;;  %v18009_v3 = vsub.f32 %v11180_v14, %v17986_v34 }
 0x898   :  { %v8071_v17 = vpop.f32.mrf.mxu0 }
 0x899   :  { %v8072_v19 = vadd.f32 %v8071_v17, %v7953_v41  ;;  %v8795_v17 = vsub.f32 %v17939_v35, %v8794_v52  ;;  %v18014_v41 = vand.u32 4294901760, %v11178_v59 }
 0x89a   :  { %v14018_v39 = vpop.f32.mrf.mxu0 }
 0x89b   :  { %v8789_v39 = vand.u32 4294901760, %v8788_v63  ;;  %v11173_v63 = vld [vmem:[%s18806_s8 + $0x380] sm:$0xff] }
 0x8a0   :  { %v8158_v2 = vpop.f32.mrf.mxu1 }
 0x8a1   :  { %v8159_v32 = vadd.f32 %v8158_v2, %v8072_v19  ;;  %v8815_v19 = vand.u32 4294901760, %v17984_v42 }
 0x8a2   :  { %v14053_v53 = vpop.f32.mrf.mxu1 }
 0x8a3   :  { %v8202_v25 = vand.u32 4294901760, %v8159_v32  ;;  %v11176_v53 = vld [vmem:[%s18806_s8 + $0x398] sm:$0xff]  ;;  %v8816_v36 = vsub.f32 %v17984_v42, %v8815_v19 }
 0x8a4   :  { %v18050_v47 = vand.u32 4294901760, %v11176_v53 }
 0x8a5   :  { %v8289_v45 = vsub.f32 %v8159_v32, %v8202_v25  ;;  %14054 = vmatprep.subr.mxu0 %v8202_v25 }
 0x8a6   :  { %14055 = vmatpush3.msra.mxu0 %v8202_v25 }
 0x8a7   :  { %14057 = vmatmul.mubr.f32.vlgmr.msra.gmra.mxu0 %v8251_v5  ;;  %14064 = vmatprep.subr.mxu0 %v8289_v45  ;;  %v8290_v15 = vand.u32 4294901760, %v8289_v45  ;;  %v18039_v5 = vsub.f32 %v11178_v59, %v18014_v41 }
 0x8a8   :  { %14065 = vmatpush3.msra.mxu0 %v8289_v45  ;;  %14066 = vmatprep.mubr.f32.mxu0 %v17866_v18  ;;  %v11179_v18 = vld [vmem:[%s18806_s8 + $0x3b0] sm:$0xff] }
 0x8a9   :  { %14074 = vmatprep.subr.mxu0 %v8290_v15  ;;  %v8291_v20 = vsub.f32 %v8289_v45, %v8290_v15  ;;  %v18002_v16 = vand.u32 4294901760, %v11179_v18  ;;  %v8829_v45 = vand.u32 4294901760, %v18009_v3  ;;  %v8843_v14 = vand.u32 4294901760, %v18039_v5 }
 0x8ab   :  { %14067 = vmatmul.mubr.f32.vlgmr.msra.gmra.mxu0 %v17886_v21  ;;  %v8292_v10 = vand.u32 4294901760, %v8291_v20  ;;  %v17997_v21 = vsub.f32 %v11181_v22, %v17970_v43  ;;  %v18024_v2 = vsub.f32 %v11179_v18, %v18002_v16  ;;  %v8830_v46 = vsub.f32 %v18009_v3, %v8829_v45 }
 0x8ac   :  { %14075 = vmatpush3.msra.mxu0 %v8290_v15  ;;  %14076 = vmatprep.mubr.f32.mxu0 %v17863_v50  ;;  %v11175_v15 = vld [vmem:[%s18806_s8 + $0x390] sm:$0xff]  ;;  %v18078_v18 = vsub.f32 %v11176_v53, %v18050_v47 }
 0x8ad   :  { %14059 = vmatprep.subr.mxu1 %v8292_v10  ;;  %14084 = vmatprep.subr.mxu0 %v14571_v0  ;;  %v8822_v30 = vand.u32 4294901760, %v17997_v21  ;;  %v18065_v22 = vand.u32 4294901760, %v11175_v15  ;;  %v8831_v8 = vand.u32 4294901760, %v8830_v46 }
 0x8ae   :  { %14060 = vmatpush3.msra.mxu1 %v8292_v10  ;;  %v8836_v10 = vand.u32 4294901760, %v18024_v2  ;;  %v8857_v53 = vand.u32 4294901760, %v18078_v18 }
 0x8af   :  { %14062 = vmatmul.mubr.f32.vlgmr.msra.gmra.mxu1 %v17883_v61  ;;  %14069 = vmatprep.subr.mxu1 %v8202_v25  ;;  %v8823_v9 = vsub.f32 %v17997_v21, %v8822_v30 }
 0x8b0   :  { %14077 = vmatmul.mubr.f32.vlgmr.msra.gmra.mxu0 %v17883_v61  ;;  %14070 = vmatpush3.msra.mxu1 %v8202_v25  ;;  %v8837_v59 = vsub.f32 %v18024_v2, %v8836_v10 }
 0x8b1   :  { %14085 = vmatpush3.msra.mxu0 %v17898_v62  ;;  %14079 = vmatprep.subr.mxu1 %v8202_v25 }
 0x8b2   :  { %14086 = vmatprep.subr.mxu0 %v14571_v0  ;;  %14071 = vmatprep.mubr.f32.mxu1 %v8239_v26  ;;  %v8775_v26 = vand.u32 4294901760, %v8774_v29  ;;  %v8817_v29 = vand.u32 4294901760, %v8816_v36 }
 0x8b3   :  { %14087 = vmatpush3.msra.mxu0 %v17903_v13  ;;  %14072 = vmatmul.mubr.f32.vlgmr.msra.gmra.mxu1 %v8249_v27  ;;  %v8802_v27 = vsub.f32 %v17950_v33, %v8801_v51 }
 0x8b4   :  { %14088 = vmatprep.subr.mxu0 %v14571_v0  ;;  %14080 = vmatpush3.msra.mxu1 %v8202_v25 }
 0x8b5   :  { %14089 = vmatpush3.msra.mxu0 %v17905_v48  ;;  %14081 = vmatprep.mubr.f32.mxu1 %v17863_v50  ;;  %v8808_v50 = vand.u32 4294901760, %v17968_v1  ;;  %v8803_v25 = vand.u32 4294901760, %v8802_v27  ;;  %v8850_v27 = vand.u32 4294901760, %v18063_v60 }
 0x8b6   :  { %14090 = vmatprep.subr.mxu0 %v14571_v0  ;;  %14119 = vmatprep.subr.mxu1 %v14571_v0 }
 0x8b7   :  { %14091 = vmatpush3.msra.mxu0 %v17920_v44  ;;  %14082 = vmatmul.mubr.f32.vlgmr.msra.gmra.mxu1 %v17883_v61  ;;  %v8796_v61 = vand.u32 4294901760, %v8795_v17  ;;  %v8809_v32 = vsub.f32 %v17968_v1, %v8808_v50  ;;  %v18089_v17 = vsub.f32 %v11175_v15, %v18065_v22  ;;  %v8851_v15 = vsub.f32 %v18063_v60, %v8850_v27 }
 0x8b8   :  { %14092 = vmatprep.subr.mxu0 %v14571_v0  ;;  %14120 = vmatpush3.msra.mxu1 %v8775_v26  ;;  %v18080_v26 = vand.u32 4294901760, %v11174_v31 }
 0x8b9   :  { %14093 = vmatpush3.msra.mxu0 %v17930_v28  ;;  %14121 = vmatprep.subr.mxu1 %v14571_v0  ;;  %v8810_v20 = vand.u32 4294901760, %v8809_v32  ;;  %v8852_v46 = vand.u32 4294901760, %v8851_v15 }
 0x8ba   :  { %14094 = vmatprep.subr.mxu0 %v14571_v0  ;;  %14122 = vmatpush3.msra.mxu1 %v8782_v56  ;;  %v8824_v56 = vand.u32 4294901760, %v8823_v9  ;;  %v18101_v32 = vsub.f32 %v11174_v31, %v18080_v26  ;;  %v8858_v31 = vsub.f32 %v18078_v18, %v8857_v53 }
 0x8bb   :  { %14095 = vmatpush3.msra.mxu0 %v17941_v7  ;;  %14123 = vmatprep.subr.mxu1 %v14571_v0 }
 0x8bc   :  { %14096 = vmatprep.subr.mxu0 %v14571_v0  ;;  %14124 = vmatpush3.msra.mxu1 %v8789_v39  ;;  %v18091_v39 = vand.u32 4294901760, %v11173_v63 }
 0x8bd   :  { %14097 = vmatpush3.msra.mxu0 %v17955_v4  ;;  %14125 = vmatprep.subr.mxu1 %v14571_v0 }
 0x8be   :  { %14098 = vmatprep.subr.mxu0 %v14571_v0  ;;  %14126 = vmatpush3.msra.mxu1 %v8796_v61  ;;  %v8844_v61 = vsub.f32 %v18039_v5, %v8843_v14  ;;  %v18108_v36 = vsub.f32 %v11173_v63, %v18091_v39 }
 0x8bf   :  { %14099 = vmatpush3.msra.mxu0 %v17970_v43  ;;  %14127 = vmatprep.subr.mxu1 %v14571_v0 }
 0x8c0   :  { %14100 = vmatprep.subr.mxu0 %v14571_v0  ;;  %14128 = vmatpush3.msra.mxu1 %v8803_v25  ;;  %v8838_v25 = vand.u32 4294901760, %v8837_v59  ;;  %v8845_v9 = vand.u32 4294901760, %v8844_v61  ;;  %v8859_v59 = vand.u32 4294901760, %v8858_v31 }
 0x8c1   :  { %14101 = vmatpush3.msra.mxu0 %v17986_v34  ;;  %14129 = vmatprep.subr.mxu1 %v14571_v0 }
 0x8c2   :  { %14102 = vmatprep.subr.mxu0 %v14571_v0  ;;  %14130 = vmatpush3.msra.mxu1 %v8810_v20  ;;  %v8864_v20 = vand.u32 4294901760, %v18089_v17 }
 0x8c3   :  { %14103 = vmatpush3.msra.mxu0 %v18002_v16  ;;  %14131 = vmatprep.subr.mxu1 %v14571_v0 }
 0x8c4   :  { %14104 = vmatprep.subr.mxu0 %v14571_v0  ;;  %14132 = vmatpush3.msra.mxu1 %v8817_v29  ;;  %v8871_v29 = vand.u32 4294901760, %v18101_v32  ;;  %v8865_v63 = vsub.f32 %v18089_v17, %v8864_v20 }
 0x8c5   :  { %14105 = vmatpush3.msra.mxu0 %v18014_v41  ;;  %14133 = vmatprep.subr.mxu1 %v14571_v0 }
 0x8c6   :  { %14106 = vmatprep.subr.mxu0 %v14571_v0  ;;  %14134 = vmatpush3.msra.mxu1 %v8824_v56  ;;  %v8878_v56 = vand.u32 4294901760, %v18108_v36  ;;  %v8866_v61 = vand.u32 4294901760, %v8865_v63 }
 0x8c7   :  { %14107 = vmatpush3.msra.mxu0 %v18035_v37  ;;  %14135 = vmatprep.subr.mxu1 %v14571_v0 }
 0x8c8   :  { %14108 = vmatprep.subr.mxu0 %v14571_v0  ;;  %14136 = vmatpush3.msra.mxu1 %v8831_v8  ;;  %v8872_v8 = vsub.f32 %v18101_v32, %v8871_v29 }
 0x8c9   :  { %14109 = vmatpush3.msra.mxu0 %v18050_v47  ;;  %14137 = vmatprep.subr.mxu1 %v14571_v0 }
 0x8ca   :  { %14110 = vmatprep.subr.mxu0 %v14571_v0  ;;  %14138 = vmatpush3.msra.mxu1 %v8838_v25  ;;  %v8879_v25 = vsub.f32 %v18108_v36, %v8878_v56  ;;  %v8873_v15 = vand.u32 4294901760, %v8872_v8 }
 0x8cb   :  { %14111 = vmatpush3.msra.mxu0 %v18065_v22  ;;  %14139 = vmatprep.subr.mxu1 %v14571_v0 }
 0x8cc   :  { %14112 = vmatprep.subr.mxu0 %v14571_v0  ;;  %14140 = vmatpush3.msra.mxu1 %v8845_v9  ;;  %v8880_v9 = vand.u32 4294901760, %v8879_v25 }
 0x8cd   :  { %14113 = vmatpush3.msra.mxu0 %v18080_v26  ;;  %14141 = vmatprep.subr.mxu1 %v14571_v0 }
 0x8ce   :  { %14114 = vmatprep.subr.mxu0 %v14571_v0  ;;  %14116 = vmatprep.mubr.msk.f32.mxu0 %vm14572_vm1, %v14571_v0 }
 0x8cf   :  { %14115 = vmatpush3.msra.mxu0 %v18091_v39  ;;  %14142 = vmatpush3.msra.mxu1 %v8852_v46 }
 0x8d0   :  { %14117 = vmatmul.mubr.f32.vlgmr.msra.gmra.mxu0 %v15048_v24  ;;  %14143 = vmatprep.subr.mxu1 %v14571_v0 }
 0x8d1   :  { %14154 = vmatprep.subr.mxu0 %v14571_v0  ;;  %14144 = vmatpush3.msra.mxu1 %v8859_v59  ;;  %v11206_v59 = vld [vmem:[%s18806_s8 + $0x478] sm:$0xff] }
 0x8d2   :  { %14155 = vmatpush3.msra.mxu0 %v17912_v11  ;;  %14145 = vmatprep.subr.mxu1 %v14571_v0 }
 0x8d3   :  { %14156 = vmatprep.subr.mxu0 %v14571_v0  ;;  %14146 = vmatpush3.msra.mxu1 %v8866_v61  ;;  %v11205_v61 = vld [vmem:[%s18806_s8 + $0x470] sm:$0xff] }
 0x8d4   :  { %14157 = vmatpush3.msra.mxu0 %v17915_v23  ;;  %14147 = vmatprep.subr.mxu1 %v14571_v0 }
 0x8d5   :  { %14158 = vmatprep.subr.mxu0 %v14571_v0  ;;  %14148 = vmatpush3.msra.mxu1 %v8873_v15 }
 0x8d6   :  { %14159 = vmatpush3.msra.mxu0 %v17924_v55  ;;  %14149 = vmatprep.subr.mxu1 %v14571_v0 }
 0x8d7   :  { %14160 = vmatprep.subr.mxu0 %v14571_v0  ;;  %14150 = vmatpush3.msra.mxu1 %v8880_v9  ;;  %v18344_v9 = vand.u32 4294901760, %v11206_v59 }
 0x8d8   :  { %14151 = vmatprep.mubr.msk.f32.mxu1 %vm14572_vm1, %v14571_v0  ;;  %14161 = vmatpush3.msra.mxu0 %v17939_v35 }
 0x8d9   :  { %14152 = vmatmul.mubr.f32.vlgmr.msra.gmra.mxu1 %v15029_v58  ;;  %14162 = vmatprep.subr.mxu0 %v14571_v0 }
 0x8da   :  { %14189 = vmatprep.subr.mxu1 %v14571_v0  ;;  %14163 = vmatpush3.msra.mxu0 %v17950_v33 }
 0x8db   :  { %14190 = vmatpush3.msra.mxu1 %v17898_v62  ;;  %14164 = vmatprep.subr.mxu0 %v14571_v0 }
 0x8dc   :  { %14191 = vmatprep.subr.mxu1 %v14571_v0  ;;  %14165 = vmatpush3.msra.mxu0 %v17968_v1 }
 0x8dd   :  { %14192 = vmatpush3.msra.mxu1 %v17903_v13  ;;  %14166 = vmatprep.subr.mxu0 %v14571_v0 }
 0x8de   :  { %14193 = vmatprep.subr.mxu1 %v14571_v0  ;;  %14167 = vmatpush3.msra.mxu0 %v17984_v42 }
 0x8df   :  { %14194 = vmatpush3.msra.mxu1 %v17905_v48  ;;  %14168 = vmatprep.subr.mxu0 %v14571_v0 }
 0x8e0   :  { %14195 = vmatprep.subr.mxu1 %v14571_v0  ;;  %14169 = vmatpush3.msra.mxu0 %v17997_v21 }
 0x8e1   :  { %14196 = vmatpush3.msra.mxu1 %v17920_v44  ;;  %14170 = vmatprep.subr.mxu0 %v14571_v0 }
 0x8e2   :  { %14197 = vmatprep.subr.mxu1 %v14571_v0  ;;  %14171 = vmatpush3.msra.mxu0 %v18009_v3 }
 0x8e3   :  { %14198 = vmatpush3.msra.mxu1 %v17930_v28  ;;  %14172 = vmatprep.subr.mxu0 %v14571_v0 }
 0x8e4   :  { %14199 = vmatprep.subr.mxu1 %v14571_v0  ;;  %14173 = vmatpush3.msra.mxu0 %v18024_v2 }
 0x8e5   :  { %14200 = vmatpush3.msra.mxu1 %v17941_v7  ;;  %14174 = vmatprep.subr.mxu0 %v14571_v0 }
 0x8e6   :  { %14201 = vmatprep.subr.mxu1 %v14571_v0  ;;  %14175 = vmatpush3.msra.mxu0 %v18039_v5 }
 0x8e7   :  { %14202 = vmatpush3.msra.mxu1 %v17955_v4  ;;  %14176 = vmatprep.subr.mxu0 %v14571_v0 }
 0x8e8   :  { %14203 = vmatprep.subr.mxu1 %v14571_v0  ;;  %14177 = vmatpush3.msra.mxu0 %v18063_v60 }
 0x8e9   :  { %14204 = vmatpush3.msra.mxu1 %v17970_v43  ;;  %14178 = vmatprep.subr.mxu0 %v14571_v0 }
 0x8ea   :  { %14205 = vmatprep.subr.mxu1 %v14571_v0  ;;  %14179 = vmatpush3.msra.mxu0 %v18078_v18 }
 0x8eb   :  { %14206 = vmatpush3.msra.mxu1 %v17986_v34  ;;  %14180 = vmatprep.subr.mxu0 %v14571_v0 }
 0x8ec   :  { %14207 = vmatprep.subr.mxu1 %v14571_v0  ;;  %14181 = vmatpush3.msra.mxu0 %v18089_v17  ;;  %v11190_v17 = vld [vmem:[%s18809_s4 + $0x78] sm:$0xff] }
 0x8ed   :  { %14208 = vmatpush3.msra.mxu1 %v18002_v16  ;;  %14182 = vmatprep.subr.mxu0 %v14571_v0 }
 0x8ee   :  { %14209 = vmatprep.subr.mxu1 %v14571_v0  ;;  %14183 = vmatpush3.msra.mxu0 %v18101_v32 }
 0x8ef   :  { %14210 = vmatpush3.msra.mxu1 %v18014_v41  ;;  %14184 = vmatprep.subr.mxu0 %v14571_v0 }
 0x8f0   :  { %14211 = vmatprep.subr.mxu1 %v14571_v0  ;;  %14185 = vmatpush3.msra.mxu0 %v18108_v36 }
 0x8f1   :  { %14186 = vmatprep.mubr.msk.f32.mxu0 %vm14572_vm1, %v14571_v0  ;;  %14212 = vmatpush3.msra.mxu1 %v18035_v37 }
 0x8f2   :  { %14187 = vmatmul.mubr.f32.vlgmr.msra.gmra.mxu0 %v15032_v6  ;;  %14213 = vmatprep.subr.mxu1 %v14571_v0 }
 0x8f3   :  { %14224 = vmatprep.subr.mxu0 %v14571_v0  ;;  %14214 = vmatpush3.msra.mxu1 %v18050_v47 }
 0x8f4   :  { %14225 = vmatpush3.msra.mxu0 %v8773_v54  ;;  %14215 = vmatprep.subr.mxu1 %v14571_v0 }
 0x8f5   :  { %14226 = vmatprep.subr.mxu0 %v14571_v0  ;;  %14216 = vmatpush3.msra.mxu1 %v18065_v22 }
 0x8f6   :  { %14227 = vmatpush3.msra.mxu0 %v8780_v40  ;;  %14217 = vmatprep.subr.mxu1 %v14571_v0 }
 0x8f7   :  { %14228 = vmatprep.subr.mxu0 %v14571_v0  ;;  %14218 = vmatpush3.msra.mxu1 %v18080_v26 }
 0x8f8   :  { %14229 = vmatpush3.msra.mxu0 %v8787_v38  ;;  %14219 = vmatprep.subr.mxu1 %v14571_v0 }
 0x8f9   :  { %14230 = vmatprep.subr.mxu0 %v14571_v0  ;;  %14220 = vmatpush3.msra.mxu1 %v18091_v39 }
 0x8fa   :  { %14221 = vmatprep.mubr.msk.f32.mxu1 %vm14572_vm1, %v14571_v0  ;;  %14231 = vmatpush3.msra.mxu0 %v8794_v52 }
 0x8fb   :  { %14222 = vmatmul.mubr.f32.vlgmr.msra.gmra.mxu1 %v15039_v12  ;;  %14232 = vmatprep.subr.mxu0 %v14571_v0 }
 0x8fc   :  { %14259 = vmatprep.subr.mxu1 %v14571_v0  ;;  %14233 = vmatpush3.msra.mxu0 %v8801_v51 }
 0x8fd   :  { %14260 = vmatpush3.msra.mxu1 %v17898_v62  ;;  %14234 = vmatprep.subr.mxu0 %v14571_v0  ;;  %v11189_v62 = vld [vmem:[%s18809_s4 + $0x70] sm:$0xff] }
 0x8fe   :  { %14261 = vmatprep.subr.mxu1 %v14571_v0  ;;  %14235 = vmatpush3.msra.mxu0 %v8808_v50 }
 0x8ff   :  { %14262 = vmatpush3.msra.mxu1 %v17903_v13  ;;  %14236 = vmatprep.subr.mxu0 %v14571_v0  ;;  %v9324_v13 = vsel %vm1881_vm2, %v11189_v62, 0  ;;  %v11204_v62 = vld [vmem:[%s18806_s8 + $0x468] sm:$0xff] }
 0x900   :  { %14263 = vmatprep.subr.mxu1 %v14571_v0  ;;  %14237 = vmatpush3.msra.mxu0 %v8815_v19 }
 0x901   :  { %14264 = vmatpush3.msra.mxu1 %v17905_v48  ;;  %14238 = vmatprep.subr.mxu0 %v14571_v0  ;;  %v18309_v48 = vand.u32 4294901760, %v9324_v13 }
 0x902   :  { %14265 = vmatprep.subr.mxu1 %v14571_v0  ;;  %14239 = vmatpush3.msra.mxu0 %v8822_v30 }
 0x903   :  { %14266 = vmatpush3.msra.mxu1 %v17920_v44  ;;  %14240 = vmatprep.subr.mxu0 %v14571_v0  ;;  %v18312_v11 = vsub.f32 %v9324_v13, %v18309_v48 }
 0x904   :  { %14267 = vmatprep.subr.mxu1 %v14571_v0  ;;  %14241 = vmatpush3.msra.mxu0 %v8829_v45 }
 0x905   :  { %14268 = vmatpush3.msra.mxu1 %v17930_v28  ;;  %14242 = vmatprep.subr.mxu0 %v14571_v0  ;;  %v9397_v23 = vand.u32 4294901760, %v18312_v11 }
 0x906   :  { %14269 = vmatprep.subr.mxu1 %v14571_v0  ;;  %14243 = vmatpush3.msra.mxu0 %v8836_v10 }
 0x907   :  { %14270 = vmatpush3.msra.mxu1 %v17941_v7  ;;  %14244 = vmatprep.subr.mxu0 %v14571_v0  ;;  %v9398_v44 = vsub.f32 %v18312_v11, %v9397_v23 }
 0x908   :  { %14271 = vmatprep.subr.mxu1 %v14571_v0  ;;  %14245 = vmatpush3.msra.mxu0 %v8843_v14 }
 0x909   :  { %14272 = vmatpush3.msra.mxu1 %v17955_v4  ;;  %14246 = vmatprep.subr.mxu0 %v14571_v0  ;;  %v9399_v55 = vand.u32 4294901760, %v9398_v44  ;;  %v18349_v44 = vand.u32 4294901760, %v11205_v61 }
 0x90a   :  { %14273 = vmatprep.subr.mxu1 %v14571_v0  ;;  %14247 = vmatpush3.msra.mxu0 %v8850_v27 }
 0x90b   :  { %14274 = vmatpush3.msra.mxu1 %v17970_v43  ;;  %14248 = vmatprep.subr.mxu0 %v14571_v0 }
 0x90c   :  { %14275 = vmatprep.subr.mxu1 %v14571_v0  ;;  %14249 = vmatpush3.msra.mxu0 %v8857_v53 }
 0x90d   :  { %14276 = vmatpush3.msra.mxu1 %v17986_v34  ;;  %14250 = vmatprep.subr.mxu0 %v14571_v0 }
 0x90e   :  { %14277 = vmatprep.subr.mxu1 %v14571_v0  ;;  %14251 = vmatpush3.msra.mxu0 %v8864_v20 }
 0x90f   :  { %14278 = vmatpush3.msra.mxu1 %v18002_v16  ;;  %14252 = vmatprep.subr.mxu0 %v14571_v0 }
 0x910   :  { %14279 = vmatprep.subr.mxu1 %v14571_v0  ;;  %14253 = vmatpush3.msra.mxu0 %v8871_v29 }
 0x911   :  { %14280 = vmatpush3.msra.mxu1 %v18014_v41  ;;  %14254 = vmatprep.subr.mxu0 %v14571_v0 }
 0x912   :  { %14281 = vmatprep.subr.mxu1 %v14571_v0  ;;  %14255 = vmatpush3.msra.mxu0 %v8878_v56 }
 0x913   :  { %14256 = vmatprep.mubr.msk.f32.mxu0 %vm14572_vm1, %v14571_v0  ;;  %14282 = vmatpush3.msra.mxu1 %v18035_v37 }
 0x914   :  { %14257 = vmatmul.mubr.f32.vlgmr.msra.gmra.mxu0 %v15029_v58  ;;  %14283 = vmatprep.subr.mxu1 %v14571_v0 }
 0x915   :  { %14284 = vmatpush3.msra.mxu1 %v18050_v47  ;;  %14291 = vmatprep.mubr.msk.f32.mxu1 %vm14572_vm1, %v14571_v0 }
 0x916   :  { %14285 = vmatprep.subr.mxu1 %v14571_v0  ;;  %14296 = vmatprep.mubr.f32.mxu0 %v9399_v55 }
 0x917   :  { %14286 = vmatpush3.msra.mxu1 %v18065_v22 }
 0x918   :  { %14287 = vmatprep.subr.mxu1 %v14571_v0 }
 0x919   :  { %14288 = vmatpush3.msra.mxu1 %v18080_v26 }
 0x91a   :  { %14289 = vmatprep.subr.mxu1 %v14571_v0 }
 0x91b   :  { %14290 = vmatpush3.msra.mxu1 %v18091_v39  ;;  %v9327_v39 = vsel %vm1881_vm2, %v11190_v17, 0 }
 0x91c   :  { %14292 = vmatmul.mubr.f32.vlgmr.msra.gmra.mxu1 %v15029_v58 }
 0x91d   :  { %14301 = vmatprep.mubr.f32.mxu1 %v18309_v48 }
 0x967   :  { %v14058_v28 = vpop.f32.mrf.mxu0 }
 0x969   :  { %v8243_v54 = vpop.f32.mrf.mxu0 }
 0x96b   :  { %v14068_v40 = vpop.f32.mrf.mxu0 }
 0x96d   :  { %v8409_v7 = vpop.f32.mrf.mxu0 }
 0x96f   :  { %v14063_v35 = vpop.f32.mrf.mxu1 }
 0x970   :  { %v8336_v38 = vadd.f32 %v14063_v35, %v14058_v28  ;;  %v14078_v52 = vpop.f32.mrf.mxu0  ;;  %v18351_v28 = vand.u32 4294901760, %v11204_v62 }
 0x971   :  { %v8329_v33 = vpop.f32.mrf.mxu1 }
 0x972   :  { %v8417_v4 = vadd.f32 %v14068_v40, %v8336_v38  ;;  %v8330_v1 = vadd.f32 %v8329_v33, %v8243_v54  ;;  %v8572_v50 = vpop.f32.mrf.mxu0  ;;  %v11203_v54 = vld [vmem:[%s18806_s8 + $0x460] sm:$0xff]  ;;  %v18358_v40 = vsub.f32 %v11206_v59, %v18344_v9  ;;  %v11202_v38 = vld [vmem:[%s18806_s8 + $0x458] sm:$0xff] }
 0x973   :  { %v14073_v43 = vpop.f32.mrf.mxu1  ;;  %v18366_v33 = vand.u32 4294901760, %v11203_v54 }
 0x974   :  { %v8410_v42 = vadd.f32 %v8409_v7, %v8330_v1  ;;  %v8499_v34 = vadd.f32 %v14073_v43, %v8417_v4  ;;  %v18361_v7 = vsub.f32 %v11205_v61, %v18349_v44  ;;  %v18370_v1 = vsub.f32 %v11204_v62, %v18351_v28  ;;  %v11201_v43 = vld [vmem:[%s18806_s8 + $0x450] sm:$0xff] }
 0x975   :  { %v8490_v51 = vpop.f32.mrf.mxu1 }
 0x976   :  { %v8579_v21 = vadd.f32 %v14078_v52, %v8499_v34  ;;  %v8491_v16 = vadd.f32 %v8490_v51, %v8410_v42  ;;  %v18376_v52 = vand.u32 4294901760, %v11202_v38  ;;  %v9931_v42 = vand.u32 4294901760, %v18358_v40  ;;  %v11200_v51 = vld [vmem:[%s18806_s8 + $0x448] sm:$0xff] }
 0x977   :  { %v14083_v3 = vpop.f32.mrf.mxu1  ;;  %v9938_v34 = vand.u32 4294901760, %v18361_v7 }
 0x978   :  { %v8573_v41 = vadd.f32 %v8572_v50, %v8491_v16  ;;  %v8657_v19 = vadd.f32 %v14083_v3, %v8579_v21  ;;  %v18385_v21 = vsub.f32 %v11203_v54, %v18366_v33  ;;  %v18387_v16 = vand.u32 4294901760, %v11201_v43  ;;  %v11199_v3 = vld [vmem:[%s18806_s8 + $0x440] sm:$0xff] }
 0x979   :  { %v8650_v2 = vpop.f32.mrf.mxu1  ;;  %v9945_v50 = vand.u32 4294901760, %v18370_v1 }
 0x97a   :  { %v18320_v30 = vadd.f32 %v8657_v19, %v17874_v49  ;;  %v8651_v37 = vadd.f32 %v8650_v2, %v8573_v41  ;;  %v18329_v49 = vand.u32 4294901760, %v9327_v39  ;;  %v18396_v41 = vsub.f32 %v11202_v38, %v18376_v52 }
 0x97b   :  { %v9932_v19 = vsub.f32 %v18358_v40, %v9931_v42  ;;  %v18401_v2 = vand.u32 4294901760, %v11200_v51 }
 0x97c   :  { %v18323_v5 = vadd.f32 %v8651_v37, %v17877_v57  ;;  %v18332_v27 = vsub.f32 %v9327_v39, %v18329_v49  ;;  %v9939_v37 = vsub.f32 %v18361_v7, %v9938_v34  ;;  %v11196_v39 = vld [vmem:[%s18806_s8 + $0x428] sm:$0xff] }
 0x97e   :  { %v9407_v20 = vand.u32 4294901760, %v18332_v27  ;;  %v9940_v17 = vand.u32 4294901760, %v9939_v37 }
 0x980   :  { %v9408_v46 = vsub.f32 %v18332_v27, %v9407_v20 }
 0x982   :  { %v9409_v15 = vand.u32 4294901760, %v9408_v46  ;;  %v11195_v46 = vld [vmem:[%s18806_s8 + $0x420] sm:$0xff] }
 0x983   :  { %v18481_v61 = vand.u32 4294901760, %v11195_v46 }
 0x990   :  { %v8766_v45 = vpop.f32.mrf.mxu0 }
 0x992   :  { %v14118_v47 = vpop.f32.mrf.mxu0 }
 0x993   :  { %v18414_v47 = vsub.f32 %v11201_v43, %v18387_v16  ;;  %v11192_v43 = vld [vmem:[%s18806_s8 + $0x408] sm:$0xff] }
 0x999   :  { %v8917_v10 = vpop.f32.mrf.mxu1 }
 0x99a   :  { %v8918_v32 = vadd.f32 %v8917_v10, %v8766_v45  ;;  %v11198_v45 = vld [vmem:[%s18806_s8 + $0x438] sm:$0xff]  ;;  %v18416_v10 = vand.u32 4294901760, %v11199_v3 }
 0x99b   :  { %v14153_v60 = vpop.f32.mrf.mxu1 }
 0x99c   :  { %v9952_v60 = vand.u32 4294901760, %v18385_v21 }
 0x9b2   :  { %v9021_v22 = vpop.f32.mrf.mxu0 }
 0x9b3   :  { %v9022_v36 = vadd.f32 %v9021_v22, %v8918_v32  ;;  %v9946_v22 = vsub.f32 %v18370_v1, %v9945_v50 }
 0x9b4   :  { %v14188_v14 = vpop.f32.mrf.mxu0 }
 0x9b5   :  { %v18430_v14 = vsub.f32 %v11200_v51, %v18401_v2  ;;  %v18509_v51 = vsub.f32 %v11195_v46, %v18481_v61 }
 0x9bb   :  { %v9110_v18 = vpop.f32.mrf.mxu1 }
 0x9bc   :  { %v9111_v31 = vadd.f32 %v9110_v18, %v9022_v36  ;;  %v18432_v18 = vand.u32 4294901760, %v11198_v45 }
 0x9bd   :  { %v14223_v26 = vpop.f32.mrf.mxu1 }
 0x9be   :  { %v9959_v26 = vand.u32 4294901760, %v18396_v41  ;;  %v18455_v36 = vsub.f32 %v11198_v45, %v18432_v18 }
 0x9d4   :  { %v9229_v57 = vpop.f32.mrf.mxu0 }
 0x9d5   :  { %v9230_v29 = vadd.f32 %v9229_v57, %v9111_v31  ;;  %v9953_v57 = vsub.f32 %v18385_v21, %v9952_v60  ;;  %v18460_v31 = vand.u32 4294901760, %v11196_v39 }
 0x9d6   :  { %v14258_v53 = vpop.f32.mrf.mxu0 }
 0x9d7   :  { %v9947_v53 = vand.u32 4294901760, %v9946_v22  ;;  %v11191_v22 = vld [vmem:[%s18806_s8 + $0x400] sm:$0xff] }
 0x9dc   :  { %v9316_v63 = vpop.f32.mrf.mxu1 }
 0x9dd   :  { %v9317_v56 = vadd.f32 %v9316_v63, %v9230_v29  ;;  %v9973_v29 = vand.u32 4294901760, %v18430_v14 }
 0x9de   :  { %v14293_v8 = vpop.f32.mrf.mxu1 }
 0x9df   :  { %v9360_v25 = vand.u32 4294901760, %v9317_v56  ;;  %v11194_v8 = vld [vmem:[%s18806_s8 + $0x418] sm:$0xff]  ;;  %v9974_v62 = vsub.f32 %v18430_v14, %v9973_v29 }
 0x9e0   :  { %v18496_v54 = vand.u32 4294901760, %v11194_v8 }
 0x9e1   :  { %v9447_v13 = vsub.f32 %v9317_v56, %v9360_v25  ;;  %14294 = vmatprep.subr.mxu0 %v9360_v25 }
 0x9e2   :  { %14295 = vmatpush3.msra.mxu0 %v9360_v25 }
 0x9e3   :  { %14297 = vmatmul.mubr.f32.vlgmr.msra.gmra.mxu0 %v9409_v15  ;;  %14304 = vmatprep.subr.mxu0 %v9447_v13  ;;  %v9448_v55 = vand.u32 4294901760, %v9447_v13  ;;  %v18485_v15 = vsub.f32 %v11196_v39, %v18460_v31 }
 0x9e4   :  { %14305 = vmatpush3.msra.mxu0 %v9447_v13  ;;  %14306 = vmatprep.mubr.f32.mxu0 %v18312_v11  ;;  %v11197_v11 = vld [vmem:[%s18806_s8 + $0x430] sm:$0xff] }
 0x9e5   :  { %14314 = vmatprep.subr.mxu0 %v9448_v55  ;;  %v9449_v35 = vsub.f32 %v9447_v13, %v9448_v55  ;;  %v18448_v32 = vand.u32 4294901760, %v11197_v11  ;;  %v9987_v13 = vand.u32 4294901760, %v18455_v36  ;;  %v10001_v45 = vand.u32 4294901760, %v18485_v15 }
 0x9e7   :  { %14307 = vmatmul.mubr.f32.vlgmr.msra.gmra.mxu0 %v18332_v27  ;;  %v9450_v4 = vand.u32 4294901760, %v9449_v35  ;;  %v18443_v27 = vsub.f32 %v11199_v3, %v18416_v10  ;;  %v18470_v63 = vsub.f32 %v11197_v11, %v18448_v32  ;;  %v9988_v37 = vsub.f32 %v18455_v36, %v9987_v13 }
 0x9e8   :  { %14315 = vmatpush3.msra.mxu0 %v9448_v55  ;;  %14316 = vmatprep.mubr.f32.mxu0 %v18309_v48  ;;  %v11193_v55 = vld [vmem:[%s18806_s8 + $0x410] sm:$0xff]  ;;  %v18524_v11 = vsub.f32 %v11194_v8, %v18496_v54 }
 0x9e9   :  { %14299 = vmatprep.subr.mxu1 %v9450_v4  ;;  %14324 = vmatprep.subr.mxu0 %v14571_v0  ;;  %v9980_v59 = vand.u32 4294901760, %v18443_v27  ;;  %v18511_v3 = vand.u32 4294901760, %v11193_v55  ;;  %v9989_v46 = vand.u32 4294901760, %v9988_v37 }
 0x9ea   :  { %14300 = vmatpush3.msra.mxu1 %v9450_v4  ;;  %v9994_v4 = vand.u32 4294901760, %v18470_v63  ;;  %v10015_v8 = vand.u32 4294901760, %v18524_v11 }
 0x9eb   :  { %14302 = vmatmul.mubr.f32.vlgmr.msra.gmra.mxu1 %v18329_v49  ;;  %14309 = vmatprep.subr.mxu1 %v9360_v25  ;;  %v9981_v38 = vsub.f32 %v18443_v27, %v9980_v59 }
 0x9ec   :  { %14317 = vmatmul.mubr.f32.vlgmr.msra.gmra.mxu0 %v18329_v49  ;;  %14310 = vmatpush3.msra.mxu1 %v9360_v25  ;;  %v9995_v39 = vsub.f32 %v18470_v63, %v9994_v4 }
 0x9ed   :  { %14325 = vmatpush3.msra.mxu0 %v18344_v9  ;;  %14319 = vmatprep.subr.mxu1 %v9360_v25 }
 0x9ee   :  { %14326 = vmatprep.subr.mxu0 %v14571_v0  ;;  %14311 = vmatprep.mubr.f32.mxu1 %v9397_v23  ;;  %v9933_v23 = vand.u32 4294901760, %v9932_v19  ;;  %v9975_v19 = vand.u32 4294901760, %v9974_v62 }
 0x9ef   :  { %14327 = vmatpush3.msra.mxu0 %v18349_v44  ;;  %14312 = vmatmul.mubr.f32.vlgmr.msra.gmra.mxu1 %v9407_v20  ;;  %v9960_v20 = vsub.f32 %v18396_v41, %v9959_v26 }
 0x9f0   :  { %14328 = vmatprep.subr.mxu0 %v14571_v0  ;;  %14320 = vmatpush3.msra.mxu1 %v9360_v25 }
 0x9f1   :  { %14329 = vmatpush3.msra.mxu0 %v18351_v28  ;;  %14321 = vmatprep.mubr.f32.mxu1 %v18309_v48  ;;  %v9966_v48 = vand.u32 4294901760, %v18414_v47  ;;  %v9961_v25 = vand.u32 4294901760, %v9960_v20  ;;  %v10008_v20 = vand.u32 4294901760, %v18509_v51 }
 0x9f2   :  { %14330 = vmatprep.subr.mxu0 %v14571_v0  ;;  %14359 = vmatprep.subr.mxu1 %v14571_v0 }
 0x9f3   :  { %14331 = vmatpush3.msra.mxu0 %v18366_v33  ;;  %14322 = vmatmul.mubr.f32.vlgmr.msra.gmra.mxu1 %v18329_v49  ;;  %v9954_v49 = vand.u32 4294901760, %v9953_v57  ;;  %v9967_v56 = vsub.f32 %v18414_v47, %v9966_v48  ;;  %v18535_v57 = vsub.f32 %v11193_v55, %v18511_v3  ;;  %v10009_v55 = vsub.f32 %v18509_v51, %v10008_v20 }
 0x9f4   :  { %14332 = vmatprep.subr.mxu0 %v14571_v0  ;;  %14360 = vmatpush3.msra.mxu1 %v9933_v23  ;;  %v18526_v23 = vand.u32 4294901760, %v11192_v43 }
 0x9f5   :  { %14333 = vmatpush3.msra.mxu0 %v18376_v52  ;;  %14361 = vmatprep.subr.mxu1 %v14571_v0  ;;  %v9968_v35 = vand.u32 4294901760, %v9967_v56  ;;  %v10010_v37 = vand.u32 4294901760, %v10009_v55 }
 0x9f6   :  { %14334 = vmatprep.subr.mxu0 %v14571_v0  ;;  %14362 = vmatpush3.msra.mxu1 %v9940_v17  ;;  %v9982_v17 = vand.u32 4294901760, %v9981_v38  ;;  %v18547_v56 = vsub.f32 %v11192_v43, %v18526_v23  ;;  %v10016_v43 = vsub.f32 %v18524_v11, %v10015_v8 }
 0x9f7   :  { %14335 = vmatpush3.msra.mxu0 %v18387_v16  ;;  %14363 = vmatprep.subr.mxu1 %v14571_v0 }
 0x9f8   :  { %14336 = vmatprep.subr.mxu0 %v14571_v0  ;;  %14364 = vmatpush3.msra.mxu1 %v9947_v53  ;;  %v18537_v53 = vand.u32 4294901760, %v11191_v22 }
 0x9f9   :  { %14337 = vmatpush3.msra.mxu0 %v18401_v2  ;;  %14365 = vmatprep.subr.mxu1 %v14571_v0 }
 0x9fa   :  { %14338 = vmatprep.subr.mxu0 %v14571_v0  ;;  %14366 = vmatpush3.msra.mxu1 %v9954_v49  ;;  %v10002_v49 = vsub.f32 %v18485_v15, %v10001_v45  ;;  %v18554_v62 = vsub.f32 %v11191_v22, %v18537_v53 }
 0x9fb   :  { %14339 = vmatpush3.msra.mxu0 %v18416_v10  ;;  %14367 = vmatprep.subr.mxu1 %v14571_v0 }
 0x9fc   :  { %14340 = vmatprep.subr.mxu0 %v14571_v0  ;;  %14368 = vmatpush3.msra.mxu1 %v9961_v25  ;;  %v9996_v25 = vand.u32 4294901760, %v9995_v39  ;;  %v10003_v38 = vand.u32 4294901760, %v10002_v49  ;;  %v10017_v39 = vand.u32 4294901760, %v10016_v43 }
 0x9fd   :  { %14341 = vmatpush3.msra.mxu0 %v18432_v18  ;;  %14369 = vmatprep.subr.mxu1 %v14571_v0 }
 0x9fe   :  { %14342 = vmatprep.subr.mxu0 %v14571_v0  ;;  %14370 = vmatpush3.msra.mxu1 %v9968_v35  ;;  %v10022_v35 = vand.u32 4294901760, %v18535_v57 }
 0x9ff   :  { %14343 = vmatpush3.msra.mxu0 %v18448_v32  ;;  %14371 = vmatprep.subr.mxu1 %v14571_v0 }
 0xa00   :  { %14344 = vmatprep.subr.mxu0 %v14571_v0  ;;  %14372 = vmatpush3.msra.mxu1 %v9975_v19  ;;  %v10029_v19 = vand.u32 4294901760, %v18547_v56  ;;  %v10023_v22 = vsub.f32 %v18535_v57, %v10022_v35 }
 0xa01   :  { %14345 = vmatpush3.msra.mxu0 %v18460_v31  ;;  %14373 = vmatprep.subr.mxu1 %v14571_v0 }
 0xa02   :  { %14346 = vmatprep.subr.mxu0 %v14571_v0  ;;  %14374 = vmatpush3.msra.mxu1 %v9982_v17  ;;  %v10036_v17 = vand.u32 4294901760, %v18554_v62  ;;  %v10024_v49 = vand.u32 4294901760, %v10023_v22 }
 0xa03   :  { %14347 = vmatpush3.msra.mxu0 %v18481_v61  ;;  %14375 = vmatprep.subr.mxu1 %v14571_v0 }
 0xa04   :  { %14348 = vmatprep.subr.mxu0 %v14571_v0  ;;  %14376 = vmatpush3.msra.mxu1 %v9989_v46  ;;  %v10030_v46 = vsub.f32 %v18547_v56, %v10029_v19 }
 0xa05   :  { %14349 = vmatpush3.msra.mxu0 %v18496_v54  ;;  %14377 = vmatprep.subr.mxu1 %v14571_v0 }
 0xa06   :  { %14350 = vmatprep.subr.mxu0 %v14571_v0  ;;  %14378 = vmatpush3.msra.mxu1 %v9996_v25  ;;  %v10037_v25 = vsub.f32 %v18554_v62, %v10036_v17  ;;  %v10031_v55 = vand.u32 4294901760, %v10030_v46 }
 0xa07   :  { %14351 = vmatpush3.msra.mxu0 %v18511_v3  ;;  %14379 = vmatprep.subr.mxu1 %v14571_v0 }
 0xa08   :  { %14352 = vmatprep.subr.mxu0 %v14571_v0  ;;  %14380 = vmatpush3.msra.mxu1 %v10003_v38  ;;  %v10038_v38 = vand.u32 4294901760, %v10037_v25 }
 0xa09   :  { %14353 = vmatpush3.msra.mxu0 %v18526_v23  ;;  %14381 = vmatprep.subr.mxu1 %v14571_v0 }
 0xa0a   :  { %14354 = vmatprep.subr.mxu0 %v14571_v0  ;;  %14356 = vmatprep.mubr.msk.f32.mxu0 %vm14572_vm1, %v14571_v0 }
 0xa0b   :  { %14355 = vmatpush3.msra.mxu0 %v18537_v53  ;;  %14382 = vmatpush3.msra.mxu1 %v10010_v37 }
 0xa0c   :  { %14357 = vmatmul.mubr.f32.vlgmr.msra.gmra.mxu0 %v15048_v24  ;;  %14383 = vmatprep.subr.mxu1 %v14571_v0 }
 0xa0d   :  { %14394 = vmatprep.subr.mxu0 %v14571_v0  ;;  %14384 = vmatpush3.msra.mxu1 %v10017_v39 }
 0xa0e   :  { %14395 = vmatpush3.msra.mxu0 %v18358_v40  ;;  %14385 = vmatprep.subr.mxu1 %v14571_v0 }
 0xa0f   :  { %14396 = vmatprep.subr.mxu0 %v14571_v0  ;;  %14386 = vmatpush3.msra.mxu1 %v10024_v49 }
 0xa10   :  { %14397 = vmatpush3.msra.mxu0 %v18361_v7  ;;  %14387 = vmatprep.subr.mxu1 %v14571_v0 }
 0xa11   :  { %14398 = vmatprep.subr.mxu0 %v14571_v0  ;;  %14388 = vmatpush3.msra.mxu1 %v10031_v55 }
 0xa12   :  { %14399 = vmatpush3.msra.mxu0 %v18370_v1  ;;  %14389 = vmatprep.subr.mxu1 %v14571_v0 }
 0xa13   :  { %14400 = vmatprep.subr.mxu0 %v14571_v0  ;;  %14390 = vmatpush3.msra.mxu1 %v10038_v38 }
 0xa14   :  { %14391 = vmatprep.mubr.msk.f32.mxu1 %vm14572_vm1, %v14571_v0  ;;  %14401 = vmatpush3.msra.mxu0 %v18385_v21 }
 0xa15   :  { %14392 = vmatmul.mubr.f32.vlgmr.msra.gmra.mxu1 %v15029_v58  ;;  %14402 = vmatprep.subr.mxu0 %v14571_v0 }
 0xa16   :  { %14429 = vmatprep.subr.mxu1 %v14571_v0  ;;  %14403 = vmatpush3.msra.mxu0 %v18396_v41  ;;  %v10979_v41 = vld [vmem:[%s18803_s5 + $0x8] sm:$0xff] }
 0xa17   :  { %14430 = vmatpush3.msra.mxu1 %v18344_v9  ;;  %14404 = vmatprep.subr.mxu0 %v14571_v0 }
 0xa18   :  { %14431 = vmatprep.subr.mxu1 %v14571_v0  ;;  %14405 = vmatpush3.msra.mxu0 %v18414_v47 }
 0xa19   :  { %14432 = vmatpush3.msra.mxu1 %v18349_v44  ;;  %14406 = vmatprep.subr.mxu0 %v14571_v0 }
 0xa1a   :  { %14433 = vmatprep.subr.mxu1 %v14571_v0  ;;  %14407 = vmatpush3.msra.mxu0 %v18430_v14 }
 0xa1b   :  { %14434 = vmatpush3.msra.mxu1 %v18351_v28  ;;  %14408 = vmatprep.subr.mxu0 %v14571_v0 }
 0xa1c   :  { %14435 = vmatprep.subr.mxu1 %v14571_v0  ;;  %14409 = vmatpush3.msra.mxu0 %v18443_v27 }
 0xa1d   :  { %14436 = vmatpush3.msra.mxu1 %v18366_v33  ;;  %14410 = vmatprep.subr.mxu0 %v14571_v0 }
 0xa1e   :  { %14437 = vmatprep.subr.mxu1 %v14571_v0  ;;  %14411 = vmatpush3.msra.mxu0 %v18455_v36 }
 0xa1f   :  { %14438 = vmatpush3.msra.mxu1 %v18376_v52  ;;  %14412 = vmatprep.subr.mxu0 %v14571_v0 }
 0xa20   :  { %14439 = vmatprep.subr.mxu1 %v14571_v0  ;;  %14413 = vmatpush3.msra.mxu0 %v18470_v63 }
 0xa21   :  { %14440 = vmatpush3.msra.mxu1 %v18387_v16  ;;  %14414 = vmatprep.subr.mxu0 %v14571_v0 }
 0xa22   :  { %14441 = vmatprep.subr.mxu1 %v14571_v0  ;;  %14415 = vmatpush3.msra.mxu0 %v18485_v15 }
 0xa23   :  { %14442 = vmatpush3.msra.mxu1 %v18401_v2  ;;  %14416 = vmatprep.subr.mxu0 %v14571_v0 }
 0xa24   :  { %14443 = vmatprep.subr.mxu1 %v14571_v0  ;;  %14417 = vmatpush3.msra.mxu0 %v18509_v51 }
 0xa25   :  { %14444 = vmatpush3.msra.mxu1 %v18416_v10  ;;  %14418 = vmatprep.subr.mxu0 %v14571_v0 }
 0xa26   :  { %14445 = vmatprep.subr.mxu1 %v14571_v0  ;;  %14419 = vmatpush3.msra.mxu0 %v18524_v11  ;;  %v11208_v11 = vld [vmem:[%s18809_s4 + $0x88] sm:$0xff] }
 0xa27   :  { %14446 = vmatpush3.msra.mxu1 %v18432_v18  ;;  %14420 = vmatprep.subr.mxu0 %v14571_v0 }
 0xa28   :  { %14447 = vmatprep.subr.mxu1 %v14571_v0  ;;  %14421 = vmatpush3.msra.mxu0 %v18535_v57 }
 0xa29   :  { %14448 = vmatpush3.msra.mxu1 %v18448_v32  ;;  %14422 = vmatprep.subr.mxu0 %v14571_v0 }
 0xa2a   :  { %14449 = vmatprep.subr.mxu1 %v14571_v0  ;;  %14423 = vmatpush3.msra.mxu0 %v18547_v56 }
 0xa2b   :  { %14450 = vmatpush3.msra.mxu1 %v18460_v31  ;;  %14424 = vmatprep.subr.mxu0 %v14571_v0 }
 0xa2c   :  { %14451 = vmatprep.subr.mxu1 %v14571_v0  ;;  %14425 = vmatpush3.msra.mxu0 %v18554_v62 }
 0xa2d   :  { %14426 = vmatprep.mubr.msk.f32.mxu0 %vm14572_vm1, %v14571_v0  ;;  %14452 = vmatpush3.msra.mxu1 %v18481_v61 }
 0xa2e   :  { %14427 = vmatmul.mubr.f32.vlgmr.msra.gmra.mxu0 %v15032_v6  ;;  %14453 = vmatprep.subr.mxu1 %v14571_v0  ;;  %v11207_v6 = vld [vmem:[%s18809_s4 + $0x80] sm:$0xff] }
 0xa2f   :  { %14464 = vmatprep.subr.mxu0 %v14571_v0  ;;  %14454 = vmatpush3.msra.mxu1 %v18496_v54 }
 0xa30   :  { %14465 = vmatpush3.msra.mxu0 %v9931_v42  ;;  %14455 = vmatprep.subr.mxu1 %v14571_v0 }
 0xa31   :  { %14466 = vmatprep.subr.mxu0 %v14571_v0  ;;  %14456 = vmatpush3.msra.mxu1 %v18511_v3 }
 0xa32   :  { %14467 = vmatpush3.msra.mxu0 %v9938_v34  ;;  %14457 = vmatprep.subr.mxu1 %v14571_v0 }
 0xa33   :  { %14468 = vmatprep.subr.mxu0 %v14571_v0  ;;  %14458 = vmatpush3.msra.mxu1 %v18526_v23 }
 0xa34   :  { %14469 = vmatpush3.msra.mxu0 %v9945_v50  ;;  %14459 = vmatprep.subr.mxu1 %v14571_v0 }
 0xa35   :  { %14470 = vmatprep.subr.mxu0 %v14571_v0  ;;  %14460 = vmatpush3.msra.mxu1 %v18537_v53 }
 0xa36   :  { %14461 = vmatprep.mubr.msk.f32.mxu1 %vm14572_vm1, %v14571_v0  ;;  %14471 = vmatpush3.msra.mxu0 %v9952_v60  ;;  %v11017_v60 = vld [vmem:[%s18804_s6] sm:$0xff] }
 0xa37   :  { %14462 = vmatmul.mubr.f32.vlgmr.msra.gmra.mxu1 %v15039_v12  ;;  %14472 = vmatprep.subr.mxu0 %v14571_v0  ;;  %v10482_v12 = vsel %vm1881_vm2, %v11207_v6, 0 }
 0xa38   :  { %14499 = vmatprep.subr.mxu1 %v14571_v0  ;;  %14473 = vmatpush3.msra.mxu0 %v9959_v26  ;;  %v18755_v24 = vand.u32 4294901760, %v10482_v12 }
 0xa39   :  { %14500 = vmatpush3.msra.mxu1 %v18344_v9  ;;  %14474 = vmatprep.subr.mxu0 %v14571_v0 }
 0xa3a   :  { %14501 = vmatprep.subr.mxu1 %v14571_v0  ;;  %14475 = vmatpush3.msra.mxu0 %v9966_v48  ;;  %v18758_v9 = vsub.f32 %v10482_v12, %v18755_v24 }
 0xa3b   :  { %14502 = vmatpush3.msra.mxu1 %v18349_v44  ;;  %14476 = vmatprep.subr.mxu0 %v14571_v0 }
 0xa3c   :  { %14503 = vmatprep.subr.mxu1 %v14571_v0  ;;  %14477 = vmatpush3.msra.mxu0 %v9973_v29  ;;  %v10555_v44 = vand.u32 4294901760, %v18758_v9 }
 0xa3d   :  { %14504 = vmatpush3.msra.mxu1 %v18351_v28  ;;  %14478 = vmatprep.subr.mxu0 %v14571_v0 }
 0xa3e   :  { %14505 = vmatprep.subr.mxu1 %v14571_v0  ;;  %14479 = vmatpush3.msra.mxu0 %v9980_v59 }
 0xa3f   :  { %14506 = vmatpush3.msra.mxu1 %v18366_v33  ;;  %14480 = vmatprep.subr.mxu0 %v14571_v0 }
 0xa40   :  { %14507 = vmatprep.subr.mxu1 %v14571_v0  ;;  %14481 = vmatpush3.msra.mxu0 %v9987_v13 }
 0xa41   :  { %14508 = vmatpush3.msra.mxu1 %v18376_v52  ;;  %14482 = vmatprep.subr.mxu0 %v14571_v0 }
 0xa42   :  { %14509 = vmatprep.subr.mxu1 %v14571_v0  ;;  %14483 = vmatpush3.msra.mxu0 %v9994_v4 }
 0xa43   :  { %14510 = vmatpush3.msra.mxu1 %v18387_v16  ;;  %14484 = vmatprep.subr.mxu0 %v14571_v0 }
 0xa44   :  { %14511 = vmatprep.subr.mxu1 %v14571_v0  ;;  %14485 = vmatpush3.msra.mxu0 %v10001_v45 }
 0xa45   :  { %14512 = vmatpush3.msra.mxu1 %v18401_v2  ;;  %14486 = vmatprep.subr.mxu0 %v14571_v0 }
 0xa46   :  { %14513 = vmatprep.subr.mxu1 %v14571_v0  ;;  %14487 = vmatpush3.msra.mxu0 %v10008_v20 }
 0xa47   :  { %14514 = vmatpush3.msra.mxu1 %v18416_v10  ;;  %14488 = vmatprep.subr.mxu0 %v14571_v0 }
 0xa48   :  { %14515 = vmatprep.subr.mxu1 %v14571_v0  ;;  %14489 = vmatpush3.msra.mxu0 %v10015_v8 }
 0xa49   :  { %14516 = vmatpush3.msra.mxu1 %v18432_v18  ;;  %14490 = vmatprep.subr.mxu0 %v14571_v0 }
 0xa4a   :  { %14517 = vmatprep.subr.mxu1 %v14571_v0  ;;  %14491 = vmatpush3.msra.mxu0 %v10022_v35 }
 0xa4b   :  { %14518 = vmatpush3.msra.mxu1 %v18448_v32  ;;  %14492 = vmatprep.subr.mxu0 %v14571_v0 }
 0xa4c   :  { %14519 = vmatprep.subr.mxu1 %v14571_v0  ;;  %14493 = vmatpush3.msra.mxu0 %v10029_v19 }
 0xa4d   :  { %14520 = vmatpush3.msra.mxu1 %v18460_v31  ;;  %14494 = vmatprep.subr.mxu0 %v14571_v0  ;;  %v11031_v31 = vld [vmem:[%s18805_s7] sm:$0xff] }
 0xa4e   :  { %14521 = vmatprep.subr.mxu1 %v14571_v0  ;;  %14495 = vmatpush3.msra.mxu0 %v10036_v17 }
 0xa4f   :  { %14496 = vmatprep.mubr.msk.f32.mxu0 %vm14572_vm1, %v14571_v0  ;;  %14522 = vmatpush3.msra.mxu1 %v18481_v61 }
 0xa50   :  { %14497 = vmatmul.mubr.f32.vlgmr.msra.gmra.mxu0 %v15029_v58  ;;  %14523 = vmatprep.subr.mxu1 %v14571_v0 }
 0xa51   :  { %14524 = vmatpush3.msra.mxu1 %v18496_v54  ;;  %14531 = vmatprep.mubr.msk.f32.mxu1 %vm14572_vm1, %v14571_v0 }
 0xa52   :  { %14525 = vmatprep.subr.mxu1 %v14571_v0  ;;  %10987 = vperm.xlu1 %14568, %v10979_v41  }
 0xa53   :  { %14526 = vmatpush3.msra.mxu1 %v18511_v3 }
 0xa54   :  { %14527 = vmatprep.subr.mxu1 %v14571_v0 }
 0xa55   :  { %14528 = vmatpush3.msra.mxu1 %v18526_v23 }
 0xa56   :  { %14529 = vmatprep.subr.mxu1 %v14571_v0  ;;  %v10556_v0 = vsub.f32 %v18758_v9, %v10555_v44  ;;  %11021 = vperm.xlu1 %14568, %v11017_v60  }
 0xa57   :  { %14530 = vmatpush3.msra.mxu1 %v18537_v53 }
 0xa58   :  { %14532 = vmatmul.mubr.f32.vlgmr.msra.gmra.mxu1 %v15029_v58  ;;  %v10557_v58 = vand.u32 4294901760, %v10556_v0 }
 0xa59   :  { %14541 = vmatprep.mubr.f32.mxu1 %v18755_v24 }
 0xa5a   :  { %14536 = vmatprep.mubr.f32.mxu0 %v10557_v58  ;;  %11035 = vperm.xlu1 %14568, %v11031_v31  }
 0xaa3   :  { %v14298_v28 = vpop.f32.mrf.mxu0 }
 0xaa5   :  { %v9401_v40 = vpop.f32.mrf.mxu0 }
 0xaa7   :  { %v14308_v7 = vpop.f32.mrf.mxu0 }
 0xaa9   :  { %v9567_v1 = vpop.f32.mrf.mxu0 }
 0xaab   :  { %v14303_v33 = vpop.f32.mrf.mxu1 }
 0xaac   :  { %v9494_v52 = vadd.f32 %v14303_v33, %v14298_v28  ;;  %v14318_v50 = vpop.f32.mrf.mxu0 }
 0xaad   :  { %v9487_v42 = vpop.f32.mrf.mxu1 }
 0xaae   :  { %v9575_v34 = vadd.f32 %v14308_v7, %v9494_v52  ;;  %v9488_v21 = vadd.f32 %v9487_v42, %v9401_v40  ;;  %v9730_v26 = vpop.f32.mrf.mxu0 }
 0xaaf   :  { %v14313_v16 = vpop.f32.mrf.mxu1 }
 0xab0   :  { %v9568_v2 = vadd.f32 %v9567_v1, %v9488_v21  ;;  %v9657_v47 = vadd.f32 %v14313_v16, %v9575_v34 }
 0xab1   :  { %v9648_v10 = vpop.f32.mrf.mxu1 }
 0xab2   :  { %v9737_v14 = vadd.f32 %v14318_v50, %v9657_v47  ;;  %v9649_v18 = vadd.f32 %v9648_v10, %v9568_v2 }
 0xab3   :  { %v14323_v27 = vpop.f32.mrf.mxu1 }
 0xab4   :  { %v9731_v32 = vadd.f32 %v9730_v26, %v9649_v18  ;;  %v9815_v48 = vadd.f32 %v14323_v27, %v9737_v14  ;;  %v10983_v14 = vpop.permute.xlu0 %10982 }
 0xab5   :  { %v9808_v36 = vpop.f32.mrf.mxu1 }
 0xab6   :  { %v18775_v29 = vadd.f32 %v9815_v48, %v18320_v30  ;;  %v9809_v63 = vadd.f32 %v9808_v36, %v9731_v32  ;;  %v10485_v30 = vsel %vm1881_vm2, %v11208_v11, 0 }
 0xab7   :  { %v10563_v23 = vand.u32 4294901760, %v10485_v30 }
 0xab8   :  { %v18778_v59 = vadd.f32 %v9809_v63, %v18323_v5 }
 0xab9   :  { %v10564_v57 = vsub.f32 %v10485_v30, %v10563_v23 }
 0xabb   :  { %v10565_v8 = vand.u32 4294901760, %v10564_v57 }
 0xabd   :  { %v10566_v43 = vsub.f32 %v10564_v57, %v10565_v8 }
 0xabf   :  { %v10567_v39 = vand.u32 4294901760, %v10566_v43 }
 0xacc   :  { %v9924_v61 = vpop.f32.mrf.mxu0 }
 0xacd   :  { %v10988_v18 = vpop.permute.xlu1 %10987 }
 0xace   :  { %v14358_v15 = vpop.f32.mrf.mxu0 }
 0xad5   :  { %v10075_v13 = vpop.f32.mrf.mxu1 }
 0xad6   :  { %v10076_v5 = vadd.f32 %v10075_v13, %v9924_v61 }
 0xad7   :  { %v14393_v54 = vpop.f32.mrf.mxu1 }
 0xaee   :  { %v10179_v4 = vpop.f32.mrf.mxu0 }
 0xaef   :  { %v10180_v56 = vadd.f32 %v10179_v4, %v10076_v5 }
 0xaf0   :  { %v14428_v51 = vpop.f32.mrf.mxu0 }
 0xaf7   :  { %v10268_v3 = vpop.f32.mrf.mxu1 }
 0xaf8   :  { %v10269_v62 = vadd.f32 %v10268_v3, %v10180_v56  ;;  %v11022_v56 = vpop.permute.xlu1 %11021 }
 0xaf9   :  { %v14463_v45 = vpop.f32.mrf.mxu1 }
 0xb10   :  { %v10387_v53 = vpop.f32.mrf.mxu0 }
 0xb11   :  { %v10388_v35 = vadd.f32 %v10387_v53, %v10269_v62 }
 0xb12   :  { %v14498_v20 = vpop.f32.mrf.mxu0 }
 0xb13   :  { %v11027_v20 = vpop.permute.xlu0 %11026 }
 0xb18   :  { %v10474_v19 = vpop.f32.mrf.mxu1 }
 0xb19   :  { %v10475_v37 = vadd.f32 %v10474_v19, %v10388_v35 }
 0xb1a   :  { %v14533_v22 = vpop.f32.mrf.mxu1 }
 0xb1b   :  { %v10518_v17 = vand.u32 4294901760, %v10475_v37  ;;  %v11209_v22 = vld [vmem:[%s18810_s9] ss:$0 sm:$0xff] }
 0xb1d   :  { %v10605_v46 = vsub.f32 %v10475_v37, %v10518_v17  ;;  %14534 = vmatprep.subr.mxu0 %v10518_v17  ;;  %v11041_v37 = vpop.permute.xlu0 %11040 }
 0xb1e   :  { %14535 = vmatpush3.msra.mxu0 %v10518_v17 }
 0xb1f   :  { %14537 = vmatmul.mubr.f32.vlgmr.msra.gmra.mxu0 %v10567_v39  ;;  %14544 = vmatprep.subr.mxu0 %v10605_v46  ;;  %v10606_v49 = vand.u32 4294901760, %v10605_v46 }
 0xb20   :  { %14545 = vmatpush3.msra.mxu0 %v10605_v46  ;;  %14546 = vmatprep.mubr.f32.mxu0 %v18758_v9 }
 0xb21   :  { %14554 = vmatprep.subr.mxu0 %v10606_v49  ;;  %v10607_v25 = vsub.f32 %v10605_v46, %v10606_v49 }
 0xb23   :  { %14547 = vmatmul.mubr.f32.vlgmr.msra.gmra.mxu0 %v10564_v57  ;;  %v10608_v55 = vand.u32 4294901760, %v10607_v25 }
 0xb24   :  { %14555 = vmatpush3.msra.mxu0 %v10606_v49  ;;  %14556 = vmatprep.mubr.f32.mxu0 %v18755_v24 }
 0xb25   :  { %14539 = vmatprep.subr.mxu1 %v10608_v55 }
 0xb26   :  { %14540 = vmatpush3.msra.mxu1 %v10608_v55 }
 0xb27   :  { %14542 = vmatmul.mubr.f32.vlgmr.msra.gmra.mxu1 %v10563_v23  ;;  %14549 = vmatprep.subr.mxu1 %v10518_v17 }
 0xb28   :  { %14550 = vmatpush3.msra.mxu1 %v10518_v17  ;;  %14551 = vmatprep.mubr.f32.mxu1 %v10555_v44 }
 0xb29   :  { %14559 = vmatprep.subr.mxu1 %v10518_v17  ;;  %14557 = vmatmul.mubr.f32.vlgmr.msra.gmra.mxu0 %v10563_v23 }
 0xb2b   :  { %14552 = vmatmul.mubr.f32.vlgmr.msra.gmra.mxu1 %v10565_v8 }
 0xb2c   :  { %14560 = vmatpush3.msra.mxu1 %v10518_v17  ;;  %14561 = vmatprep.mubr.f32.mxu1 %v18755_v24  ;;  %v11036_v17 = vpop.permute.xlu1 %11035 }
 0xb2f   :  { %14562 = vmatmul.mubr.f32.vlgmr.msra.gmra.mxu1 %v10563_v23 }
 0xbdf   :  { %v14538_v38 = vpop.f32.mrf.mxu0 }
 0xbe1   :  { %v10559_v6 = vpop.f32.mrf.mxu0 }
 0xbe3   :  { %v14548_v12 = vpop.f32.mrf.mxu0 }
 0xbe5   :  { %v10725_v58 = vpop.f32.mrf.mxu0 }
 0xbe7   :  { %v14543_v0 = vpop.f32.mrf.mxu1 }
 0xbe8   :  { %v10652_v28 = vadd.f32 %v14543_v0, %v14538_v38 }
 0xbe9   :  { %v10645_v40 = vpop.f32.mrf.mxu1  ;;  %v14558_v52 = vpop.f32.mrf.mxu0 }
 0xbea   :  { %v10646_v7 = vadd.f32 %v10645_v40, %v10559_v6  ;;  %v10733_v33 = vadd.f32 %v14548_v12, %v10652_v28 }
 0xbeb   :  { %v14553_v1 = vpop.f32.mrf.mxu1  ;;  %v10888_v16 = vpop.f32.mrf.mxu0 }
 0xbec   :  { %v10726_v9 = vadd.f32 %v10725_v58, %v10646_v7  ;;  %v10815_v44 = vadd.f32 %v14553_v1, %v10733_v33 }
 0xbed   :  { %v10806_v42 = vpop.f32.mrf.mxu1 }
 0xbee   :  { %v10807_v34 = vadd.f32 %v10806_v42, %v10726_v9  ;;  %v10895_v21 = vadd.f32 %v14558_v52, %v10815_v44 }
 0xbef   :  { %v14563_v50 = vpop.f32.mrf.mxu1 }
 0xbf0   :  { %v10889_v24 = vadd.f32 %v10888_v16, %v10807_v34  ;;  %v10973_v41 = vadd.f32 %v14563_v50, %v10895_v21 }
 0xbf1   :  { %v10966_v2 = vpop.f32.mrf.mxu1 }
 0xbf2   :  { %v10977_v47 = vadd.f32 %v10973_v41, %v18775_v29  ;;  %v10967_v10 = vadd.f32 %v10966_v2, %v10889_v24 }
 0xbf4   :  { %v10976_v60 = vadd.f32 %v10967_v10, %v18778_v59  ;;  %v10991_v26 = vadd.f32 %v10988_v18, %v10977_v47 }
 0xbf6   :  { %v10990_v27 = vadd.f32 %v10983_v14, %v10976_v60 }
 0xbf8   :  { %v10992_v32 = vadd.f32 %v10991_v26, %v10990_v27 }
 0xbfa   :  { %v10993_v48 = vrot.slane %v10992_v32, 4 }
 0xbfc   :  { %v10994_v36 = vadd.f32 %v10993_v48, %v10992_v32 }
 0xbfe   :  { %v10995_v31 = vrot.slane %v10994_v36, 2 }
 0xc00   :  { %v10996_v63 = vadd.f32 %v10995_v31, %v10994_v36 }
 0xc02   :  { %v10997_v61 = vrot.slane %v10996_v63, 1 }
 0xc04   :  { %v10998_v15 = vadd.f32 %v10997_v61, %v10996_v63 }
 0xc06   :  { %v11000_v13 = vmul.f32 0.0625, %v10998_v15 }
 0xc08   :  { %v11001_v54 = vsub.f32 %v10990_v27, %v11000_v13  ;;  %v11002_v4 = vsub.f32 %v10991_v26, %v11000_v13 }
 0xc0a   :  { %v11003_v51 = vmul.f32 %v11001_v54, %v11001_v54  ;;  %v11004_v3 = vmul.f32 %v11002_v4, %v11002_v4 }
 0xc0c   :  { %v11005_v29 = vadd.f32 %v11004_v3, %v11003_v51 }
 0xc0e   :  { %v11006_v45 = vrot.slane %v11005_v29, 4 }
 0xc10   :  { %v11007_v11 = vadd.f32 %v11006_v45, %v11005_v29 }
 0xc12   :  { %v11008_v59 = vrot.slane %v11007_v11, 2 }
 0xc14   :  { %v11009_v30 = vadd.f32 %v11008_v59, %v11007_v11 }
 0xc16   :  { %v11010_v23 = vrot.slane %v11009_v30, 1 }
 0xc18   :  { %v11011_v57 = vadd.f32 %v11010_v23, %v11009_v30 }
 0xc1a   :  { %v11012_v53 = vmul.f32 0.0625, %v11011_v57 }
 0xc1c   :  { %v11013_v5 = vadd.f32 1e-06, %v11012_v53 }
 0xc1e   :  { %14569 = vrsqrt.f32 %v11013_v5 }
 0xc2b   :  { %v14570_v8 = vpop.eup %14569 }
 0xc2c   :  { %v11015_v62 = vmul.f32 %v14570_v8, %v11001_v54  ;;  %v11016_v35 = vmul.f32 %v14570_v8, %v11002_v4 }
 0xc2e   :  { %v11029_v43 = vmul.f32 %v11022_v56, %v11015_v62  ;;  %v11030_v19 = vmul.f32 %v11027_v20, %v11016_v35 }
 0xc30   :  { %v11043_v39 = vadd.f32 %v11036_v17, %v11029_v43  ;;  %v11044_v46 = vadd.f32 %v11041_v37, %v11030_v19 }
 0xc32   :  { %v11052_v49 = vmul.f32 %v11209_v22, %v11043_v39  ;;  %v11053_v25 = vmul.f32 %v11209_v22, %v11044_v46 }
 0xc34   :  { %11054 = vst [vmem:[%s18811_s11] sm:$0xff] %v11052_v49  ;;  %11055 = vst [vmem:[%s18811_s11 + $0x8] sm:$0xff] %v11053_v25 }

</bundles_post_ra>
